<compile_context>
chip_gen: v7x
topology: tpu7x:2x2x1
jax: 0.10.0
libtpu: 0.0.40
codegen_flags: <defaults>
</compile_context>

<pallas_src>
import numpy as np
import jax
import jax.numpy as jnp
from jax.experimental import pallas as pl
from jax.experimental.pallas import tpu as pltpu

DIM = 54                          # logical embedding dim (hard-coded np.zeros(54))
DP = 128                          # padded embedding dim (lane-dense)
N_GNN_LAYERS = 4                  # gnn() loops range(4)
N_MLP_LAYERS = 9                  # mlp() loops range(9)
MLP_DIM = 2 * DIM + 61            # 169
MP = 256                          # padded MLP width
DESC_LEN = MLP_DIM - 2 * DIM - 4  # 57
SD_PAD = 128                      # [HOMO_D, LUMO_D, HOMO_A, LUMO_A, desc(57)] padded
SENTINEL = 22222222


def _pad_to(x, shape):
    return jnp.pad(x, [(0, s - d) for d, s in zip(x.shape, shape)])


# ----------------------------------------------------------------------------
# Kernel 1 (grid=(B,), batch-parallel): embedding + merged donor/acceptor GNN
# on the block-diagonal graph + selection-matmul molecular sums + first
# (concat-decomposed) MLP layer.  Weights are VMEM-resident across grid steps.
# ----------------------------------------------------------------------------
def gnn_kernel(fps_ref, adj_ref, sel_ref, sd_ref,
               embed_ref, wfp_ref, bfp_ref,
               w1d_ref, w1a_ref, w1sd_ref, b1_ref,
               h1_ref):
    fps = fps_ref[...]                                   # (2*N_PAD, 1) int32
    n2 = fps.shape[0]
    nfp = embed_ref.shape[0]

    # One-hot embedding lookup on the MXU.  Sentinel (22222222) and padding ids
    # match no column -> zero rows, reproducing the reference's
    # delete-then-reinsert-zeros behaviour.
    iota = jax.lax.broadcasted_iota(jnp.int32, (n2, nfp), 1)
    onehot = (fps == iota).astype(jnp.float32)            # (2N, NFP_PAD)
    v = jnp.dot(onehot, embed_ref[...], preferred_element_type=jnp.float32)

    adj = adj_ref[...]                                     # block-diag (2N, 2N)
    for l in range(N_GNN_LAYERS):                          # static, unrolled
        h = jnp.dot(v, wfp_ref[l], preferred_element_type=jnp.float32) + bfp_ref[l]
        h = jnp.maximum(h, 0.0)                            # relu
        hs = h + jnp.dot(adj, h, preferred_element_type=jnp.float32)
        sumsq = jnp.sum(hs * hs, axis=1, keepdims=True)
        # F.normalize(hs, 2, 1): pad lanes are zero so the norm is exact.
        v = hs * jax.lax.rsqrt(jnp.maximum(sumsq, 1e-24))

    # Per-molecule node sums via 0/1 selection matmul (row 0 = donor nodes,
    # row 1 = acceptor nodes; artificial padding nodes are masked out).
    mol = jnp.dot(sel_ref[...], v, preferred_element_type=jnp.float32)   # (8, DP)
    mol_d = mol[0:1, :]
    mol_a = mol[1:2, :]

    # First MLP layer with the 169-feature concat folded into 3 split matmuls:
    # [molD | HOMO_D LUMO_D HOMO_A LUMO_A desc] @ W1 + b1.
    h1 = (jnp.dot(mol_d, w1d_ref[...], preferred_element_type=jnp.float32)
          + jnp.dot(mol_a, w1a_ref[...], preferred_element_type=jnp.float32)
          + jnp.dot(sd_ref[...], w1sd_ref[...], preferred_element_type=jnp.float32)
          + b1_ref[...])
    h1_ref[...] = jnp.maximum(h1, 0.0)


# ----------------------------------------------------------------------------
# Kernel 2 (single call): remaining 8 relu(Linear(256,256)) layers + property
# head on the whole (B, 256) batch at once (weight pushes amortized over B).
# ----------------------------------------------------------------------------
def mlp_kernel(h_ref, wrest_ref, brest_ref, wprop_ref, bprop_ref, out_ref):
    h = h_ref[...]                                         # (B, MP)
    for l in range(N_MLP_LAYERS - 1):
        h = jnp.dot(h, wrest_ref[l], preferred_element_type=jnp.float32) + brest_ref[l]
        h = jnp.maximum(h, 0.0)
    # Lane-dense (B, 128) output slab; only lane 0 is the real prediction.
    out_ref[...] = (jnp.dot(h, wprop_ref[...], preferred_element_type=jnp.float32)
                    + bprop_ref[...])


_VMEM = pl.BlockSpec(memory_space=pltpu.MemorySpace.VMEM)


@jax.jit
def model_forward(prep, fps_b, adj_b, sel_b, sd_b):
    B, n2, _ = fps_b.shape
    nfp_pad = prep["embed"].shape[0]

    per_sample = lambda i: (i, 0, 0)
    const2 = lambda i: (0, 0)
    const3 = lambda i: (0, 0, 0)

    h1 = pl.pallas_call(
        gnn_kernel,
        out_shape=jax.ShapeDtypeStruct((B, 1, MP), jnp.float32),
        grid_spec=pltpu.PrefetchScalarGridSpec(
            num_scalar_prefetch=0,
            grid=(B,),
            in_specs=[
                pl.BlockSpec((None, n2, 1), per_sample),        # fps (stacked D|A)
                pl.BlockSpec((None, n2, n2), per_sample),       # block-diag adjacency
                pl.BlockSpec((None, 8, n2), per_sample),        # selection mask
                pl.BlockSpec((None, 1, SD_PAD), per_sample),    # scalars + descriptors
                pl.BlockSpec((nfp_pad, DP), const2),            # embed table (resident)
                pl.BlockSpec((N_GNN_LAYERS, DP, DP), const3),   # W_fp^T (resident)
                pl.BlockSpec((N_GNN_LAYERS, 1, DP), const3),    # b_fp (resident)
                pl.BlockSpec((DP, MP), const2),                 # W1 rows for molD
                pl.BlockSpec((DP, MP), const2),                 # W1 rows for molA
                pl.BlockSpec((SD_PAD, MP), const2),             # W1 rows for scal+desc
                pl.BlockSpec((1, MP), const2),                  # b1
            ],
            out_specs=pl.BlockSpec((None, 1, MP), per_sample),
        ),
        compiler_params=pltpu.CompilerParams(
            dimension_semantics=("parallel",)),
    )(fps_b, adj_b, sel_b, sd_b,
      prep["embed"], prep["W_fp_T"], prep["b_fp"],
      prep["W1_D"], prep["W1_A"], prep["W1_SD"], prep["b1"])

    out = pl.pallas_call(
        mlp_kernel,
        out_shape=jax.ShapeDtypeStruct((B, DP), jnp.float32),
        in_specs=[_VMEM] * 5,
        out_specs=_VMEM,
    )(h1.reshape(B, MP),
      prep["W_rest"], prep["b_rest"], prep["W_prop"], prep["b_prop"])
    return out[:, 0]                                       # (B,) predictions


# ----------------------------------------------------------------------------
# Parameter construction (PyTorch-equivalent init) and one-time padding/split.
# ----------------------------------------------------------------------------
def init_params(key, n_fingerprints):
    ks = jax.random.split(key, 8)
    lim_fp = 1.0 / jnp.sqrt(DIM)
    lim_out = 1.0 / jnp.sqrt(MLP_DIM)
    embed = jax.random.normal(ks[0], (n_fingerprints, DIM), jnp.float32)
    W_fp = jax.random.uniform(ks[1], (N_GNN_LAYERS, DIM, DIM), jnp.float32, -lim_fp, lim_fp)
    b_fp = jax.random.uniform(ks[2], (N_GNN_LAYERS, DIM), jnp.float32, -lim_fp, lim_fp)
    W_out = jax.random.uniform(ks[3], (N_MLP_LAYERS, MLP_DIM, MLP_DIM), jnp.float32,
                               -lim_out, lim_out)
    b_out = jax.random.uniform(ks[4], (N_MLP_LAYERS, MLP_DIM), jnp.float32, -lim_out, lim_out)
    W_prop = jax.random.uniform(ks[5], (1, MLP_DIM), jnp.float32, -lim_out, lim_out)
    b_prop = jax.random.uniform(ks[6], (1,), jnp.float32, -lim_out, lim_out)
    return dict(embed=embed, W_fp=W_fp, b_fp=b_fp,
                W_out=W_out, b_out=b_out, W_prop=W_prop, b_prop=b_prop)


def prepare_params(p):
    """Transpose to (in, out), split first MLP layer, zero-pad to 128/256 lanes."""
    nfp = p["embed"].shape[0]
    nfp_pad = ((nfp + 127) // 128) * 128
    embed = _pad_to(p["embed"], (nfp_pad, DP))
    W_fp_T = _pad_to(jnp.transpose(p["W_fp"], (0, 2, 1)), (N_GNN_LAYERS, DP, DP))
    b_fp = _pad_to(p["b_fp"][:, None, :], (N_GNN_LAYERS, 1, DP))

    # Concatenated 169-vector layout:
    #   [0:54]=molD, 54=HOMO_D, 55=LUMO_D, [56:110]=molA, 110=HOMO_A,
    #   111=LUMO_A, [112:169]=descriptors
    W1_T = p["W_out"][0].T                                  # (169 in, 169 out)
    W1_D = _pad_to(W1_T[0:DIM, :], (DP, MP))
    W1_A = _pad_to(W1_T[DIM + 2:2 * DIM + 2, :], (DP, MP))
    # Scalars + descriptors stacked into one weight; matches sd input layout
    # [HOMO_D, LUMO_D, HOMO_A, LUMO_A, desc(57), zeros...].
    sd_rows = jnp.concatenate([W1_T[DIM:DIM + 2, :],
                               W1_T[2 * DIM + 2:2 * DIM + 4, :],
                               W1_T[2 * DIM + 4:, :]], axis=0)   # (61, 169)
    W1_SD = _pad_to(sd_rows, (SD_PAD, MP))
    b1 = _pad_to(p["b_out"][0][None, :], (1, MP))

    W_rest = _pad_to(jnp.transpose(p["W_out"][1:], (0, 2, 1)), (N_MLP_LAYERS - 1, MP, MP))
    b_rest = _pad_to(p["b_out"][1:][:, None, :], (N_MLP_LAYERS - 1, 1, MP))

    W_prop = _pad_to(p["W_prop"].T, (MP, DP))               # only column 0 is real
    b_prop = _pad_to(p["b_prop"][None, :], (1, DP))

    return dict(embed=embed, W_fp_T=W_fp_T, b_fp=b_fp,
                W1_D=W1_D, W1_A=W1_A, W1_SD=W1_SD, b1=b1,
                W_rest=W_rest, b_rest=b_rest, W_prop=W_prop, b_prop=b_prop)


# ----------------------------------------------------------------------------
# Host-side packing of one sample: pad both graphs to N_PAD, stack fps, build
# block-diagonal adjacency, 0/1 selection mask and the scal+desc lane vector.
# ----------------------------------------------------------------------------
def pack_sample(fps_D, adj_D, fps_A, adj_A, scal, desc, n_pad):
    n_D, n_A = fps_D.shape[0], fps_A.shape[0]
    fps = jnp.full((2 * n_pad, 1), SENTINEL, jnp.int32)
    fps = fps.at[:n_D, 0].set(fps_D).at[n_pad:n_pad + n_A, 0].set(fps_A)
    adj = jnp.zeros((2 * n_pad, 2 * n_pad), jnp.float32)
    adj = adj.at[:n_D, :n_D].set(adj_D)
    adj = adj.at[n_pad:n_pad + n_A, n_pad:n_pad + n_A].set(adj_A)
    sel = jnp.zeros((8, 2 * n_pad), jnp.float32)
    sel = sel.at[0, :n_D].set(1.0).at[1, n_pad:n_pad + n_A].set(1.0)
    sd = jnp.zeros((1, SD_PAD), jnp.float32)
    sd = sd.at[0, 0:4].set(scal).at[0, 4:4 + desc.shape[0]].set(desc)
    return fps, adj, sel, sd


# ----------------------------------------------------------------------------
# Pure-JAX reference mirroring the PyTorch module (for correctness check).
# ----------------------------------------------------------------------------
def reference_forward(raw, fps_D, adj_D, fps_A, adj_A, scal, desc):
    HP = jax.lax.Precision.HIGHEST

    def gnn_one(fps, adj):
        mask = fps != SENTINEL
        safe = jnp.where(mask, fps, 0)
        v = jnp.where(mask[:, None], raw["embed"][safe], 0.0)
        for l in range(N_GNN_LAYERS):
            h = jnp.maximum(
                jnp.dot(v, raw["W_fp"][l].T, precision=HP) + raw["b_fp"][l], 0.0)
            hs = h + jnp.dot(adj, h, precision=HP)
            norm = jnp.sqrt(jnp.sum(hs * hs, axis=1, keepdims=True))
            v = hs / jnp.maximum(norm, 1e-12)
        return jnp.sum(v, axis=0)

    mol_d = gnn_one(fps_D, adj_D)
    mol_a = gnn_one(fps_A, adj_A)
    x = jnp.concatenate([mol_d, scal[0:2], mol_a, scal[2:4], desc])
    for l in range(N_MLP_LAYERS):
        x = jnp.maximum(jnp.dot(x, raw["W_out"][l].T, precision=HP) + raw["b_out"][l], 0.0)
    return jnp.dot(x, raw["W_prop"][0], precision=HP) + raw["b_prop"][0]


if __name__ == "__main__":
    key = jax.random.PRNGKey(0)
    k_param, k_data = jax.random.split(key)

    N_FINGERPRINTS = 32
    N_PAD = 16                     # per-molecule node padding (multiple of 8)
    B = 4                          # batch of molecule pairs

    raw = init_params(k_param, N_FINGERPRINTS)
    prep = prepare_params(raw)

    sizes = [(16, 12), (12, 16), (14, 9), (10, 13)]
    samples = []
    keys = jax.random.split(k_data, B)
    for b in range(B):
        n_D, n_A = sizes[b]
        kd = jax.random.split(keys[b], 6)
        fps_D = jax.random.randint(kd[0], (n_D,), 0, N_FINGERPRINTS, jnp.int32)
        fps_D = fps_D.at[3].set(SENTINEL)
        adj_D = (jax.random.uniform(kd[1], (n_D, n_D)) > 0.7).astype(jnp.float32)
        adj_D = jnp.maximum(adj_D, adj_D.T)
        fps_A = jax.random.randint(kd[2], (n_A,), 0, N_FINGERPRINTS, jnp.int32)
        fps_A = fps_A.at[5].set(SENTINEL)
        adj_A = (jax.random.uniform(kd[3], (n_A, n_A)) > 0.7).astype(jnp.float32)
        adj_A = jnp.maximum(adj_A, adj_A.T)
        scal = jax.random.normal(kd[4], (4,), jnp.float32) - 4.0   # HOMO_D, LUMO_D, HOMO_A, LUMO_A
        desc = jax.random.normal(kd[5], (DESC_LEN,), jnp.float32)
        samples.append((fps_D, adj_D, fps_A, adj_A, scal, desc))

    packed = [pack_sample(*s, n_pad=N_PAD) for s in samples]
    fps_b = jnp.stack([p[0] for p in packed])
    adj_b = jnp.stack([p[1] for p in packed])
    sel_b = jnp.stack([p[2] for p in packed])
    sd_b = jnp.stack([p[3] for p in packed])

    out = model_forward(prep, fps_b, adj_b, sel_b, sd_b)
    jax.block_until_ready(out)
    assert out.shape == (B,)

    ref = jnp.stack([reference_forward(raw, *s) for s in samples])
    np.testing.assert_allclose(np.asarray(out), np.asarray(ref), rtol=2e-3, atol=2e-3)
    print("KERNEL_OK")
</pallas_src>

<mosaic_0001>
module attributes {stable_mosaic.version = 11 : i64} {
  func.func @gnn_kernel(%arg0: i32, %arg1: memref<1x32x1xi32, #tpu.memory_space<vmem>>, %arg2: memref<1x32x32xf32, #tpu.memory_space<vmem>>, %arg3: memref<1x8x32xf32, #tpu.memory_space<vmem>>, %arg4: memref<1x1x128xf32, #tpu.memory_space<vmem>>, %arg5: memref<128x128xf32, #tpu.memory_space<vmem>>, %arg6: memref<4x128x128xf32, #tpu.memory_space<vmem>>, %arg7: memref<4x1x128xf32, #tpu.memory_space<vmem>>, %arg8: memref<128x256xf32, #tpu.memory_space<vmem>>, %arg9: memref<128x256xf32, #tpu.memory_space<vmem>>, %arg10: memref<128x256xf32, #tpu.memory_space<vmem>>, %arg11: memref<1x256xf32, #tpu.memory_space<vmem>>, %arg12: memref<1x1x256xf32, #tpu.memory_space<vmem>>) attributes {dimension_semantics = [#tpu.dimension_semantics<parallel>], iteration_bounds = array<i64: 4>, scalar_prefetch = 0 : i64, scratch_operands = 0 : i64, tpu.core_type = #tpu.core_type<tc>, window_params = [{transform_indices = @transform_0, window_bounds = array<i64: 1, 32, 1>}, {transform_indices = @transform_1, window_bounds = array<i64: 1, 32, 32>}, {transform_indices = @transform_2, window_bounds = array<i64: 1, 8, 32>}, {transform_indices = @transform_3, window_bounds = array<i64: 1, 1, 128>}, {pipeline_mode = #tpu.pipeline_mode<synchronous>, transform_indices = @transform_4, window_bounds = array<i64: 128, 128>}, {pipeline_mode = #tpu.pipeline_mode<synchronous>, transform_indices = @transform_5, window_bounds = array<i64: 4, 128, 128>}, {pipeline_mode = #tpu.pipeline_mode<synchronous>, transform_indices = @transform_6, window_bounds = array<i64: 4, 1, 128>}, {pipeline_mode = #tpu.pipeline_mode<synchronous>, transform_indices = @transform_7, window_bounds = array<i64: 128, 256>}, {pipeline_mode = #tpu.pipeline_mode<synchronous>, transform_indices = @transform_8, window_bounds = array<i64: 128, 256>}, {pipeline_mode = #tpu.pipeline_mode<synchronous>, transform_indices = @transform_9, window_bounds = array<i64: 128, 256>}, {pipeline_mode = #tpu.pipeline_mode<synchronous>, transform_indices = @transform_10, window_bounds = array<i64: 1, 256>}, {transform_indices = @transform_11, window_bounds = array<i64: 1, 1, 256>}]} {
    %c0 = arith.constant 0 : index
    %c0_0 = arith.constant 0 : index
    %c0_1 = arith.constant 0 : index
    %0 = vector.load %arg1[%c0, %c0_0, %c0_1] : memref<1x32x1xi32, #tpu.memory_space<vmem>>, vector<1x32x1xi32>
    %1 = vector.shape_cast %0 : vector<1x32x1xi32> to vector<32x1xi32>
    %2 = tpu.iota {dimensions = array<i32: 1>} : vector<32x128xi32>
    %3 = vector.broadcast %1 : vector<32x1xi32> to vector<32x128xi32>
    %4 = arith.cmpi eq, %3, %2 : vector<32x128xi32>
    %5 = arith.extui %4 : vector<32x128xi1> to vector<32x128xi32>
    %6 = arith.sitofp %5 : vector<32x128xi32> to vector<32x128xf32>
    %c0_2 = arith.constant 0 : index
    %c0_3 = arith.constant 0 : index
    %7 = vector.load %arg5[%c0_2, %c0_3] : memref<128x128xf32, #tpu.memory_space<vmem>>, vector<128x128xf32>
    %cst = arith.constant dense<0.000000e+00> : vector<32x128xf32>
    %8 = tpu.matmul %6, %7, %cst {dimension_numbers = #tpu.dot_dimension_numbers<[1], [0], [0], [1], [0, 0, 1, 1], [], []>} : vector<32x128xf32>, vector<128x128xf32>, vector<32x128xf32> -> vector<32x128xf32>
    %c0_4 = arith.constant 0 : index
    %c0_5 = arith.constant 0 : index
    %c0_6 = arith.constant 0 : index
    %9 = vector.load %arg2[%c0_4, %c0_5, %c0_6] : memref<1x32x32xf32, #tpu.memory_space<vmem>>, vector<1x32x32xf32>
    %10 = vector.shape_cast %9 : vector<1x32x32xf32> to vector<32x32xf32>
    %c0_7 = arith.constant 0 : index
    %c0_8 = arith.constant 0 : index
    %c0_9 = arith.constant 0 : index
    %11 = vector.load %arg6[%c0_7, %c0_8, %c0_9] : memref<4x128x128xf32, #tpu.memory_space<vmem>>, vector<1x128x128xf32>
    %12 = vector.shape_cast %11 : vector<1x128x128xf32> to vector<128x128xf32>
    %cst_10 = arith.constant dense<0.000000e+00> : vector<32x128xf32>
    %13 = tpu.matmul %8, %12, %cst_10 {dimension_numbers = #tpu.dot_dimension_numbers<[1], [0], [0], [1], [0, 0, 1, 1], [], []>} : vector<32x128xf32>, vector<128x128xf32>, vector<32x128xf32> -> vector<32x128xf32>
    %c0_11 = arith.constant 0 : index
    %c0_12 = arith.constant 0 : index
    %c0_13 = arith.constant 0 : index
    %14 = vector.load %arg7[%c0_11, %c0_12, %c0_13] : memref<4x1x128xf32, #tpu.memory_space<vmem>>, vector<1x1x128xf32>
    %15 = vector.shape_cast %14 : vector<1x1x128xf32> to vector<1x128xf32>
    %16 = vector.broadcast %15 : vector<1x128xf32> to vector<32x128xf32>
    %17 = arith.addf %13, %16 : vector<32x128xf32>
    %cst_14 = arith.constant 0.000000e+00 : f32
    %18 = vector.broadcast %cst_14 : f32 to vector<32x128xf32>
    %19 = arith.maximumf %17, %18 : vector<32x128xf32>
    %cst_15 = arith.constant dense<0.000000e+00> : vector<32x128xf32>
    %20 = tpu.matmul %10, %19, %cst_15 {dimension_numbers = #tpu.dot_dimension_numbers<[1], [0], [0], [1], [0, 0, 1, 1], [], []>} : vector<32x32xf32>, vector<32x128xf32>, vector<32x128xf32> -> vector<32x128xf32>
    %21 = arith.addf %19, %20 : vector<32x128xf32>
    %22 = arith.mulf %21, %21 : vector<32x128xf32>
    %cst_16 = arith.constant dense<0.000000e+00> : vector<32xf32>
    %23 = vector.multi_reduction <add>, %22, %cst_16 [1] : vector<32x128xf32> to vector<32xf32>
    %24 = vector.shape_cast %23 : vector<32xf32> to vector<32x1xf32>
    %cst_17 = arith.constant 1.000000e-24 : f32
    %25 = vector.broadcast %cst_17 : f32 to vector<32x1xf32>
    %26 = arith.maximumf %24, %25 : vector<32x1xf32>
    %27 = math.rsqrt %26 : vector<32x1xf32>
    %28 = vector.broadcast %27 : vector<32x1xf32> to vector<32x128xf32>
    %29 = arith.mulf %21, %28 : vector<32x128xf32>
    %c1 = arith.constant 1 : index
    %c0_18 = arith.constant 0 : index
    %c0_19 = arith.constant 0 : index
    %30 = vector.load %arg6[%c1, %c0_18, %c0_19] : memref<4x128x128xf32, #tpu.memory_space<vmem>>, vector<1x128x128xf32>
    %31 = vector.shape_cast %30 : vector<1x128x128xf32> to vector<128x128xf32>
    %cst_20 = arith.constant dense<0.000000e+00> : vector<32x128xf32>
    %32 = tpu.matmul %29, %31, %cst_20 {dimension_numbers = #tpu.dot_dimension_numbers<[1], [0], [0], [1], [0, 0, 1, 1], [], []>} : vector<32x128xf32>, vector<128x128xf32>, vector<32x128xf32> -> vector<32x128xf32>
    %c1_21 = arith.constant 1 : index
    %c0_22 = arith.constant 0 : index
    %c0_23 = arith.constant 0 : index
    %33 = vector.load %arg7[%c1_21, %c0_22, %c0_23] : memref<4x1x128xf32, #tpu.memory_space<vmem>>, vector<1x1x128xf32>
    %34 = vector.shape_cast %33 : vector<1x1x128xf32> to vector<1x128xf32>
    %35 = vector.broadcast %34 : vector<1x128xf32> to vector<32x128xf32>
    %36 = arith.addf %32, %35 : vector<32x128xf32>
    %cst_24 = arith.constant 0.000000e+00 : f32
    %37 = vector.broadcast %cst_24 : f32 to vector<32x128xf32>
    %38 = arith.maximumf %36, %37 : vector<32x128xf32>
    %cst_25 = arith.constant dense<0.000000e+00> : vector<32x128xf32>
    %39 = tpu.matmul %10, %38, %cst_25 {dimension_numbers = #tpu.dot_dimension_numbers<[1], [0], [0], [1], [0, 0, 1, 1], [], []>} : vector<32x32xf32>, vector<32x128xf32>, vector<32x128xf32> -> vector<32x128xf32>
    %40 = arith.addf %38, %39 : vector<32x128xf32>
    %41 = arith.mulf %40, %40 : vector<32x128xf32>
    %cst_26 = arith.constant dense<0.000000e+00> : vector<32xf32>
    %42 = vector.multi_reduction <add>, %41, %cst_26 [1] : vector<32x128xf32> to vector<32xf32>
    %43 = vector.shape_cast %42 : vector<32xf32> to vector<32x1xf32>
    %cst_27 = arith.constant 1.000000e-24 : f32
    %44 = vector.broadcast %cst_27 : f32 to vector<32x1xf32>
    %45 = arith.maximumf %43, %44 : vector<32x1xf32>
    %46 = math.rsqrt %45 : vector<32x1xf32>
    %47 = vector.broadcast %46 : vector<32x1xf32> to vector<32x128xf32>
    %48 = arith.mulf %40, %47 : vector<32x128xf32>
    %c2 = arith.constant 2 : index
    %c0_28 = arith.constant 0 : index
    %c0_29 = arith.constant 0 : index
    %49 = vector.load %arg6[%c2, %c0_28, %c0_29] : memref<4x128x128xf32, #tpu.memory_space<vmem>>, vector<1x128x128xf32>
    %50 = vector.shape_cast %49 : vector<1x128x128xf32> to vector<128x128xf32>
    %cst_30 = arith.constant dense<0.000000e+00> : vector<32x128xf32>
    %51 = tpu.matmul %48, %50, %cst_30 {dimension_numbers = #tpu.dot_dimension_numbers<[1], [0], [0], [1], [0, 0, 1, 1], [], []>} : vector<32x128xf32>, vector<128x128xf32>, vector<32x128xf32> -> vector<32x128xf32>
    %c2_31 = arith.constant 2 : index
    %c0_32 = arith.constant 0 : index
    %c0_33 = arith.constant 0 : index
    %52 = vector.load %arg7[%c2_31, %c0_32, %c0_33] : memref<4x1x128xf32, #tpu.memory_space<vmem>>, vector<1x1x128xf32>
    %53 = vector.shape_cast %52 : vector<1x1x128xf32> to vector<1x128xf32>
    %54 = vector.broadcast %53 : vector<1x128xf32> to vector<32x128xf32>
    %55 = arith.addf %51, %54 : vector<32x128xf32>
    %cst_34 = arith.constant 0.000000e+00 : f32
    %56 = vector.broadcast %cst_34 : f32 to vector<32x128xf32>
    %57 = arith.maximumf %55, %56 : vector<32x128xf32>
    %cst_35 = arith.constant dense<0.000000e+00> : vector<32x128xf32>
    %58 = tpu.matmul %10, %57, %cst_35 {dimension_numbers = #tpu.dot_dimension_numbers<[1], [0], [0], [1], [0, 0, 1, 1], [], []>} : vector<32x32xf32>, vector<32x128xf32>, vector<32x128xf32> -> vector<32x128xf32>
    %59 = arith.addf %57, %58 : vector<32x128xf32>
    %60 = arith.mulf %59, %59 : vector<32x128xf32>
    %cst_36 = arith.constant dense<0.000000e+00> : vector<32xf32>
    %61 = vector.multi_reduction <add>, %60, %cst_36 [1] : vector<32x128xf32> to vector<32xf32>
    %62 = vector.shape_cast %61 : vector<32xf32> to vector<32x1xf32>
    %cst_37 = arith.constant 1.000000e-24 : f32
    %63 = vector.broadcast %cst_37 : f32 to vector<32x1xf32>
    %64 = arith.maximumf %62, %63 : vector<32x1xf32>
    %65 = math.rsqrt %64 : vector<32x1xf32>
    %66 = vector.broadcast %65 : vector<32x1xf32> to vector<32x128xf32>
    %67 = arith.mulf %59, %66 : vector<32x128xf32>
    %c3 = arith.constant 3 : index
    %c0_38 = arith.constant 0 : index
    %c0_39 = arith.constant 0 : index
    %68 = vector.load %arg6[%c3, %c0_38, %c0_39] : memref<4x128x128xf32, #tpu.memory_space<vmem>>, vector<1x128x128xf32>
    %69 = vector.shape_cast %68 : vector<1x128x128xf32> to vector<128x128xf32>
    %cst_40 = arith.constant dense<0.000000e+00> : vector<32x128xf32>
    %70 = tpu.matmul %67, %69, %cst_40 {dimension_numbers = #tpu.dot_dimension_numbers<[1], [0], [0], [1], [0, 0, 1, 1], [], []>} : vector<32x128xf32>, vector<128x128xf32>, vector<32x128xf32> -> vector<32x128xf32>
    %c3_41 = arith.constant 3 : index
    %c0_42 = arith.constant 0 : index
    %c0_43 = arith.constant 0 : index
    %71 = vector.load %arg7[%c3_41, %c0_42, %c0_43] : memref<4x1x128xf32, #tpu.memory_space<vmem>>, vector<1x1x128xf32>
    %72 = vector.shape_cast %71 : vector<1x1x128xf32> to vector<1x128xf32>
    %73 = vector.broadcast %72 : vector<1x128xf32> to vector<32x128xf32>
    %74 = arith.addf %70, %73 : vector<32x128xf32>
    %cst_44 = arith.constant 0.000000e+00 : f32
    %75 = vector.broadcast %cst_44 : f32 to vector<32x128xf32>
    %76 = arith.maximumf %74, %75 : vector<32x128xf32>
    %cst_45 = arith.constant dense<0.000000e+00> : vector<32x128xf32>
    %77 = tpu.matmul %10, %76, %cst_45 {dimension_numbers = #tpu.dot_dimension_numbers<[1], [0], [0], [1], [0, 0, 1, 1], [], []>} : vector<32x32xf32>, vector<32x128xf32>, vector<32x128xf32> -> vector<32x128xf32>
    %78 = arith.addf %76, %77 : vector<32x128xf32>
    %79 = arith.mulf %78, %78 : vector<32x128xf32>
    %cst_46 = arith.constant dense<0.000000e+00> : vector<32xf32>
    %80 = vector.multi_reduction <add>, %79, %cst_46 [1] : vector<32x128xf32> to vector<32xf32>
    %81 = vector.shape_cast %80 : vector<32xf32> to vector<32x1xf32>
    %cst_47 = arith.constant 1.000000e-24 : f32
    %82 = vector.broadcast %cst_47 : f32 to vector<32x1xf32>
    %83 = arith.maximumf %81, %82 : vector<32x1xf32>
    %84 = math.rsqrt %83 : vector<32x1xf32>
    %85 = vector.broadcast %84 : vector<32x1xf32> to vector<32x128xf32>
    %86 = arith.mulf %78, %85 : vector<32x128xf32>
    %c0_48 = arith.constant 0 : index
    %c0_49 = arith.constant 0 : index
    %c0_50 = arith.constant 0 : index
    %87 = vector.load %arg3[%c0_48, %c0_49, %c0_50] : memref<1x8x32xf32, #tpu.memory_space<vmem>>, vector<1x8x32xf32>
    %88 = vector.shape_cast %87 : vector<1x8x32xf32> to vector<8x32xf32>
    %cst_51 = arith.constant dense<0.000000e+00> : vector<8x128xf32>
    %89 = tpu.matmul %88, %86, %cst_51 {dimension_numbers = #tpu.dot_dimension_numbers<[1], [0], [0], [1], [0, 0, 1, 1], [], []>} : vector<8x32xf32>, vector<32x128xf32>, vector<8x128xf32> -> vector<8x128xf32>
    %90 = vector.extract_strided_slice %89 {offsets = [0, 0], sizes = [1, 128], strides = [1, 1]} : vector<8x128xf32> to vector<1x128xf32>
    %91 = vector.extract_strided_slice %89 {offsets = [1, 0], sizes = [1, 128], strides = [1, 1]} : vector<8x128xf32> to vector<1x128xf32>
    %c0_52 = arith.constant 0 : index
    %c0_53 = arith.constant 0 : index
    %92 = vector.load %arg8[%c0_52, %c0_53] : memref<128x256xf32, #tpu.memory_space<vmem>>, vector<128x256xf32>
    %cst_54 = arith.constant dense<0.000000e+00> : vector<1x256xf32>
    %93 = tpu.matmul %90, %92, %cst_54 {dimension_numbers = #tpu.dot_dimension_numbers<[1], [0], [0], [1], [0, 0, 1, 1], [], []>} : vector<1x128xf32>, vector<128x256xf32>, vector<1x256xf32> -> vector<1x256xf32>
    %c0_55 = arith.constant 0 : index
    %c0_56 = arith.constant 0 : index
    %94 = vector.load %arg9[%c0_55, %c0_56] : memref<128x256xf32, #tpu.memory_space<vmem>>, vector<128x256xf32>
    %cst_57 = arith.constant dense<0.000000e+00> : vector<1x256xf32>
    %95 = tpu.matmul %91, %94, %cst_57 {dimension_numbers = #tpu.dot_dimension_numbers<[1], [0], [0], [1], [0, 0, 1, 1], [], []>} : vector<1x128xf32>, vector<128x256xf32>, vector<1x256xf32> -> vector<1x256xf32>
    %96 = arith.addf %93, %95 : vector<1x256xf32>
    %c0_58 = arith.constant 0 : index
    %c0_59 = arith.constant 0 : index
    %c0_60 = arith.constant 0 : index
    %97 = vector.load %arg4[%c0_58, %c0_59, %c0_60] : memref<1x1x128xf32, #tpu.memory_space<vmem>>, vector<1x1x128xf32>
    %98 = vector.shape_cast %97 : vector<1x1x128xf32> to vector<1x128xf32>
    %c0_61 = arith.constant 0 : index
    %c0_62 = arith.constant 0 : index
    %99 = vector.load %arg10[%c0_61, %c0_62] : memref<128x256xf32, #tpu.memory_space<vmem>>, vector<128x256xf32>
    %cst_63 = arith.constant dense<0.000000e+00> : vector<1x256xf32>
    %100 = tpu.matmul %98, %99, %cst_63 {dimension_numbers = #tpu.dot_dimension_numbers<[1], [0], [0], [1], [0, 0, 1, 1], [], []>} : vector<1x128xf32>, vector<128x256xf32>, vector<1x256xf32> -> vector<1x256xf32>
    %101 = arith.addf %96, %100 : vector<1x256xf32>
    %c0_64 = arith.constant 0 : index
    %c0_65 = arith.constant 0 : index
    %102 = vector.load %arg11[%c0_64, %c0_65] : memref<1x256xf32, #tpu.memory_space<vmem>>, vector<1x256xf32>
    %103 = arith.addf %101, %102 : vector<1x256xf32>
    %cst_66 = arith.constant 0.000000e+00 : f32
    %104 = vector.broadcast %cst_66 : f32 to vector<1x256xf32>
    %105 = arith.maximumf %103, %104 : vector<1x256xf32>
    %c0_67 = arith.constant 0 : index
    %c0_68 = arith.constant 0 : index
    %c0_69 = arith.constant 0 : index
    %106 = vector.load %arg12[%c0_67, %c0_68, %c0_69] : memref<1x1x256xf32, #tpu.memory_space<vmem>>, vector<1x1x256xf32>
    %107 = vector.shape_cast %106 : vector<1x1x256xf32> to vector<1x256xf32>
    %108 = vector.shape_cast %105 : vector<1x256xf32> to vector<1x1x256xf32>
    tpu.vector_store %arg12[%c0_67, %c0_68, %c0_69], %108 {strides = array<i32>} : memref<1x1x256xf32, #tpu.memory_space<vmem>>, vector<1x1x256xf32>,
    return
  }
  func.func @transform_0(%arg0: i32) -> (i32, i32, i32) {
    %c0_i32 = arith.constant 0 : i32
    %c0_i32_0 = arith.constant 0 : i32
    %c0_i32_1 = arith.constant 0 : i32
    return %arg0, %c0_i32, %c0_i32_0 : i32, i32, i32
  }
  func.func @transform_1(%arg0: i32) -> (i32, i32, i32) {
    %c0_i32 = arith.constant 0 : i32
    %c0_i32_0 = arith.constant 0 : i32
    %c0_i32_1 = arith.constant 0 : i32
    return %arg0, %c0_i32, %c0_i32_0 : i32, i32, i32
  }
  func.func @transform_2(%arg0: i32) -> (i32, i32, i32) {
    %c0_i32 = arith.constant 0 : i32
    %c0_i32_0 = arith.constant 0 : i32
    %c0_i32_1 = arith.constant 0 : i32
    return %arg0, %c0_i32, %c0_i32_0 : i32, i32, i32
  }
  func.func @transform_3(%arg0: i32) -> (i32, i32, i32) {
    %c0_i32 = arith.constant 0 : i32
    %c0_i32_0 = arith.constant 0 : i32
    %c0_i32_1 = arith.constant 0 : i32
    return %arg0, %c0_i32, %c0_i32_0 : i32, i32, i32
  }
  func.func @transform_4(%arg0: i32) -> (i32, i32) {
    %c0_i32 = arith.constant 0 : i32
    %c0_i32_0 = arith.constant 0 : i32
    %c0_i32_1 = arith.constant 0 : i32
    return %c0_i32, %c0_i32_0 : i32, i32
  }
  func.func @transform_5(%arg0: i32) -> (i32, i32, i32) {
    %c0_i32 = arith.constant 0 : i32
    %c0_i32_0 = arith.constant 0 : i32
    %c0_i32_1 = arith.constant 0 : i32
    %c0_i32_2 = arith.constant 0 : i32
    return %c0_i32, %c0_i32_0, %c0_i32_1 : i32, i32, i32
  }
  func.func @transform_6(%arg0: i32) -> (i32, i32, i32) {
    %c0_i32 = arith.constant 0 : i32
    %c0_i32_0 = arith.constant 0 : i32
    %c0_i32_1 = arith.constant 0 : i32
    %c0_i32_2 = arith.constant 0 : i32
    return %c0_i32, %c0_i32_0, %c0_i32_1 : i32, i32, i32
  }
  func.func @transform_7(%arg0: i32) -> (i32, i32) {
    %c0_i32 = arith.constant 0 : i32
    %c0_i32_0 = arith.constant 0 : i32
    %c0_i32_1 = arith.constant 0 : i32
    return %c0_i32, %c0_i32_0 : i32, i32
  }
  func.func @transform_8(%arg0: i32) -> (i32, i32) {
    %c0_i32 = arith.constant 0 : i32
    %c0_i32_0 = arith.constant 0 : i32
    %c0_i32_1 = arith.constant 0 : i32
    return %c0_i32, %c0_i32_0 : i32, i32
  }
  func.func @transform_9(%arg0: i32) -> (i32, i32) {
    %c0_i32 = arith.constant 0 : i32
    %c0_i32_0 = arith.constant 0 : i32
    %c0_i32_1 = arith.constant 0 : i32
    return %c0_i32, %c0_i32_0 : i32, i32
  }
  func.func @transform_10(%arg0: i32) -> (i32, i32) {
    %c0_i32 = arith.constant 0 : i32
    %c0_i32_0 = arith.constant 0 : i32
    %c0_i32_1 = arith.constant 0 : i32
    return %c0_i32, %c0_i32_0 : i32, i32
  }
  func.func @transform_11(%arg0: i32) -> (i32, i32, i32) {
    %c0_i32 = arith.constant 0 : i32
    %c0_i32_0 = arith.constant 0 : i32
    %c0_i32_1 = arith.constant 0 : i32
    return %arg0, %c0_i32, %c0_i32_0 : i32, i32, i32
  }
}

module attributes {stable_mosaic.version = 11 : i64} {
  func.func @mlp_kernel(%arg0: memref<4x256xf32, #tpu.memory_space<vmem>>, %arg1: memref<8x256x256xf32, #tpu.memory_space<vmem>>, %arg2: memref<8x1x256xf32, #tpu.memory_space<vmem>>, %arg3: memref<256x128xf32, #tpu.memory_space<vmem>>, %arg4: memref<1x128xf32, #tpu.memory_space<vmem>>, %arg5: memref<4x128xf32, #tpu.memory_space<vmem>>) attributes {dimension_semantics = [], scalar_prefetch = 0 : i64, scratch_operands = 0 : i64, tpu.core_type = #tpu.core_type<tc>} {
    %c0 = arith.constant 0 : index
    %c0_0 = arith.constant 0 : index
    %0 = vector.load %arg0[%c0, %c0_0] : memref<4x256xf32, #tpu.memory_space<vmem>>, vector<4x256xf32>
    %c0_1 = arith.constant 0 : index
    %c0_2 = arith.constant 0 : index
    %c0_3 = arith.constant 0 : index
    %1 = vector.load %arg1[%c0_1, %c0_2, %c0_3] : memref<8x256x256xf32, #tpu.memory_space<vmem>>, vector<1x256x256xf32>
    %2 = vector.shape_cast %1 : vector<1x256x256xf32> to vector<256x256xf32>
    %cst = arith.constant dense<0.000000e+00> : vector<4x256xf32>
    %3 = tpu.matmul %0, %2, %cst {dimension_numbers = #tpu.dot_dimension_numbers<[1], [0], [0], [1], [0, 0, 1, 1], [], []>} : vector<4x256xf32>, vector<256x256xf32>, vector<4x256xf32> -> vector<4x256xf32>
    %c0_4 = arith.constant 0 : index
    %c0_5 = arith.constant 0 : index
    %c0_6 = arith.constant 0 : index
    %4 = vector.load %arg2[%c0_4, %c0_5, %c0_6] : memref<8x1x256xf32, #tpu.memory_space<vmem>>, vector<1x1x256xf32>
    %5 = vector.shape_cast %4 : vector<1x1x256xf32> to vector<1x256xf32>
    %6 = vector.broadcast %5 : vector<1x256xf32> to vector<4x256xf32>
    %7 = arith.addf %3, %6 : vector<4x256xf32>
    %cst_7 = arith.constant 0.000000e+00 : f32
    %8 = vector.broadcast %cst_7 : f32 to vector<4x256xf32>
    %9 = arith.maximumf %7, %8 : vector<4x256xf32>
    %c1 = arith.constant 1 : index
    %c0_8 = arith.constant 0 : index
    %c0_9 = arith.constant 0 : index
    %10 = vector.load %arg1[%c1, %c0_8, %c0_9] : memref<8x256x256xf32, #tpu.memory_space<vmem>>, vector<1x256x256xf32>
    %11 = vector.shape_cast %10 : vector<1x256x256xf32> to vector<256x256xf32>
    %cst_10 = arith.constant dense<0.000000e+00> : vector<4x256xf32>
    %12 = tpu.matmul %9, %11, %cst_10 {dimension_numbers = #tpu.dot_dimension_numbers<[1], [0], [0], [1], [0, 0, 1, 1], [], []>} : vector<4x256xf32>, vector<256x256xf32>, vector<4x256xf32> -> vector<4x256xf32>
    %c1_11 = arith.constant 1 : index
    %c0_12 = arith.constant 0 : index
    %c0_13 = arith.constant 0 : index
    %13 = vector.load %arg2[%c1_11, %c0_12, %c0_13] : memref<8x1x256xf32, #tpu.memory_space<vmem>>, vector<1x1x256xf32>
    %14 = vector.shape_cast %13 : vector<1x1x256xf32> to vector<1x256xf32>
    %15 = vector.broadcast %14 : vector<1x256xf32> to vector<4x256xf32>
    %16 = arith.addf %12, %15 : vector<4x256xf32>
    %cst_14 = arith.constant 0.000000e+00 : f32
    %17 = vector.broadcast %cst_14 : f32 to vector<4x256xf32>
    %18 = arith.maximumf %16, %17 : vector<4x256xf32>
    %c2 = arith.constant 2 : index
    %c0_15 = arith.constant 0 : index
    %c0_16 = arith.constant 0 : index
    %19 = vector.load %arg1[%c2, %c0_15, %c0_16] : memref<8x256x256xf32, #tpu.memory_space<vmem>>, vector<1x256x256xf32>
    %20 = vector.shape_cast %19 : vector<1x256x256xf32> to vector<256x256xf32>
    %cst_17 = arith.constant dense<0.000000e+00> : vector<4x256xf32>
    %21 = tpu.matmul %18, %20, %cst_17 {dimension_numbers = #tpu.dot_dimension_numbers<[1], [0], [0], [1], [0, 0, 1, 1], [], []>} : vector<4x256xf32>, vector<256x256xf32>, vector<4x256xf32> -> vector<4x256xf32>
    %c2_18 = arith.constant 2 : index
    %c0_19 = arith.constant 0 : index
    %c0_20 = arith.constant 0 : index
    %22 = vector.load %arg2[%c2_18, %c0_19, %c0_20] : memref<8x1x256xf32, #tpu.memory_space<vmem>>, vector<1x1x256xf32>
    %23 = vector.shape_cast %22 : vector<1x1x256xf32> to vector<1x256xf32>
    %24 = vector.broadcast %23 : vector<1x256xf32> to vector<4x256xf32>
    %25 = arith.addf %21, %24 : vector<4x256xf32>
    %cst_21 = arith.constant 0.000000e+00 : f32
    %26 = vector.broadcast %cst_21 : f32 to vector<4x256xf32>
    %27 = arith.maximumf %25, %26 : vector<4x256xf32>
    %c3 = arith.constant 3 : index
    %c0_22 = arith.constant 0 : index
    %c0_23 = arith.constant 0 : index
    %28 = vector.load %arg1[%c3, %c0_22, %c0_23] : memref<8x256x256xf32, #tpu.memory_space<vmem>>, vector<1x256x256xf32>
    %29 = vector.shape_cast %28 : vector<1x256x256xf32> to vector<256x256xf32>
    %cst_24 = arith.constant dense<0.000000e+00> : vector<4x256xf32>
    %30 = tpu.matmul %27, %29, %cst_24 {dimension_numbers = #tpu.dot_dimension_numbers<[1], [0], [0], [1], [0, 0, 1, 1], [], []>} : vector<4x256xf32>, vector<256x256xf32>, vector<4x256xf32> -> vector<4x256xf32>
    %c3_25 = arith.constant 3 : index
    %c0_26 = arith.constant 0 : index
    %c0_27 = arith.constant 0 : index
    %31 = vector.load %arg2[%c3_25, %c0_26, %c0_27] : memref<8x1x256xf32, #tpu.memory_space<vmem>>, vector<1x1x256xf32>
    %32 = vector.shape_cast %31 : vector<1x1x256xf32> to vector<1x256xf32>
    %33 = vector.broadcast %32 : vector<1x256xf32> to vector<4x256xf32>
    %34 = arith.addf %30, %33 : vector<4x256xf32>
    %cst_28 = arith.constant 0.000000e+00 : f32
    %35 = vector.broadcast %cst_28 : f32 to vector<4x256xf32>
    %36 = arith.maximumf %34, %35 : vector<4x256xf32>
    %c4 = arith.constant 4 : index
    %c0_29 = arith.constant 0 : index
    %c0_30 = arith.constant 0 : index
    %37 = vector.load %arg1[%c4, %c0_29, %c0_30] : memref<8x256x256xf32, #tpu.memory_space<vmem>>, vector<1x256x256xf32>
    %38 = vector.shape_cast %37 : vector<1x256x256xf32> to vector<256x256xf32>
    %cst_31 = arith.constant dense<0.000000e+00> : vector<4x256xf32>
    %39 = tpu.matmul %36, %38, %cst_31 {dimension_numbers = #tpu.dot_dimension_numbers<[1], [0], [0], [1], [0, 0, 1, 1], [], []>} : vector<4x256xf32>, vector<256x256xf32>, vector<4x256xf32> -> vector<4x256xf32>
    %c4_32 = arith.constant 4 : index
    %c0_33 = arith.constant 0 : index
    %c0_34 = arith.constant 0 : index
    %40 = vector.load %arg2[%c4_32, %c0_33, %c0_34] : memref<8x1x256xf32, #tpu.memory_space<vmem>>, vector<1x1x256xf32>
    %41 = vector.shape_cast %40 : vector<1x1x256xf32> to vector<1x256xf32>
    %42 = vector.broadcast %41 : vector<1x256xf32> to vector<4x256xf32>
    %43 = arith.addf %39, %42 : vector<4x256xf32>
    %cst_35 = arith.constant 0.000000e+00 : f32
    %44 = vector.broadcast %cst_35 : f32 to vector<4x256xf32>
    %45 = arith.maximumf %43, %44 : vector<4x256xf32>
    %c5 = arith.constant 5 : index
    %c0_36 = arith.constant 0 : index
    %c0_37 = arith.constant 0 : index
    %46 = vector.load %arg1[%c5, %c0_36, %c0_37] : memref<8x256x256xf32, #tpu.memory_space<vmem>>, vector<1x256x256xf32>
    %47 = vector.shape_cast %46 : vector<1x256x256xf32> to vector<256x256xf32>
    %cst_38 = arith.constant dense<0.000000e+00> : vector<4x256xf32>
    %48 = tpu.matmul %45, %47, %cst_38 {dimension_numbers = #tpu.dot_dimension_numbers<[1], [0], [0], [1], [0, 0, 1, 1], [], []>} : vector<4x256xf32>, vector<256x256xf32>, vector<4x256xf32> -> vector<4x256xf32>
    %c5_39 = arith.constant 5 : index
    %c0_40 = arith.constant 0 : index
    %c0_41 = arith.constant 0 : index
    %49 = vector.load %arg2[%c5_39, %c0_40, %c0_41] : memref<8x1x256xf32, #tpu.memory_space<vmem>>, vector<1x1x256xf32>
    %50 = vector.shape_cast %49 : vector<1x1x256xf32> to vector<1x256xf32>
    %51 = vector.broadcast %50 : vector<1x256xf32> to vector<4x256xf32>
    %52 = arith.addf %48, %51 : vector<4x256xf32>
    %cst_42 = arith.constant 0.000000e+00 : f32
    %53 = vector.broadcast %cst_42 : f32 to vector<4x256xf32>
    %54 = arith.maximumf %52, %53 : vector<4x256xf32>
    %c6 = arith.constant 6 : index
    %c0_43 = arith.constant 0 : index
    %c0_44 = arith.constant 0 : index
    %55 = vector.load %arg1[%c6, %c0_43, %c0_44] : memref<8x256x256xf32, #tpu.memory_space<vmem>>, vector<1x256x256xf32>
    %56 = vector.shape_cast %55 : vector<1x256x256xf32> to vector<256x256xf32>
    %cst_45 = arith.constant dense<0.000000e+00> : vector<4x256xf32>
    %57 = tpu.matmul %54, %56, %cst_45 {dimension_numbers = #tpu.dot_dimension_numbers<[1], [0], [0], [1], [0, 0, 1, 1], [], []>} : vector<4x256xf32>, vector<256x256xf32>, vector<4x256xf32> -> vector<4x256xf32>
    %c6_46 = arith.constant 6 : index
    %c0_47 = arith.constant 0 : index
    %c0_48 = arith.constant 0 : index
    %58 = vector.load %arg2[%c6_46, %c0_47, %c0_48] : memref<8x1x256xf32, #tpu.memory_space<vmem>>, vector<1x1x256xf32>
    %59 = vector.shape_cast %58 : vector<1x1x256xf32> to vector<1x256xf32>
    %60 = vector.broadcast %59 : vector<1x256xf32> to vector<4x256xf32>
    %61 = arith.addf %57, %60 : vector<4x256xf32>
    %cst_49 = arith.constant 0.000000e+00 : f32
    %62 = vector.broadcast %cst_49 : f32 to vector<4x256xf32>
    %63 = arith.maximumf %61, %62 : vector<4x256xf32>
    %c7 = arith.constant 7 : index
    %c0_50 = arith.constant 0 : index
    %c0_51 = arith.constant 0 : index
    %64 = vector.load %arg1[%c7, %c0_50, %c0_51] : memref<8x256x256xf32, #tpu.memory_space<vmem>>, vector<1x256x256xf32>
    %65 = vector.shape_cast %64 : vector<1x256x256xf32> to vector<256x256xf32>
    %cst_52 = arith.constant dense<0.000000e+00> : vector<4x256xf32>
    %66 = tpu.matmul %63, %65, %cst_52 {dimension_numbers = #tpu.dot_dimension_numbers<[1], [0], [0], [1], [0, 0, 1, 1], [], []>} : vector<4x256xf32>, vector<256x256xf32>, vector<4x256xf32> -> vector<4x256xf32>
    %c7_53 = arith.constant 7 : index
    %c0_54 = arith.constant 0 : index
    %c0_55 = arith.constant 0 : index
    %67 = vector.load %arg2[%c7_53, %c0_54, %c0_55] : memref<8x1x256xf32, #tpu.memory_space<vmem>>, vector<1x1x256xf32>
    %68 = vector.shape_cast %67 : vector<1x1x256xf32> to vector<1x256xf32>
    %69 = vector.broadcast %68 : vector<1x256xf32> to vector<4x256xf32>
    %70 = arith.addf %66, %69 : vector<4x256xf32>
    %cst_56 = arith.constant 0.000000e+00 : f32
    %71 = vector.broadcast %cst_56 : f32 to vector<4x256xf32>
    %72 = arith.maximumf %70, %71 : vector<4x256xf32>
    %c0_57 = arith.constant 0 : index
    %c0_58 = arith.constant 0 : index
    %73 = vector.load %arg3[%c0_57, %c0_58] : memref<256x128xf32, #tpu.memory_space<vmem>>, vector<256x128xf32>
    %cst_59 = arith.constant dense<0.000000e+00> : vector<4x128xf32>
    %74 = tpu.matmul %72, %73, %cst_59 {dimension_numbers = #tpu.dot_dimension_numbers<[1], [0], [0], [1], [0, 0, 1, 1], [], []>} : vector<4x256xf32>, vector<256x128xf32>, vector<4x128xf32> -> vector<4x128xf32>
    %c0_60 = arith.constant 0 : index
    %c0_61 = arith.constant 0 : index
    %75 = vector.load %arg4[%c0_60, %c0_61] : memref<1x128xf32, #tpu.memory_space<vmem>>, vector<1x128xf32>
    %76 = vector.broadcast %75 : vector<1x128xf32> to vector<4x128xf32>
    %77 = arith.addf %74, %76 : vector<4x128xf32>
    %c0_62 = arith.constant 0 : index
    %c0_63 = arith.constant 0 : index
    %78 = vector.load %arg5[%c0_62, %c0_63] : memref<4x128xf32, #tpu.memory_space<vmem>>, vector<4x128xf32>
    tpu.vector_store %arg5[%c0_62, %c0_63], %77 {strides = array<i32>} : memref<4x128xf32, #tpu.memory_space<vmem>>, vector<4x128xf32>,
    return
  }
}

</mosaic_0001>

<bundles_post_ra>
// kernel: model_forward.2
= control target key start
LH: loop header
LB: loop body
LE: loop exit
PB: predicated region body
PF: predicated region fallthrough
CT: control target
= control target key end

     0   :  { %s4055_s0 = inlined_call_operand.vmem [shape: s32[4,32,1], index: 0, kind: input, shape index: {}]   ;;  %s4056_s1 = inlined_call_operand.hbm [shape: f32[4,32,32], index: 1, kind: input, shape index: {}]   ;;  %s4057_s2 = inlined_call_operand.hbm [shape: f32[4,8,32], index: 2, kind: input, shape index: {}]   ;;  %s4058_s3 = inlined_call_operand.hbm [shape: f32[4,1,128], index: 3, kind: input, shape index: {}]   ;;  %s4059_s4 = inlined_call_operand.hbm [shape: f32[128,128], index: 4, kind: input, shape index: {}]   ;;  %s4060_s5 = inlined_call_operand.hbm [shape: f32[4,128,128], index: 5, kind: input, shape index: {}]   ;;  %s4061_s6 = inlined_call_operand.hbm [shape: f32[4,1,128], index: 6, kind: input, shape index: {}]   ;;  %s4062_s7 = inlined_call_operand.hbm [shape: f32[128,256], index: 7, kind: input, shape index: {}]   ;;  %s4063_s8 = inlined_call_operand.hbm [shape: f32[128,256], index: 8, kind: input, shape index: {}]   ;;  %s4064_s9 = inlined_call_operand.hbm [shape: f32[128,256], index: 9, kind: input, shape index: {}]   ;;  %s4065_s10 = inlined_call_operand.hbm [shape: f32[1,256], index: 10, kind: input, shape index: {}]   ;;  %s4066_s11 = inlined_call_operand.vmem [shape: f32[4,1,256], index: 11, kind: output, shape index: {}]  }
   0x1   :  { %4093 = sst [smem:[#allocation29_spill]] %s4055_s0 }
   0x2   :  { %4094 = sst [smem:[#allocation30_spill]] %s4057_s2 }
   0x3   :  { %4095 = sst [smem:[#allocation31_spill]] %s4059_s4 }
   0x4   :  { %4096 = sst [smem:[#allocation32_spill]] %s4060_s5 }
   0x5   :  { %4097 = sst [smem:[#allocation33_spill]] %s4061_s6 }
   0x6   :  { %4098 = sst [smem:[#allocation34_spill]] %s4063_s8 }
   0x7   :  { %4099 = sst [smem:[#allocation35_spill]] %s4066_s11 }
   0x8   :  { %16 = vsyncpa [#allocation3], 0 }
   0x9   :  { %18 = vsyncpa [#allocation3 + $0x1], 0 }
   0xa   :  { %19 = vsyncpa [#allocation5], 0 }
   0xb   :  { %21 = vsyncpa [#allocation5 + $0x1], 0 }
   0xc   :  { %22 = vsyncpa [#allocation8], 0 }
   0xd   :  { %23 = vsyncpa [#allocation11], 0 }
   0xe   :  { %24 = vsyncpa [#allocation14], 0 }
   0xf   :  { %25 = vsyncpa [#allocation17], 0  ;;  %s3601_s17 = smov 0   ;;  %s3603_s18 = smov 0  }
  0x10   :  { %s3605_s19 = smov 0   ;;  %s3607_s20 = smov 0  }
  0x11 LB: > { %4100 = sst [smem:[#allocation24_spill]] %s3514_s19  ;;  %s3520_s21 = smov [#allocation7]   ;;  %s3518_s20 = sphi %s3607_s20, %s4140_s20   ;;  %s3514_s19 = sphi %s3605_s19, %s4142_s19   ;;  %s3510_s18 = sphi %s3603_s18, %s4144_s18   ;;  %s3506_s17 = sphi %s3601_s17, %s4143_s17  }
  0x12   : > { %s325_s22 = sshll.u32 %s3520_s21, 4  ;;  %s3622_s23 = sadd.s32 4294967295, %s3518_s20   ;;  %s3627_s22 = int_to_ptr.vmem [resolvable:$true] %s325_s22 }
  0x13   : > { %4101 = sst [smem:[#allocation25_spill]] %s3622_s23  ;;  %p2260_p0 = scmp.ge.s32.totalorder %s3518_s20, 1 }
  0x14   : > { %p4071_p1 = scmp.eq.s32.totalorder %s3622_s23, 0  ;;  %p313_p2 = scmp.lt.s32.totalorder %s3518_s20, 5 }
  0x15   : > { %s3521_s25 = smov [#allocation10]   ;;  %s4104_s4 = sld [smem:[#allocation31_spill]] }
  0x16   : > { %p3629_p3 = pnand %p2260_p0, %p313_p2  ;;  %s351_s26 = sshll.u32 %s3521_s25, 4  ;;  %s3641_s26 = int_to_ptr.vmem [resolvable:$true] %s351_s26 }
  0x18   : > { %s4102_s24 = scalar_select %p3629_p3, 1, 0 }
  0x19   : > { %p3047_p4 = pneg %p3629_p3 }
  0x1b   : > { %p3637_p5 = pnand %p3047_p4, %p4071_p1  ;;  %s3178_s30 = scalar_lea.hbm %s4104_s4, 2048 }
  0x1c   : > { %p3179_p6 = scmp.ne.s32.totalorder %s4104_s4, %s3178_s30  ;;  %p3185_p10 = scmp.lt.u32.totalorder %s3178_s30, %s4104_s4 }
  0x1d   : > { %s4103_s27 = scalar_select %p3637_p5, 1, 0 }
  0x1e   : > { %p3651_p7 = pneg %p3637_p5 }
  0x20   : > { %s4105_s14 = scalar_select %p3651_p7, 1, 0 }
  0x21   : > { %p3181_p8 = pnand %p3651_p7, %p3179_p6 }
  0x23   : > { %p3182_p9 = pneg %p3181_p8 }
  0x25   : > { %p3187_p11 = pnand %p3185_p10, %p3182_p9 }
  0x27   : > { %3190 = shalt.err (!%p3187_p11)
}
  0x28   : > { %s3191_s21 = scalar_lea.vmem %s3627_s22, 2048  ;;  %p3199_p2 = scmp.lt.s32.totalorder %s3627_s22, %s3627_s22 }
  0x29   : > { %p3192_p12 = scmp.ne.s32.totalorder %s3627_s22, %s3191_s21  ;;  %p3200_p4 = scmp.lt.s32.totalorder %s3191_s21, %s3191_s21 }
  0x2b   : > { %p3194_p13 = pnand %p3192_p12, %p3651_p7  ;;  %p3201_p6 = por %p3200_p4, %p3199_p2 }
  0x2d   : > { %p3195_p0 = pneg %p3194_p13 }
  0x2f   : > { %p3202_p8 = pnand %p3201_p6, %p3195_p0 }
  0x31   : > { %3205 = shalt.err (!%p3202_p8)
}
  0x32   : > { %s4067_s25 = smov 128   ;;  %s4069_s28 = smov 8  }
  0x33   : > { %3050 = dma.hbm_to_vmem [thread:$0]  (!%p3637_p5), %s4104_s4, 2048, %s3627_s22, [#allocation8], %s4067_s25, %s4067_s25, %s4069_s28  }
  0x34   : > { %s4106_s6 = sld [smem:[#allocation33_spill]] }
  0x3a   : > { %s3206_s15 = scalar_lea.hbm %s4106_s6, 64 }
  0x3b   : > { %p3207_p9 = scmp.ne.s32.totalorder %s4106_s6, %s3206_s15  ;;  %p3213_p12 = scmp.lt.u32.totalorder %s3206_s15, %s4106_s6 }
  0x3d   : > { %p3209_p10 = pnand %p3207_p9, %p3651_p7 }
  0x3f   : > { %p3210_p11 = pneg %p3209_p10 }
  0x41   : > { %p3215_p13 = pnand %p3213_p12, %p3210_p11 }
  0x43   : > { %3218 = shalt.err (!%p3215_p13)
}
  0x44   : > { %s3219_s22 = scalar_lea.vmem %s3641_s26, 64  ;;  %p3227_p6 = scmp.lt.s32.totalorder %s3641_s26, %s3641_s26 }
  0x45   : > { %p3220_p0 = scmp.ne.s32.totalorder %s3641_s26, %s3219_s22  ;;  %p3228_p8 = scmp.lt.s32.totalorder %s3219_s22, %s3219_s22 }
  0x47   : > { %p3222_p2 = pnand %p3220_p0, %p3651_p7  ;;  %p3229_p9 = por %p3228_p8, %p3227_p6 }
  0x49   : > { %p3223_p4 = pneg %p3222_p2 }
  0x4b   : > { %p3230_p10 = pnand %p3229_p9, %p3223_p4 }
  0x4d   : > { %3233 = shalt.err (!%p3230_p10)
}
  0x4e   : > { %s4075_s29 = smov 16   ;;  %s3525_s0 = smov 1  }
  0x4f   : > { %3056 = dma.hbm_to_vmem [thread:$0]  (!%p3637_p5), %s4106_s6, 64, %s3641_s26, [#allocation11], %s4075_s29, %s4075_s29, %s3525_s0  }
  0x50   : > { %s3526_s12 = smov [#allocation13]   ;;  %s4107_s8 = sld [smem:[#allocation34_spill]] }
  0x51   : > { %s377_s13 = sshll.u32 %s3526_s12, 4  ;;  %s378_s13 = int_to_ptr.vmem [resolvable:$true] %s377_s13 }
  0x56   : > { %s3234_s21 = scalar_lea.hbm %s4107_s8, 4096 }
  0x57   : > { %p3235_p11 = scmp.ne.s32.totalorder %s4107_s8, %s3234_s21  ;;  %p3241_p0 = scmp.lt.u32.totalorder %s3234_s21, %s4107_s8 }
  0x59   : > { %p3237_p12 = pnand %p3235_p11, %p3651_p7 }
  0x5b   : > { %p3238_p13 = pneg %p3237_p12 }
  0x5d   : > { %p3243_p2 = pnand %p3241_p0, %p3238_p13 }
  0x5f   : > { %3246 = shalt.err (!%p3243_p2)
}
  0x60   : > { %s3247_s26 = scalar_lea.vmem %s378_s13, 4096  ;;  %p3255_p9 = scmp.lt.s32.totalorder %s378_s13, %s378_s13 }
  0x61   : > { %p3248_p4 = scmp.ne.s32.totalorder %s378_s13, %s3247_s26  ;;  %p3256_p10 = scmp.lt.s32.totalorder %s3247_s26, %s3247_s26 }
  0x63   : > { %p3250_p6 = pnand %p3248_p4, %p3651_p7  ;;  %p3257_p1 = por %p3256_p10, %p3255_p9 }
  0x65   : > { %p3251_p8 = pneg %p3250_p6 }
  0x67   : > { %p3258_p3 = pnand %p3257_p1, %p3251_p8 }
  0x69   : > { %3261 = shalt.err (!%p3258_p3)
}
  0x6a   : > { %s4073_s25 = smov 256   ;;  %s3722_s0 = sadd.s32 1, %s3518_s20  }
  0x6b   : > { %3062 = dma.hbm_to_vmem [thread:$0]  (!%p3637_p5), %s4107_s8, 4096, %s378_s13, [#allocation14], %s4073_s25, %s4073_s25, %s4075_s29  }
  0x6c   : > { %4108 = sst [smem:[#allocation26_spill]] %s3722_s0  ;;  %s64_s11 = sadd.s32 1, %s3514_s19 }
  0x6d   : > { %s61_s30 = ssub.s32 %s3518_s20, %s3722_s0  ;;  %p71_p1 = scmp.ne.s32.totalorder %s3514_s19, %s3510_s18 }
  0x6e   : > { %p62_p3 = scmp.eq.s32.totalorder %s61_s30, 0  ;;  %p72_p11 = scmp.eq.s32.totalorder %s3518_s20, 0 }
  0x6f   : > { %p77_p12 = scmp.ne.s32.totalorder %s3510_s18, %s3506_s17  ;;  %p3086_p13 = scmp.lt.s32.totalorder %s3518_s20, 4 }
  0x70   : > { %s3734_s12 = scalar_select %p62_p3, %s3514_s19, %s64_s11  }
  0x71   : > { %p73_p0 = por %p72_p11, %p71_p1  ;;  %p4110_p2 = scmp.eq.s32.totalorder %s3622_s23, 0 }
  0x72   : > { %4109 = sst [smem:[#allocation27_spill]] %s3734_s12  ;;  %s3743_s13 = sand.u32 1, %s3514_s19  }
  0x73   : > { %p3738_p4 = por %p4110_p2, %p77_p12  ;;  %s444_s16 = sand.u32 1, %s3518_s20  }
  0x74   : > { %p3746_p6 = pnand %p3086_p13, %p73_p0  ;;  %s2272_s22 = sshll.u32 %s3743_s13, 3 }
  0x75   : > { %s4111_s15 = scalar_select %p3738_p4, 1, 0 }
  0x76   : > { %s4113_s21 = scalar_select %p3746_p6, 1, 0 }
  0x77   : > { %4112 = sst [smem:[#allocation28_spill]] %s4111_s15  ;;  %s2273_s17 = sshll.u32 %s3518_s20, 7 }
  0x78   : > { %s4114_s2 = sld [smem:[#allocation30_spill]]  ;;  %s448_s11 = scalar_lea.vmem [#allocation4], %s2272_s22 }
  0x79   : > { %s455_s30 = sshll.u32 %s448_s11, 4  ;;  %s3759_s25 = scalar_lea.sflag [#allocation5], %s444_s16  ;;  %s3757_s30 = int_to_ptr.vmem [resolvable:$true] %s455_s30 }
  0x7a   : > { %p3765_p9 = pneg %p3746_p6 }
  0x7c   : > { %s4115_s6 = scalar_select %p3765_p9, 1, 0 }
  0x7e   : > { %s3755_s28 = scalar_lea.hbm %s4114_s2, %s2273_s17  ;;  %s3267_s22 = scalar_lea.hbm %s4114_s2, 512 }
  0x7f   : > { %s3262_s29 = scalar_lea.hbm %s3755_s28, 128  ;;  %p3268_p3 = scmp.lt.u32.totalorder %s3755_s28, %s4114_s2 }
  0x80   : > { %p3263_p8 = scmp.ne.s32.totalorder %s3755_s28, %s3262_s29  ;;  %p3269_p11 = scmp.lt.u32.totalorder %s3267_s22, %s3262_s29 }
  0x81   : > { %p3271_p13 = scmp.lt.u32.totalorder %s3262_s29, %s3755_s28 }
  0x82   : > { %p3265_p10 = pnand %p3765_p9, %p3263_p8  ;;  %p3270_p12 = por %p3269_p11, %p3268_p3 }
  0x84   : > { %p3266_p1 = pneg %p3265_p10  ;;  %p3272_p0 = por %p3271_p13, %p3270_p12 }
  0x86   : > { %p3273_p2 = pnand %p3272_p0, %p3266_p1 }
  0x88   : > { %3276 = shalt.err (!%p3273_p2)
}
  0x89   : > { %s3277_s16 = scalar_lea.vmem %s3757_s30, 128  ;;  %s3528_s17 = smov [#allocation4]  }
  0x8a   : > { %p3278_p8 = scmp.ne.s32.totalorder %s3757_s30, %s3277_s16  ;;  %s3282_s26 = sshll.u32 %s3528_s17, 4  ;;  %s3283_s26 = int_to_ptr.vmem [resolvable:$false] %s3282_s26 }
  0x8b   : > { %s3284_s4 = scalar_lea.vmem %s3283_s26, 256  ;;  %p3285_p5 = scmp.lt.s32.totalorder %s3757_s30, %s3283_s26 }
  0x8c   : > { %p3280_p10 = pnand %p3278_p8, %p3765_p9  ;;  %p3286_p7 = scmp.lt.s32.totalorder %s3284_s4, %s3277_s16 }
  0x8e   : > { %p3281_p4 = pneg %p3280_p10  ;;  %p3287_p3 = por %p3286_p7, %p3285_p5 }
  0x90   : > { %p3288_p11 = pnand %p3287_p3, %p3281_p4 }
  0x92   : > { %3291 = shalt.err (!%p3288_p11)
}
  0x93   : > { %3075 = dma.hbm_to_vmem [thread:$0]  (!%p3746_p6), %s3755_s28, 128, %s3757_s30, %s3759_s25  }
  0x94   : > { %s3529_s29 = smov [#allocation9]   ;;  %s3530_s11 = smov [#allocation12]  }
  0x95   : > { %s338_s22 = sshll.u32 %s3529_s29, 4  ;;  %s364_s2 = sshll.u32 %s3530_s11, 4  ;;  %s339_s22 = int_to_ptr.vmem [resolvable:$true] %s338_s22  ;;  %s365_s2 = int_to_ptr.vmem [resolvable:$true] %s364_s2 }
  0x96   : > { %s4116_s5 = sld [smem:[#allocation32_spill]]  ;;  %p4117_p7 = scmp.ne.s32.totalorder %s4105_s14, 0 }
  0x9c   : > { %s3292_s26 = scalar_lea.hbm %s4116_s5, 8192 }
  0x9d   : > { %p3293_p5 = scmp.ne.s32.totalorder %s4116_s5, %s3292_s26  ;;  %p3299_p12 = scmp.lt.u32.totalorder %s3292_s26, %s4116_s5 }
  0x9f   : > { %p3295_p4 = pnand %p3293_p5, %p4117_p7 }
  0xa1   : > { %p3296_p1 = pneg %p3295_p4 }
  0xa3   : > { %p3301_p13 = pnand %p3299_p12, %p3296_p1 }
  0xa5   : > { %3304 = shalt.err (!%p3301_p13)
}
  0xa6   : > { %s3305_s28 = scalar_lea.vmem %s339_s22, 8192  ;;  %p3313_p10 = scmp.lt.s32.totalorder %s339_s22, %s339_s22 }
  0xa7   : > { %p3306_p0 = scmp.ne.s32.totalorder %s339_s22, %s3305_s28  ;;  %p3314_p3 = scmp.lt.s32.totalorder %s3305_s28, %s3305_s28 }
  0xa9   : > { %p3308_p2 = pnand %p3306_p0, %p4117_p7  ;;  %p3315_p11 = por %p3314_p3, %p3313_p10 }
  0xab   : > { %p3309_p8 = pneg %p3308_p2 }
  0xad   : > { %p3316_p6 = pnand %p3315_p11, %p3309_p8 }
  0xaf   : > { %3319 = shalt.err (!%p3316_p6)
}
  0xb0   : > { %p4118_p5 = scmp.ne.s32.totalorder %s4103_s27, 0  ;;  %s4119_s8 = smov 8  }
  0xb1   : > { %s4120_s30 = smov 128   ;;  %s3320_s17 = scalar_lea.hbm %s4062_s7, 4096 }
  0xb2   : > { %3053 = dma.hbm_to_vmem [thread:$0]  (!%p4118_p5), %s4116_s5, 8192, %s339_s22, [#allocation8], %s4120_s30, %s4120_s30, %s4119_s8  }
  0xb3   : > { %p3321_p4 = scmp.ne.s32.totalorder %s4062_s7, %s3320_s17  ;;  %p3327_p12 = scmp.lt.u32.totalorder %s3320_s17, %s4062_s7 }
  0xb5   : > { %p3323_p6 = pnand %p3321_p4, %p4117_p7 }
  0xb7   : > { %p3324_p1 = pneg %p3323_p6 }
  0xb9   : > { %p3329_p13 = pnand %p3327_p12, %p3324_p1 }
  0xbb   : > { %3332 = shalt.err (!%p3329_p13)
}
  0xbc   : > { %s3333_s19 = scalar_lea.vmem %s365_s2, 4096  ;;  %p3341_p10 = scmp.lt.s32.totalorder %s365_s2, %s365_s2 }
  0xbd   : > { %p3334_p0 = scmp.ne.s32.totalorder %s365_s2, %s3333_s19  ;;  %p3342_p3 = scmp.lt.s32.totalorder %s3333_s19, %s3333_s19 }
  0xbf   : > { %p3336_p2 = pnand %p3334_p0, %p4117_p7  ;;  %p3343_p11 = por %p3342_p3, %p3341_p10 }
  0xc1   : > { %p3337_p8 = pneg %p3336_p2 }
  0xc3   : > { %p3344_p9 = pnand %p3343_p11, %p3337_p8 }
  0xc5   : > { %3347 = shalt.err (!%p3344_p9)
}
  0xc6   : > { %s4121_s22 = smov 16   ;;  %s4122_s12 = smov 256  }
  0xc7   : > { %3059 = dma.hbm_to_vmem [thread:$0]  (!%p4118_p5), %s4062_s7, 4096, %s365_s2, [#allocation11], %s4122_s12, %s4122_s12, %s4121_s22  }
  0xc8   : > { %s3531_s17 = smov [#allocation15]   ;;  %s3532_s16 = smov [#allocation16]  }
  0xc9   : > { %s390_s26 = sshll.u32 %s3531_s17, 4  ;;  %s404_s4 = sshll.u32 %s3532_s16, 4  ;;  %s391_s26 = int_to_ptr.vmem [resolvable:$true] %s390_s26  ;;  %s405_s4 = int_to_ptr.vmem [resolvable:$true] %s404_s4 }
  0xca   : > { %s3348_s5 = scalar_lea.hbm %s4064_s9, 4096 }
  0xcb   : > { %p3349_p9 = scmp.ne.s32.totalorder %s4064_s9, %s3348_s5  ;;  %p3355_p1 = scmp.lt.u32.totalorder %s3348_s5, %s4064_s9 }
  0xcd   : > { %p3351_p4 = pnand %p3349_p9, %p4117_p7 }
  0xcf   : > { %p3352_p6 = pneg %p3351_p4 }
  0xd1   : > { %p3357_p12 = pnand %p3355_p1, %p3352_p6 }
  0xd3   : > { %3360 = shalt.err (!%p3357_p12)
}
  0xd4   : > { %s3361_s2 = scalar_lea.vmem %s391_s26, 4096  ;;  %p3369_p8 = scmp.lt.s32.totalorder %s391_s26, %s391_s26 }
  0xd5   : > { %p3362_p13 = scmp.ne.s32.totalorder %s391_s26, %s3361_s2  ;;  %p3370_p10 = scmp.lt.s32.totalorder %s3361_s2, %s3361_s2 }
  0xd7   : > { %p3364_p0 = pnand %p3362_p13, %p4117_p7  ;;  %p3371_p3 = por %p3370_p10, %p3369_p8 }
  0xd9   : > { %p3365_p2 = pneg %p3364_p0 }
  0xdb   : > { %p3372_p11 = pnand %p3371_p3, %p3365_p2 }
  0xdd   : > { %3375 = shalt.err (!%p3372_p11)
}
  0xde   : > { %3065 = dma.hbm_to_vmem [thread:$0]  (!%p4118_p5), %s4064_s9, 4096, %s391_s26, [#allocation14], %s4122_s12, %s4122_s12, %s4121_s22  }
  0xdf   : > { %s3376_s11 = scalar_lea.hbm %s4065_s10, 32 }
  0xe0   : > { %p3377_p9 = scmp.ne.s32.totalorder %s4065_s10, %s3376_s11  ;;  %p3383_p1 = scmp.lt.u32.totalorder %s3376_s11, %s4065_s10 }
  0xe2   : > { %p3379_p4 = pnand %p3377_p9, %p4117_p7 }
  0xe4   : > { %p3380_p6 = pneg %p3379_p4 }
  0xe6   : > { %p3385_p12 = pnand %p3383_p1, %p3380_p6 }
  0xe8   : > { %3388 = shalt.err (!%p3385_p12)
}
  0xe9   : > { %s3389_s29 = scalar_lea.vmem %s405_s4, 32  ;;  %p3397_p8 = scmp.lt.s32.totalorder %s405_s4, %s405_s4 }
  0xea   : > { %p3390_p13 = scmp.ne.s32.totalorder %s405_s4, %s3389_s29  ;;  %p3398_p10 = scmp.lt.s32.totalorder %s3389_s29, %s3389_s29 }
  0xec   : > { %p3392_p0 = pnand %p3390_p13, %p4117_p7  ;;  %p3399_p3 = por %p3398_p10, %p3397_p8 }
  0xee   : > { %p3393_p2 = pneg %p3392_p0 }
  0xf0   : > { %p3400_p11 = pnand %p3399_p3, %p3393_p2 }
  0xf2   : > { %3403 = shalt.err (!%p3400_p11)
}
  0xf3   : > { %3068 = dma.hbm_to_vmem [thread:$0]  (!%p4118_p5), %s4065_s10, 32, %s405_s4, [#allocation17]  }
  0xf4   : > { %s2269_s26 = sshll.u32 %s3743_s13, 5  ;;  %s2319_s14 = sshll.u32 %s3518_s20, 9 }
  0xf5   : > { %s3875_s5 = scalar_lea.hbm %s4056_s1, %s2319_s14  ;;  %s427_s27 = scalar_lea.vmem [#allocation2], %s2269_s26 }
  0xf6   : > { %s434_s0 = sshll.u32 %s427_s27, 4  ;;  %s2274_s15 = sshll.u32 %s3518_s20, 4  ;;  %s3877_s0 = int_to_ptr.vmem [resolvable:$true] %s434_s0 }
  0xf7   : > { %s424_s11 = scalar_lea.sflag [#allocation3], %s3743_s13  ;;  %s3404_s17 = scalar_lea.hbm %s3875_s5, 512 }
  0xf8   : > { %p3405_p7 = scmp.ne.s32.totalorder %s3875_s5, %s3404_s17  ;;  %p4123_p5 = scmp.ne.s32.totalorder %s4115_s6, 0 }
  0xf9   : > { %s3409_s28 = scalar_lea.hbm %s4056_s1, 2048  ;;  %p3410_p6 = scmp.lt.u32.totalorder %s3875_s5, %s4056_s1 }
  0xfa   : > { %p3407_p9 = pnand %p3405_p7, %p4123_p5  ;;  %p3411_p1 = scmp.lt.u32.totalorder %s3409_s28, %s3404_s17 }
  0xfb   : > { %p3413_p13 = scmp.lt.u32.totalorder %s3404_s17, %s3875_s5 }
  0xfc   : > { %p3408_p4 = pneg %p3407_p9  ;;  %p3412_p12 = por %p3411_p1, %p3410_p6 }
  0xfe   : > { %p3414_p0 = por %p3413_p13, %p3412_p12 }
 0x100   : > { %p3415_p2 = pnand %p3414_p0, %p3408_p4 }
 0x102   : > { %3418 = shalt.err (!%p3415_p2)
}
 0x103   : > { %s3419_s22 = scalar_lea.vmem %s3877_s0, 512  ;;  %s3533_s12 = smov [#allocation2]  }
 0x104   : > { %p3420_p8 = scmp.ne.s32.totalorder %s3877_s0, %s3419_s22  ;;  %s3424_s26 = sshll.u32 %s3533_s12, 4  ;;  %s3425_s26 = int_to_ptr.vmem [resolvable:$false] %s3424_s26 }
 0x105   : > { %s3426_s14 = scalar_lea.vmem %s3425_s26, 1024  ;;  %p3427_p11 = scmp.lt.s32.totalorder %s3877_s0, %s3425_s26 }
 0x106   : > { %p3422_p10 = pnand %p3420_p8, %p4123_p5  ;;  %p3428_p7 = scmp.lt.s32.totalorder %s3426_s14, %s3419_s22 }
 0x108   : > { %p3423_p3 = pneg %p3422_p10  ;;  %p3429_p9 = por %p3428_p7, %p3427_p11 }
 0x10a   : > { %p3430_p6 = pnand %p3429_p9, %p3423_p3 }
 0x10c   : > { %3433 = shalt.err (!%p3430_p6)
}
 0x10d   : > { %p4124_p4 = scmp.ne.s32.totalorder %s4113_s21, 0  ;;  %s3912_s27 = scalar_lea.hbm %s4058_s3, %s2274_s15 }
 0x10e   : > { %s465_s17 = scalar_lea.vmem [#allocation6], %s3743_s13  ;;  %s3434_s16 = scalar_lea.hbm %s3912_s27, 16 }
 0x10f   : > { %3072 = dma.hbm_to_vmem [thread:$0]  (!%p4124_p4), %s3875_s5, 512, %s3877_s0, %s424_s11, %s4120_s30, %s4120_s30, %s4119_s8  }
 0x110   : > { %s472_s4 = sshll.u32 %s465_s17, 4  ;;  %p3435_p1 = scmp.ne.s32.totalorder %s3912_s27, %s3434_s16  ;;  %s473_s4 = int_to_ptr.vmem [resolvable:$true] %s472_s4 }
 0x111   : > { %s3439_s20 = scalar_lea.hbm %s4058_s3, 64  ;;  %p3440_p0 = scmp.lt.u32.totalorder %s3912_s27, %s4058_s3 }
 0x112   : > { %p3437_p12 = pnand %p3435_p1, %p4123_p5  ;;  %p3441_p2 = scmp.lt.u32.totalorder %s3439_s20, %s3434_s16 }
 0x113   : > { %p3443_p10 = scmp.lt.u32.totalorder %s3434_s16, %s3912_s27 }
 0x114   : > { %p3438_p13 = pneg %p3437_p12  ;;  %p3442_p8 = por %p3441_p2, %p3440_p0 }
 0x116   : > { %p3444_p3 = por %p3443_p10, %p3442_p8 }
 0x118   : > { %p3445_p11 = pnand %p3444_p3, %p3438_p13 }
 0x11a   : > { %3448 = shalt.err (!%p3445_p11)
}
 0x11b   : > { %s3449_s13 = scalar_lea.vmem %s473_s4, 16  ;;  %s3534_s0 = smov [#allocation6]  }
 0x11c   : > { %p3450_p7 = scmp.ne.s32.totalorder %s473_s4, %s3449_s13  ;;  %s3454_s15 = sshll.u32 %s3534_s0, 4  ;;  %s3455_s15 = int_to_ptr.vmem [resolvable:$false] %s3454_s15 }
 0x11d   : > { %s3456_s11 = scalar_lea.vmem %s3455_s15, 32  ;;  %p3457_p1 = scmp.lt.s32.totalorder %s473_s4, %s3455_s15 }
 0x11e   : > { %p3452_p9 = pnand %p3450_p7, %p4123_p5  ;;  %p3458_p12 = scmp.lt.s32.totalorder %s3456_s11, %s3449_s13 }
 0x120   : > { %p3453_p6 = pneg %p3452_p9  ;;  %p3459_p4 = por %p3458_p12, %p3457_p1 }
 0x122   : > { %p3460_p0 = pnand %p3459_p4, %p3453_p6 }
 0x124   : > { %3463 = shalt.err (!%p3460_p0)
}
 0x125   : > { %p4125_p2 = scmp.ne.s32.totalorder %s4113_s21, 0  ;;  %p4126_p13 = scmp.ne.s32.totalorder %s4102_s24, 0 }
 0x126   : > { %s4127_s6 = sld [smem:[#allocation28_spill]] (!%p4126_p13)  ;;  %s3936_s19 = sand.u32 (!%p4126_p13), 1, %s3510_s18  }
 0x127   : > { %3078 = dma.hbm_to_vmem [thread:$0]  (!%p4125_p2), %s3912_s27, 16, %s473_s4, %s3759_s25  }
 0x128   : > { %481 = sbr.rel (%p4126_p13) target bundleno = 3602 (0xe12), region = 64  ;;  %s2276_s29 = sshll.u32 (!%p4126_p13), %s3936_s19, 5 }
 0x129   : > { %s484_s22 = scalar_lea.sflag (!%p4126_p13), [#allocation3], %s3936_s19  ;;  %s3940_s12 = scalar_lea.vmem (!%p4126_p13), [#allocation2], %s2276_s29 }
 0x12c   : > { %p4128_p5 = scmp.ne.s32.totalorder (!%p4126_p13), %s4127_s6, 0 }
 0x12f   : > { %3481 = dma.done.wait (%p4128_p5), %s484_s22, 512  }
 0x130   : > { %3483 = vsyncadd (%p4128_p5), %s484_s22, 4294966784  ;;  %s4129_s21 = sld [smem:[#allocation25_spill]]  ;;  %s2277_s25 = sshll.u32 %s3936_s19, 3 }
 0x131   : > { %s3948_s14 = scalar_lea.vmem [#allocation4], %s2277_s25 }
 0x136   : > { %s492_s24 = sand.u32 1, %s4129_s21  }
 0x137   : > { %s493_s26 = scalar_lea.sflag [#allocation5], %s492_s24 }
 0x138   : > { %3485 = dma.done.wait (%p4128_p5), %s493_s26, 144  }
 0x139   : > { %3487 = vsyncadd (%p4128_p5), %s493_s26, 4294967152  ;;  %s504_s2 = scalar_lea.vmem [#allocation6], %s3936_s19  ;;  %p4130_p4 = scmp.eq.s32.totalorder %s4129_s21, 0 }
 0x13b   : > { %3489 = dma.done.wait (%p4130_p4), [#allocation8], 10240   ;;  %p4131_p8 = pmov %p4130_p4 }
 0x13c   : > { %p4132_p10 = pmov %p4130_p4 }
 0x13d   : > { %3491 = vsyncadd (%p4131_p8), [#allocation8], 4294957056 }
 0x13e   : > { %3493 = dma.done.wait (%p4132_p10), [#allocation11], 4160   ;;  %p4133_p3 = pmov %p4130_p4 }
 0x140   : > { %3495 = vsyncadd (%p4133_p3), [#allocation11], 4294963136  ;;  %p4134_p11 = pmov %p4133_p3 }
 0x141   : > { %p4135_p7 = pmov %p4133_p3 }
 0x142   : > { %3497 = dma.done.wait (%p4134_p11), [#allocation14], 8192  }
 0x143   : > { %3499 = vsyncadd (%p4135_p7), [#allocation14], 4294959104  ;;  %p4136_p9 = pmov %p4133_p3 }
 0x144   : > { %p4137_p6 = pmov %p4133_p3 }
 0x145   : > { %3501 = dma.done.wait (%p4136_p9), [#allocation17], 32  }
 0x146   : > { %3503 = vsyncadd (%p4137_p6), [#allocation17], 4294967264  ;;  %p584_p1 = scmp.lt.s32.totalorder %s4129_s21, 3  ;;  %v3535_v0 = vmov 0   ;;  %s4138_s4 = sld [smem:[#allocation29_spill]]  ;;  %v623_v4 = vld [vmem:[#allocation7] sm:$0xff]  ;;  %v597_v32 = vlaneseq }
 0x147   : > { %3145 = vset.pattern.permute.xlu1 %v3535_v0  ;;  %3144 = vset.pattern.permute.xlu0 %v3535_v0  ;;  %v624_v5 = vld [vmem:[#allocation7 + $0x8] sm:$0xff]  ;;  %v625_v8 = vld [vmem:[#allocation7 + $0x10] sm:$0xff]  ;;  %v626_v9 = vld [vmem:[#allocation7 + $0x18] sm:$0xff]  ;;  %v3536_v38 = vmov 1.0   ;;  %vm840_vm4 = vcmask 261120   ;;  %vm3538_vm5 = vmmov 0  }
 0x148   : > { %s4146_s21 = smov (!%p584_p1, %s4129_s21), 3  ;;  %v2715_v7 = vpack.c.bf16 %v624_v5, %v623_v4  ;;  %v2719_v10 = vpack.c.bf16 %v626_v9, %v625_v8  ;;  %v627_v11 = vld [vmem:[#allocation7 + $0x20] sm:$0xff]  ;;  %v628_v12 = vld [vmem:[#allocation7 + $0x28] sm:$0xff]  ;;  %v629_v14 = vld [vmem:[#allocation7 + $0x30] sm:$0xff]  ;;  %v598_v33 = vand.u32 127, %v597_v32  ;;  %s4139_s30 = sld [smem:[#allocation35_spill]] }
 0x149   : > { %s2320_s23 = sshll.u32 %s4146_s21, 5  ;;  %v2723_v13 = vpack.c.bf16 %v628_v12, %v627_v11  ;;  %v630_v15 = vld [vmem:[#allocation7 + $0x38] sm:$0xff]  ;;  %v631_v17 = vld [vmem:[#allocation7 + $0x40] sm:$0xff]  ;;  %v632_v18 = vld [vmem:[#allocation7 + $0x48] sm:$0xff]  ;;  %s2287_s28 = sshll.u32 %s4146_s21, 1  ;;  %vm2072_vm6 = vcmp.lt.s32.totalorder %v597_v32, 256 }
 0x14a   : > { %2716 = vmatprep.subr.bf16.mxu1 %v2715_v7  ;;  %v2727_v16 = vpack.c.bf16 %v630_v15, %v629_v14  ;;  %v2731_v19 = vpack.c.bf16 %v632_v18, %v631_v17  ;;  %v633_v20 = vld [vmem:[#allocation7 + $0x50] sm:$0xff]  ;;  %v634_v21 = vld [vmem:[#allocation7 + $0x58] sm:$0xff]  ;;  %v635_v23 = vld [vmem:[#allocation7 + $0x60] sm:$0xff] }
 0x14b   : > { %2718 = vmatpush3.bf16.msra.mxu1 %v2715_v7  ;;  %v2735_v22 = vpack.c.bf16 %v634_v21, %v633_v20  ;;  %v636_v24 = vld [vmem:[#allocation7 + $0x68] sm:$0xff]  ;;  %v637_v26 = vld [vmem:[#allocation7 + $0x70] sm:$0xff]  ;;  %v638_v27 = vld [vmem:[#allocation7 + $0x78] sm:$0xff] }
 0x14c   : > { %s588_s16 = scalar_lea.vmem %s4138_s4, %s2320_s23  ;;  %2720 = vmatprep.subr.bf16.mxu1 %v2719_v10  ;;  %v2739_v25 = vpack.c.bf16 %v636_v24, %v635_v23  ;;  %v2743_v28 = vpack.c.bf16 %v638_v27, %v637_v26  ;;  %v728_v29 = vld [vmem:[#allocation9] sm:$0xff]  ;;  %v729_v30 = vld [vmem:[#allocation9 + $0x8] sm:$0xff]  ;;  %v730_v36 = vld [vmem:[#allocation9 + $0x10] sm:$0xff] }
 0x14d   : > { %v595_v1 = vld [vmem:[%s588_s16 + $0x10] sm:$0xff]  ;;  %v593_v2 = vld [vmem:[%s588_s16] sm:$0xff]  ;;  %v596_v3 = vld [vmem:[%s588_s16 + $0x18] sm:$0xff]  ;;  %v2747_v31 = vpack.c.bf16 %v729_v30, %v728_v29 }
 0x14e   : > { %606 = vperm.xlu1 %3145, %v595_v1   ;;  %600 = vperm.xlu0 %3144, %v593_v2   ;;  %v594_v6 = vld [vmem:[%s588_s16 + $0x8] sm:$0xff]  ;;  %v732_v41 = vld [vmem:[#allocation9 + $0x20] sm:$0xff]  ;;  %v733_v42 = vld [vmem:[#allocation9 + $0x28] sm:$0xff]  ;;  %s592_s5 = scalar_lea.vmem %s4139_s30, %s2287_s28 }
 0x14f   : > { %2722 = vmatpush3.bf16.msra.mxu1 %v2719_v10  ;;  %v731_v37 = vld [vmem:[#allocation9 + $0x18] sm:$0xff]  ;;  %v2755_v44 = vpack.c.bf16 %v733_v42, %v732_v41  ;;  %v734_v45 = vld [vmem:[#allocation9 + $0x30] sm:$0xff]  ;;  %v736_v48 = vld [vmem:[#allocation9 + $0x40] sm:$0xff] }
 0x150   : > { %2724 = vmatprep.subr.bf16.mxu1 %v2723_v13  ;;  %v2751_v40 = vpack.c.bf16 %v731_v37, %v730_v36  ;;  %v735_v46 = vld [vmem:[#allocation9 + $0x38] sm:$0xff]  ;;  %v737_v49 = vld [vmem:[#allocation9 + $0x48] sm:$0xff]  ;;  %v738_v51 = vld [vmem:[#allocation9 + $0x50] sm:$0xff] }
 0x151   : > { %v2759_v47 = vpack.c.bf16 %v735_v46, %v734_v45  ;;  %v2763_v50 = vpack.c.bf16 %v737_v49, %v736_v48  ;;  %v739_v52 = vld [vmem:[#allocation9 + $0x58] sm:$0xff]  ;;  %v740_v54 = vld [vmem:[#allocation9 + $0x60] sm:$0xff]  ;;  %v741_v55 = vld [vmem:[#allocation9 + $0x68] sm:$0xff] }
 0x152   : > { %609 = vperm.xlu1 %3145, %v596_v3   ;;  %603 = vperm.xlu0 %3144, %v594_v6   ;;  %v2767_v53 = vpack.c.bf16 %v739_v52, %v738_v51  ;;  %v2771_v56 = vpack.c.bf16 %v741_v55, %v740_v54  ;;  %v742_v57 = vld [vmem:[#allocation9 + $0x70] sm:$0xff]  ;;  %v743_v58 = vld [vmem:[#allocation9 + $0x78] sm:$0xff]  ;;  %v2296_v1 = vld [vmem:[#allocation10] ss:$0 sm:$0xff] }
 0x153   : > { %2726 = vmatpush3.bf16.msra.mxu1 %v2723_v13  ;;  %v2775_v59 = vpack.c.bf16 %v743_v58, %v742_v57  ;;  %v3981_v0 = vld [vmem:[%s3940_s12] sm:$0xff]  ;;  %v3991_v17 = vld [vmem:[%s3940_s12 + $0x10] sm:$0xff]  ;;  %v3998_v18 = vld [vmem:[%s3940_s12 + $0x18] sm:$0xff] }
 0x154   : > { %2728 = vmatprep.subr.bf16.mxu1 %v2727_v16  ;;  %2594 = vmatprep.mubr.msk.f32.mxu0 %vm840_vm4, %v3981_v0  ;;  %v968_v20 = vld [vmem:[#allocation9 + $0x88] sm:$0xff]  ;;  %v969_v21 = vld [vmem:[#allocation9 + $0x90] sm:$0xff]  ;;  %v970_v23 = vld [vmem:[#allocation9 + $0x98] sm:$0xff] }
 0x155   : > { %v2791_v24 = vpack.c.bf16 %v970_v23, %v969_v21  ;;  %v972_v26 = vld [vmem:[#allocation9 + $0xa8] sm:$0xff]  ;;  %v974_v29 = vld [vmem:[#allocation9 + $0xb8] sm:$0xff] }
 0x156   : > { %v976_v45 = vld [vmem:[#allocation9 + $0xc8] sm:$0xff]  ;;  %v978_v48 = vld [vmem:[#allocation9 + $0xd8] sm:$0xff] }
 0x157   : > { %2730 = vmatpush3.bf16.msra.mxu1 %v2727_v16  ;;  %v3988_v16 = vld [vmem:[%s3940_s12 + $0x8] sm:$0xff]  ;;  %v980_v51 = vld [vmem:[#allocation9 + $0xe8] sm:$0xff] }
 0x158   : > { %2732 = vmatprep.subr.bf16.mxu1 %v2731_v19  ;;  %v982_v54 = vld [vmem:[#allocation9 + $0xf8] sm:$0xff] }
 0x15b   : > { %2734 = vmatpush3.bf16.msra.mxu1 %v2731_v19  ;;  %v967_v19 = vld [vmem:[#allocation9 + $0x80] sm:$0xff] }
 0x15c   : > { %2736 = vmatprep.subr.bf16.mxu1 %v2735_v22 }
 0x15f   : > { %2738 = vmatpush3.bf16.msra.mxu1 %v2735_v22  ;;  %v2787_v22 = vpack.c.bf16 %v968_v20, %v967_v19 }
 0x160   : > { %2740 = vmatprep.subr.bf16.mxu1 %v2739_v25 }
 0x163   : > { %2742 = vmatpush3.bf16.msra.mxu1 %v2739_v25  ;;  %v971_v25 = vld [vmem:[#allocation9 + $0xa0] sm:$0xff] }
 0x164   : > { %2744 = vmatprep.subr.bf16.mxu1 %v2743_v28  ;;  %v2795_v27 = vpack.c.bf16 %v972_v26, %v971_v25 }
 0x167   : > { %2746 = vmatpush3.bf16.msra.mxu1 %v2743_v28  ;;  %v973_v28 = vld [vmem:[#allocation9 + $0xb0] sm:$0xff] }
 0x168   : > { %2748 = vmatprep.subr.bf16.mxu1 %v2747_v31  ;;  %v2799_v30 = vpack.c.bf16 %v974_v29, %v973_v28  ;;  %v1195_v28 = vld [vmem:[#allocation9 + $0x108] sm:$0xff]  ;;  %v1196_v29 = vld [vmem:[#allocation9 + $0x110] sm:$0xff] }
 0x1cd   : > { %v607_v34 = vpop.permute.xlu1 %606  ;;  %v601_v35 = vpop.permute.xlu0 %600 }
 0x1ce   : > { %vm611_vm0 = vcmp.eq.s32.totalorder %v601_v35, %v598_v33  ;;  %vm613_vm1 = vcmp.eq.s32.totalorder %v607_v34, %v598_v33 }
 0x1cf   : > { %2490 = vmatprep.mubr.msk.f32.mxu1 %vm611_vm0, %v3536_v38 }
 0x1d1   : > { %v604_v39 = vpop.permute.xlu0 %603  ;;  %v610_v43 = vpop.permute.xlu1 %609 }
 0x1d2   : > { %vm612_vm2 = vcmp.eq.s32.totalorder %v604_v39, %v598_v33  ;;  %vm614_vm3 = vcmp.eq.s32.totalorder %v610_v43, %v598_v33 }
 0x1d3   : > { %2491 = vmatmul.mubr.msk.f32.vlgmr.msra.gmra.mrb[0].mxu1 %vm612_vm2, %v3536_v38 }
 0x1d4   : > { %2493 = vmatprep.mubr.msk.f32.mxu1 %vm613_vm1, %v3536_v38  ;;  %2750 = vmatpush3.bf16.msra.mxu1 %v2747_v31 }
 0x1d5   : > { %2752 = vmatprep.subr.bf16.mxu1 %v2751_v40 }
 0x1d7   : > { %2494 = vmatmul.mubr.msk.f32.gmra.mrb[2].mxu1 %vm614_vm3, %v3536_v38 }
 0x1d8   : > { %2754 = vmatpush3.bf16.msra.mxu1 %v2751_v40 }
 0x1d9   : > { %2756 = vmatprep.subr.bf16.mxu1 %v2755_v44 }
 0x1dc   : > { %2758 = vmatpush3.bf16.msra.mxu1 %v2755_v44  ;;  %v975_v44 = vld [vmem:[#allocation9 + $0xc0] sm:$0xff] }
 0x1dd   : > { %2760 = vmatprep.subr.bf16.mxu1 %v2759_v47  ;;  %v2803_v46 = vpack.c.bf16 %v976_v45, %v975_v44 }
 0x1e0   : > { %2762 = vmatpush3.bf16.msra.mxu1 %v2759_v47  ;;  %v977_v47 = vld [vmem:[#allocation9 + $0xd0] sm:$0xff] }
 0x1e1   : > { %2764 = vmatprep.subr.bf16.mxu1 %v2763_v50  ;;  %v2807_v49 = vpack.c.bf16 %v978_v48, %v977_v47 }
 0x1e4   : > { %2766 = vmatpush3.bf16.msra.mxu1 %v2763_v50  ;;  %v979_v50 = vld [vmem:[#allocation9 + $0xe0] sm:$0xff] }
 0x1e5   : > { %2768 = vmatprep.subr.bf16.mxu1 %v2767_v53  ;;  %v2811_v52 = vpack.c.bf16 %v980_v51, %v979_v50 }
 0x1e8   : > { %2770 = vmatpush3.bf16.msra.mxu1 %v2767_v53  ;;  %v981_v53 = vld [vmem:[#allocation9 + $0xf0] sm:$0xff] }
 0x1e9   : > { %2772 = vmatprep.subr.bf16.mxu1 %v2771_v56  ;;  %v2815_v55 = vpack.c.bf16 %v982_v54, %v981_v53  ;;  %v1203_v53 = vld [vmem:[#allocation9 + $0x148] sm:$0xff] }
 0x1ec   : > { %2774 = vmatpush3.bf16.msra.mxu1 %v2771_v56 }
 0x1ed   : > { %2776 = vmatprep.subr.bf16.mxu1 %v2775_v59 }
 0x1f0   : > { %2778 = vmatpush3.bf16.msra.mxu1 %v2775_v59 }
 0x2a6   : > { %v2492_v60 = vpop.f32.mrb[0].mxu1 }
 0x2a7   : > { %v705_v61 = vpop.f32.mrb[1].mxu1 }
 0x2a8   : > { %2528 = vmatprep.mubr.f32.mxu1 %v705_v61 }
 0x2a9   : > { %2529 = vmatmul.mubr.f32.vlgmr.msra.gmra.mrb[4].mxu1 %v2492_v60 }
 0x2aa   : > { %v2495_v62 = vpop.f32.mrb[2].mxu1 }
 0x2ab   : > { %v715_v63 = vpop.f32.mrb[3].mxu1 }
 0x2ac   : > { %2531 = vmatprep.mubr.f32.mxu1 %v715_v63 }
 0x2ad   : > { %2532 = vmatmul.mubr.f32.gmra.mrb[6].mxu1 %v2495_v62 }
 0x2ae   : > { %2542 = vmatprep.mubr.msk.f32.mxu1 %vm840_vm4, %v3981_v0 }
 0x37c   : > { %v2530_v2 = vpop.f32.mrb[4].mxu1 }
 0x37d   : > { %v823_v3 = vadd.f32 %v2530_v2, %v2296_v1  ;;  %v817_v4 = vpop.f32.mrb[5].mxu1 }
 0x37e   : > { %v818_v5 = vadd.f32 %v2296_v1, %v817_v4 }
 0x37f   : > { %v837_v6 = vmax.f32 %v823_v3, 0.0 }
 0x380   : > { %v836_v7 = vmax.f32 %v818_v5, 0.0  ;;  %v2533_v8 = vpop.f32.mrb[6].mxu1 }
 0x381   : > { %v833_v9 = vadd.f32 %v2533_v8, %v2296_v1  ;;  %v827_v10 = vpop.f32.mrb[7].mxu1 }
 0x382   : > { %v2779_v11 = vpack.c.bf16 %v837_v6, %v836_v7  ;;  %v828_v12 = vadd.f32 %v2296_v1, %v827_v10 }
 0x383   : > { %v839_v13 = vmax.f32 %v833_v9, 0.0  ;;  %v2301_v9 = vld [vmem:[#allocation10 + $0x1] ss:$0 sm:$0xff] }
 0x384   : > { %v838_v14 = vmax.f32 %v828_v12, 0.0  ;;  %2780 = vmatprep.subr.bf16.mxu1 %v2779_v11 }
 0x385   : > { %2782 = vmatpush3.bf16.msra.mxu1 %v2779_v11 }
 0x386   : > { %v2783_v15 = vpack.c.bf16 %v839_v13, %v838_v14 }
 0x388   : > { %2784 = vmatprep.subr.bf16.mxu1 %v2783_v15 }
 0x389   : > { %2786 = vmatpush3.bf16.msra.mxu1 %v2783_v15 }
 0x38a   : > { %2788 = vmatprep.subr.bf16.mxu1 %v2787_v22 }
 0x38c   : > { %2543 = vmatmul.mubr.msk.f32.vlgmr.msra.gmra.mrb[8].mxu1 %vm840_vm4, %v3988_v16 }
 0x38d   : > { %2545 = vmatprep.mubr.msk.f32.mxu1 %vm840_vm4, %v3991_v17  ;;  %2790 = vmatpush3.bf16.msra.mxu1 %v2787_v22 }
 0x38e   : > { %2792 = vmatprep.subr.bf16.mxu1 %v2791_v24 }
 0x390   : > { %2546 = vmatmul.mubr.msk.f32.gmra.mrb[10].mxu1 %vm840_vm4, %v3998_v18 }
 0x391   : > { %2794 = vmatpush3.bf16.msra.mxu1 %v2791_v24 }
 0x392   : > { %2796 = vmatprep.subr.bf16.mxu1 %v2795_v27 }
 0x395   : > { %2798 = vmatpush3.bf16.msra.mxu1 %v2795_v27  ;;  %v1194_v27 = vld [vmem:[#allocation9 + $0x100] sm:$0xff] }
 0x396   : > { %2800 = vmatprep.subr.bf16.mxu1 %v2799_v30 }
 0x399   : > { %2802 = vmatpush3.bf16.msra.mxu1 %v2799_v30  ;;  %v2827_v30 = vpack.c.bf16 %v1195_v28, %v1194_v27 }
 0x39a   : > { %2804 = vmatprep.subr.bf16.mxu1 %v2803_v46 }
 0x39d   : > { %2806 = vmatpush3.bf16.msra.mxu1 %v2803_v46 }
 0x39e   : > { %2808 = vmatprep.subr.bf16.mxu1 %v2807_v49 }
 0x3a1   : > { %2810 = vmatpush3.bf16.msra.mxu1 %v2807_v49 }
 0x3a2   : > { %2812 = vmatprep.subr.bf16.mxu1 %v2811_v52 }
 0x3a5   : > { %2814 = vmatpush3.bf16.msra.mxu1 %v2811_v52  ;;  %v1202_v52 = vld [vmem:[#allocation9 + $0x140] sm:$0xff] }
 0x3a6   : > { %2816 = vmatprep.subr.bf16.mxu1 %v2815_v55  ;;  %v2843_v54 = vpack.c.bf16 %v1203_v53, %v1202_v52 }
 0x3a9   : > { %2818 = vmatpush3.bf16.msra.mxu1 %v2815_v55  ;;  %v1204_v55 = vld [vmem:[#allocation9 + $0x150] sm:$0xff] }
 0x45f   : > { %v2544_v31 = vpop.f32.mrb[8].mxu1 }
 0x460   : > { %v939_v33 = vadd.f32 %v2544_v31, %v837_v6  ;;  %v919_v34 = vpop.f32.mrb[9].mxu1  ;;  %v1197_v31 = vld [vmem:[#allocation9 + $0x118] sm:$0xff] }
 0x461   : > { %v938_v35 = vadd.f32 %v919_v34, %v836_v7  ;;  %v1198_v34 = vld [vmem:[#allocation9 + $0x120] sm:$0xff] }
 0x462   : > { %v943_v36 = vmul.f32 %v939_v33, %v939_v33 }
 0x463   : > { %v2547_v37 = vpop.f32.mrb[10].mxu1  ;;  %v942_v38 = vmul.f32 %v938_v35, %v938_v35 }
 0x464   : > { %948 = vadd.xlane.f32.xlu1 %v943_v36  ;;  %v929_v39 = vpop.f32.mrb[11].mxu1  ;;  %v941_v41 = vadd.f32 %v2547_v37, %v839_v13  ;;  %v1200_v37 = vld [vmem:[#allocation9 + $0x130] sm:$0xff] }
 0x465   : > { %v940_v40 = vadd.f32 %v929_v39, %v838_v14  ;;  %946 = vadd.xlane.f32.xlu0 %v942_v38  ;;  %v1201_v38 = vld [vmem:[#allocation9 + $0x138] sm:$0xff] }
 0x466   : > { %v945_v43 = vmul.f32 %v941_v41, %v941_v41  ;;  %v2839_v39 = vpack.c.bf16 %v1201_v38, %v1200_v37  ;;  %v1423_v37 = vld [vmem:[#allocation9 + $0x190] sm:$0xff] }
 0x467   : > { %v944_v42 = vmul.f32 %v940_v40, %v940_v40 }
 0x469   : > { %950 = vadd.xlane.f32.xlu0 %v944_v42 }
 0x46d   : > { %952 = vadd.xlane.f32.xlu0 %v945_v43 }
 0x4f1   : > { %v949_v56 = vpop.xlane.xlu1 %948 }
 0x4f2   : > { %v955_v57 = vmax.f32 %v949_v56, 1e-24  ;;  %v947_v58 = vpop.xlane.xlu0 %946  ;;  %v1205_v56 = vld [vmem:[#allocation9 + $0x158] sm:$0xff] }
 0x4f3   : > { %v954_v59 = vmax.f32 %v947_v58, 1e-24  ;;  %v1206_v58 = vld [vmem:[#allocation9 + $0x160] sm:$0xff] }
 0x4f4   : > { %3146 = vrsqrt.f32 %v955_v57  ;;  %v2847_v57 = vpack.c.bf16 %v1205_v56, %v1204_v55 }
 0x4f5   : > { %3148 = vrsqrt.f32 %v954_v59  ;;  %v1207_v59 = vld [vmem:[#allocation9 + $0x168] sm:$0xff] }
 0x4f6   : > { %v951_v60 = vpop.xlane.xlu0 %950 }
 0x4f7   : > { %v956_v61 = vmax.f32 %v951_v60, 1e-24  ;;  %v2851_v60 = vpack.c.bf16 %v1207_v59, %v1206_v58  ;;  %v1429_v59 = vld [vmem:[#allocation9 + $0x1c0] sm:$0xff] }
 0x4f9   : > { %3150 = vrsqrt.f32 %v956_v61  ;;  %v1208_v61 = vld [vmem:[#allocation9 + $0x170] sm:$0xff] }
 0x4fa   : > { %v953_v62 = vpop.xlane.xlu0 %952 }
 0x4fb   : > { %v957_v63 = vmax.f32 %v953_v62, 1e-24  ;;  %v1209_v62 = vld [vmem:[#allocation9 + $0x178] sm:$0xff] }
 0x4fd   : > { %3152 = vrsqrt.f32 %v957_v63  ;;  %v2855_v63 = vpack.c.bf16 %v1209_v62, %v1208_v61  ;;  %v1431_v62 = vld [vmem:[#allocation9 + $0x1d0] sm:$0xff] }
 0x4fe   : > { %v3147_v1 = vpop.eup %3146 }
 0x4ff   : > { %v3149_v2 = vpop.eup %3148  ;;  %v963_v4 = vmul.f32 %v3147_v1, %v939_v33  ;;  %v2831_v33 = vpack.c.bf16 %v1197_v31, %v1196_v29 }
 0x500   : > { %v962_v3 = vmul.f32 %v3149_v2, %v938_v35  ;;  %v1199_v35 = vld [vmem:[#allocation9 + $0x128] sm:$0xff] }
 0x501   : > { %v2835_v36 = vpack.c.bf16 %v1199_v35, %v1198_v34 }
 0x502   : > { %2580 = vmatprep.mubr.f32.mxu1 %v962_v3 }
 0x503   : > { %v3151_v5 = vpop.eup %3150  ;;  %2581 = vmatmul.mubr.f32.vlgmr.msra.gmra.mrb[12].mxu1 %v963_v4 }
 0x504   : > { %v964_v6 = vmul.f32 %v3151_v5, %v940_v40 }
 0x506   : > { %2583 = vmatprep.mubr.f32.mxu1 %v964_v6 }
 0x507   : > { %v3153_v7 = vpop.eup %3152 }
 0x508   : > { %v965_v8 = vmul.f32 %v3153_v7, %v941_v41 }
 0x50a   : > { %2584 = vmatmul.mubr.f32.gmra.mrb[14].mxu1 %v965_v8 }
 0x50b   : > { %2646 = vmatprep.mubr.msk.f32.mxu1 %vm840_vm4, %v3981_v0 }
 0x5d6   : > { %v2582_v10 = vpop.f32.mrb[12].mxu1 }
 0x5d7   : > { %v1063_v11 = vadd.f32 %v2582_v10, %v2301_v9  ;;  %v1057_v12 = vpop.f32.mrb[13].mxu1 }
 0x5d8   : > { %v1058_v13 = vadd.f32 %v2301_v9, %v1057_v12 }
 0x5d9   : > { %v1077_v14 = vmax.f32 %v1063_v11, 0.0 }
 0x5da   : > { %v1076_v15 = vmax.f32 %v1058_v13, 0.0 }
 0x5dc   : > { %v2819_v19 = vpack.c.bf16 %v1077_v14, %v1076_v15 }
 0x5dd   : > { %v2585_v20 = vpop.f32.mrb[14].mxu1 }
 0x5de   : > { %v1073_v21 = vadd.f32 %v2585_v20, %v2301_v9  ;;  %v1067_v22 = vpop.f32.mrb[15].mxu1  ;;  %2820 = vmatprep.subr.bf16.mxu0 %v2819_v19  ;;  %v2306_v20 = vld [vmem:[#allocation10 + $0x2] ss:$0 sm:$0xff] }
 0x5df   : > { %v1068_v23 = vadd.f32 %v2301_v9, %v1067_v22  ;;  %2822 = vmatpush3.bf16.msra.mxu0 %v2819_v19 }
 0x5e0   : > { %v1079_v24 = vmax.f32 %v1073_v21, 0.0 }
 0x5e1   : > { %v1078_v25 = vmax.f32 %v1068_v23, 0.0 }
 0x5e3   : > { %v2823_v26 = vpack.c.bf16 %v1079_v24, %v1078_v25 }
 0x5e5   : > { %2824 = vmatprep.subr.bf16.mxu0 %v2823_v26 }
 0x5e6   : > { %2826 = vmatpush3.bf16.msra.mxu0 %v2823_v26 }
 0x5e7   : > { %2828 = vmatprep.subr.bf16.mxu0 %v2827_v30 }
 0x5e9   : > { %2595 = vmatmul.mubr.msk.f32.vlgmr.msra.gmra.mrb[0].mxu0 %vm840_vm4, %v3988_v16 }
 0x5ea   : > { %2597 = vmatprep.mubr.msk.f32.mxu0 %vm840_vm4, %v3991_v17  ;;  %2830 = vmatpush3.bf16.msra.mxu0 %v2827_v30 }
 0x5eb   : > { %2832 = vmatprep.subr.bf16.mxu0 %v2831_v33 }
 0x5ed   : > { %2598 = vmatmul.mubr.msk.f32.gmra.mrb[2].mxu0 %vm840_vm4, %v3998_v18 }
 0x5ee   : > { %2834 = vmatpush3.bf16.msra.mxu0 %v2831_v33 }
 0x5ef   : > { %2836 = vmatprep.subr.bf16.mxu0 %v2835_v36 }
 0x5f2   : > { %2838 = vmatpush3.bf16.msra.mxu0 %v2835_v36  ;;  %v1422_v36 = vld [vmem:[#allocation9 + $0x188] sm:$0xff] }
 0x5f3   : > { %2840 = vmatprep.subr.bf16.mxu0 %v2839_v39 }
 0x5f6   : > { %2842 = vmatpush3.bf16.msra.mxu0 %v2839_v39  ;;  %v1424_v39 = vld [vmem:[#allocation9 + $0x198] sm:$0xff] }
 0x5f7   : > { %2844 = vmatprep.subr.bf16.mxu0 %v2843_v54 }
 0x5fa   : > { %2846 = vmatpush3.bf16.msra.mxu0 %v2843_v54 }
 0x5fb   : > { %2848 = vmatprep.subr.bf16.mxu0 %v2847_v57 }
 0x5fe   : > { %2850 = vmatpush3.bf16.msra.mxu0 %v2847_v57 }
 0x5ff   : > { %2852 = vmatprep.subr.bf16.mxu0 %v2851_v60 }
 0x602   : > { %2854 = vmatpush3.bf16.msra.mxu0 %v2851_v60  ;;  %v1430_v60 = vld [vmem:[#allocation9 + $0x1c8] sm:$0xff] }
 0x603   : > { %2856 = vmatprep.subr.bf16.mxu0 %v2855_v63  ;;  %v2883_v61 = vpack.c.bf16 %v1430_v60, %v1429_v59 }
 0x606   : > { %2858 = vmatpush3.bf16.msra.mxu0 %v2855_v63  ;;  %v1432_v63 = vld [vmem:[#allocation9 + $0x1d8] sm:$0xff] }
 0x6bc   : > { %v2596_v40 = vpop.f32.mrb[0].mxu0 }
 0x6bd   : > { %v1166_v41 = vadd.f32 %v2596_v40, %v1077_v14  ;;  %v1146_v42 = vpop.f32.mrb[1].mxu0  ;;  %v2871_v40 = vpack.c.bf16 %v1424_v39, %v1423_v37 }
 0x6be   : > { %v1165_v43 = vadd.f32 %v1146_v42, %v1076_v15  ;;  %v1426_v42 = vld [vmem:[#allocation9 + $0x1a8] sm:$0xff] }
 0x6bf   : > { %v1170_v44 = vmul.f32 %v1166_v41, %v1166_v41 }
 0x6c0   : > { %v2599_v45 = vpop.f32.mrb[2].mxu0  ;;  %v1169_v46 = vmul.f32 %v1165_v43, %v1165_v43 }
 0x6c1   : > { %v1168_v47 = vadd.f32 %v2599_v45, %v1079_v24  ;;  %1175 = vadd.xlane.f32.xlu0 %v1170_v44  ;;  %v1156_v48 = vpop.f32.mrb[3].mxu0  ;;  %v1427_v44 = vld [vmem:[#allocation9 + $0x1b0] sm:$0xff]  ;;  %v1428_v45 = vld [vmem:[#allocation9 + $0x1b8] sm:$0xff] }
 0x6c2   : > { %v1167_v49 = vadd.f32 %v1156_v48, %v1078_v25  ;;  %1173 = vadd.xlane.f32.xlu1 %v1169_v46  ;;  %v2879_v46 = vpack.c.bf16 %v1428_v45, %v1427_v44 }
 0x6c3   : > { %v1172_v50 = vmul.f32 %v1168_v47, %v1168_v47 }
 0x6c4   : > { %v1171_v51 = vmul.f32 %v1167_v49, %v1167_v49 }
 0x6c5   : > { %1179 = vadd.xlane.f32.xlu0 %v1172_v50 }
 0x6c6   : > { %1177 = vadd.xlane.f32.xlu1 %v1171_v51 }
 0x74e   : > { %v1176_v1 = vpop.xlane.xlu0 %1175 }
 0x74f   : > { %v1182_v2 = vmax.f32 %v1176_v1, 1e-24  ;;  %v1174_v3 = vpop.xlane.xlu1 %1173  ;;  %v2887_v1 = vpack.c.bf16 %v1432_v63, %v1431_v62 }
 0x750   : > { %v1181_v4 = vmax.f32 %v1174_v3, 1e-24  ;;  %v1434_v3 = vld [vmem:[#allocation9 + $0x1e8] sm:$0xff] }
 0x751   : > { %3154 = vrsqrt.f32 %v1182_v2  ;;  %v1433_v2 = vld [vmem:[#allocation9 + $0x1e0] sm:$0xff] }
 0x752   : > { %3156 = vrsqrt.f32 %v1181_v4  ;;  %v1180_v5 = vpop.xlane.xlu0 %1179  ;;  %v2891_v4 = vpack.c.bf16 %v1434_v3, %v1433_v2 }
 0x753   : > { %v1184_v6 = vmax.f32 %v1180_v5, 1e-24  ;;  %v1178_v7 = vpop.xlane.xlu1 %1177  ;;  %v1435_v5 = vld [vmem:[#allocation9 + $0x1f0] sm:$0xff] }
 0x754   : > { %v1183_v8 = vmax.f32 %v1178_v7, 1e-24 }
 0x755   : > { %3158 = vrsqrt.f32 %v1184_v6  ;;  %v1436_v6 = vld [vmem:[#allocation9 + $0x1f8] sm:$0xff] }
 0x756   : > { %3160 = vrsqrt.f32 %v1183_v8  ;;  %v2895_v7 = vpack.c.bf16 %v1436_v6, %v1435_v5  ;;  %v1756_v5 = vld [vmem:[#allocation13 + $0x18] sm:$0xff] }
 0x75b   : > { %v3155_v9 = vpop.eup %3154 }
 0x75c   : > { %v3157_v10 = vpop.eup %3156  ;;  %v1190_v12 = vmul.f32 %v3155_v9, %v1166_v41  ;;  %v1425_v41 = vld [vmem:[#allocation9 + $0x1a0] sm:$0xff] }
 0x75d   : > { %v1189_v11 = vmul.f32 %v3157_v10, %v1165_v43  ;;  %v2875_v43 = vpack.c.bf16 %v1426_v42, %v1425_v41 }
 0x75f   : > { %v3159_v13 = vpop.eup %3158  ;;  %2632 = vmatprep.mubr.f32.mxu0 %v1189_v11 }
 0x760   : > { %v3161_v14 = vpop.eup %3160  ;;  %2633 = vmatmul.mubr.f32.vlgmr.msra.gmra.mrb[4].mxu0 %v1190_v12  ;;  %v1192_v19 = vmul.f32 %v3159_v13, %v1168_v47 }
 0x761   : > { %v1191_v15 = vmul.f32 %v3161_v14, %v1167_v49 }
 0x763   : > { %2635 = vmatprep.mubr.f32.mxu0 %v1191_v15 }
 0x764   : > { %2636 = vmatmul.mubr.f32.gmra.mrb[6].mxu0 %v1192_v19 }
 0x765   : > { %2698 = vmatprep.mubr.msk.f32.mxu0 %vm840_vm4, %v3981_v0  ;;  %v1421_v0 = vld [vmem:[#allocation9 + $0x180] sm:$0xff] }
 0x766   : > { %v2867_v38 = vpack.c.bf16 %v1422_v36, %v1421_v0 }
 0x833   : > { %v2634_v21 = vpop.f32.mrb[4].mxu0 }
 0x834   : > { %v1290_v22 = vadd.f32 %v2634_v21, %v2306_v20  ;;  %v1284_v23 = vpop.f32.mrb[5].mxu0 }
 0x835   : > { %v1285_v24 = vadd.f32 %v2306_v20, %v1284_v23 }
 0x836   : > { %v1304_v25 = vmax.f32 %v1290_v22, 0.0 }
 0x837   : > { %v1303_v26 = vmax.f32 %v1285_v24, 0.0  ;;  %v2637_v27 = vpop.f32.mrb[6].mxu0 }
 0x838   : > { %v1300_v28 = vadd.f32 %v2637_v27, %v2306_v20  ;;  %v1294_v29 = vpop.f32.mrb[7].mxu0  ;;  %v2311_v27 = vld [vmem:[#allocation10 + $0x3] ss:$0 sm:$0xff] }
 0x839   : > { %v2859_v30 = vpack.c.bf16 %v1304_v25, %v1303_v26  ;;  %v1295_v31 = vadd.f32 %v2306_v20, %v1294_v29 }
 0x83a   : > { %v1306_v33 = vmax.f32 %v1300_v28, 0.0 }
 0x83b   : > { %v1305_v34 = vmax.f32 %v1295_v31, 0.0  ;;  %2860 = vmatprep.subr.bf16.mxu1 %v2859_v30 }
 0x83c   : > { %2862 = vmatpush3.bf16.msra.mxu1 %v2859_v30 }
 0x83d   : > { %v2863_v35 = vpack.c.bf16 %v1306_v33, %v1305_v34 }
 0x83f   : > { %2864 = vmatprep.subr.bf16.mxu1 %v2863_v35 }
 0x840   : > { %2866 = vmatpush3.bf16.msra.mxu1 %v2863_v35 }
 0x841   : > { %2868 = vmatprep.subr.bf16.mxu1 %v2867_v38 }
 0x843   : > { %2647 = vmatmul.mubr.msk.f32.vlgmr.msra.gmra.mrb[16].mxu1 %vm840_vm4, %v3988_v16 }
 0x844   : > { %2649 = vmatprep.mubr.msk.f32.mxu1 %vm840_vm4, %v3991_v17  ;;  %2870 = vmatpush3.bf16.msra.mxu1 %v2867_v38 }
 0x845   : > { %2872 = vmatprep.subr.bf16.mxu1 %v2871_v40 }
 0x847   : > { %2650 = vmatmul.mubr.msk.f32.gmra.mrb[18].mxu1 %vm840_vm4, %v3998_v18 }
 0x848   : > { %2874 = vmatpush3.bf16.msra.mxu1 %v2871_v40 }
 0x849   : > { %2876 = vmatprep.subr.bf16.mxu1 %v2875_v43 }
 0x84c   : > { %2878 = vmatpush3.bf16.msra.mxu1 %v2875_v43 }
 0x84d   : > { %2880 = vmatprep.subr.bf16.mxu1 %v2879_v46 }
 0x850   : > { %2882 = vmatpush3.bf16.msra.mxu1 %v2879_v46 }
 0x851   : > { %2884 = vmatprep.subr.bf16.mxu1 %v2883_v61 }
 0x854   : > { %2886 = vmatpush3.bf16.msra.mxu1 %v2883_v61 }
 0x855   : > { %2888 = vmatprep.subr.bf16.mxu1 %v2887_v1 }
 0x858   : > { %2890 = vmatpush3.bf16.msra.mxu1 %v2887_v1 }
 0x859   : > { %2892 = vmatprep.subr.bf16.mxu1 %v2891_v4 }
 0x85c   : > { %2894 = vmatpush3.bf16.msra.mxu1 %v2891_v4  ;;  %v1754_v4 = vld [vmem:[#allocation13 + $0x8] sm:$0xff] }
 0x85d   : > { %2896 = vmatprep.subr.bf16.mxu1 %v2895_v7 }
 0x860   : > { %2898 = vmatpush3.bf16.msra.mxu1 %v2895_v7 }
 0x916   : > { %v2648_v47 = vpop.f32.mrb[16].mxu1 }
 0x917   : > { %v1393_v48 = vadd.f32 %v2648_v47, %v1304_v25  ;;  %v1373_v49 = vpop.f32.mrb[17].mxu1 }
 0x918   : > { %v1392_v50 = vadd.f32 %v1373_v49, %v1303_v26 }
 0x919   : > { %v1397_v51 = vmul.f32 %v1393_v48, %v1393_v48 }
 0x91a   : > { %v2651_v52 = vpop.f32.mrb[18].mxu1  ;;  %v1396_v53 = vmul.f32 %v1392_v50, %v1392_v50 }
 0x91b   : > { %v1395_v54 = vadd.f32 %v2651_v52, %v1306_v33  ;;  %1402 = vadd.xlane.f32.xlu0 %v1397_v51  ;;  %v1383_v55 = vpop.f32.mrb[19].mxu1 }
 0x91c   : > { %v1394_v56 = vadd.f32 %v1383_v55, %v1305_v34  ;;  %1400 = vadd.xlane.f32.xlu1 %v1396_v53 }
 0x91d   : > { %v1399_v57 = vmul.f32 %v1395_v54, %v1395_v54 }
 0x91e   : > { %v1398_v58 = vmul.f32 %v1394_v56, %v1394_v56 }
 0x91f   : > { %1406 = vadd.xlane.f32.xlu0 %v1399_v57 }
 0x920   : > { %1404 = vadd.xlane.f32.xlu1 %v1398_v58 }
 0x9a8   : > { %v1403_v8 = vpop.xlane.xlu0 %1402 }
 0x9a9   : > { %v1409_v9 = vmax.f32 %v1403_v8, 1e-24  ;;  %v1401_v10 = vpop.xlane.xlu1 %1400 }
 0x9aa   : > { %v1408_v11 = vmax.f32 %v1401_v10, 1e-24  ;;  %v1753_v10 = vld [vmem:[#allocation13] sm:$0xff] }
 0x9ab   : > { %3162 = vrsqrt.f32 %v1409_v9  ;;  %v2913_v9 = vpack.c.bf16 %v1756_v5, %v1754_v4 }
 0x9ac   : > { %3164 = vrsqrt.f32 %v1408_v11  ;;  %v1407_v12 = vpop.xlane.xlu0 %1406  ;;  %v1755_v11 = vld [vmem:[#allocation13 + $0x10] sm:$0xff] }
 0x9ad   : > { %v1411_v13 = vmax.f32 %v1407_v12, 1e-24  ;;  %v1405_v14 = vpop.xlane.xlu1 %1404 }
 0x9ae   : > { %v1410_v15 = vmax.f32 %v1405_v14, 1e-24  ;;  %v1760_v14 = vld [vmem:[#allocation13 + $0x38] sm:$0xff] }
 0x9af   : > { %3166 = vrsqrt.f32 %v1411_v13  ;;  %v1758_v13 = vld [vmem:[#allocation13 + $0x28] sm:$0xff] }
 0x9b0   : > { %3168 = vrsqrt.f32 %v1410_v15  ;;  %v1647_v15 = vld [vmem:[%s3948_s14] sm:$0xff] }
 0x9b5   : > { %v3163_v19 = vpop.eup %3162 }
 0x9b6   : > { %v3165_v20 = vpop.eup %3164  ;;  %v1417_v22 = vmul.f32 %v3163_v19, %v1393_v48  ;;  %v2915_v19 = vpack.c.bf16 %v1755_v11, %v1753_v10  ;;  %v1732_v10 = vld [vmem:[#allocation12 + $0x58] sm:$0xff] }
 0x9b7   : > { %v1416_v21 = vmul.f32 %v3165_v20, %v1392_v50  ;;  %v2917_v20 = vpack.c.bf16 %v1760_v14, %v1758_v13  ;;  %v1729_v13 = vld [vmem:[#allocation12 + $0x40] sm:$0xff]  ;;  %v1731_v14 = vld [vmem:[#allocation12 + $0x50] sm:$0xff] }
 0x9b9   : > { %v3167_v23 = vpop.eup %3166  ;;  %2684 = vmatprep.mubr.f32.mxu1 %v1416_v21  ;;  %v1757_v21 = vld [vmem:[#allocation13 + $0x20] sm:$0xff] }
 0x9ba   : > { %v3169_v24 = vpop.eup %3168  ;;  %2685 = vmatmul.mubr.f32.vlgmr.msra.gmra.mrb[20].mxu1 %v1417_v22  ;;  %v1419_v26 = vmul.f32 %v3167_v23, %v1395_v54  ;;  %v1759_v22 = vld [vmem:[#allocation13 + $0x30] sm:$0xff]  ;;  %v1762_v23 = vld [vmem:[#allocation13 + $0x48] sm:$0xff] }
 0x9bb   : > { %v1418_v25 = vmul.f32 %v3169_v24, %v1394_v56  ;;  %v1764_v24 = vld [vmem:[#allocation13 + $0x58] sm:$0xff] }
 0x9bd   : > { %2687 = vmatprep.mubr.f32.mxu1 %v1418_v25  ;;  %v2919_v25 = vpack.c.bf16 %v1759_v22, %v1757_v21  ;;  %v1733_v22 = vld [vmem:[#allocation12 + $0x60] sm:$0xff] }
 0x9be   : > { %2688 = vmatmul.mubr.f32.gmra.mrb[22].mxu1 %v1419_v26  ;;  %v2921_v26 = vpack.c.bf16 %v1764_v24, %v1762_v23  ;;  %v1735_v23 = vld [vmem:[#allocation12 + $0x70] sm:$0xff]  ;;  %v1738_v24 = vld [vmem:[#allocation12 + $0x88] sm:$0xff] }
 0xa8d   : > { %v2686_v28 = vpop.f32.mrb[20].mxu1 }
 0xa8e   : > { %v1517_v29 = vadd.f32 %v2686_v28, %v2311_v27  ;;  %v1511_v30 = vpop.f32.mrb[21].mxu1  ;;  %v1763_v28 = vld [vmem:[#allocation13 + $0x50] sm:$0xff] }
 0xa8f   : > { %v1512_v31 = vadd.f32 %v2311_v27, %v1511_v30  ;;  %v1768_v30 = vld [vmem:[#allocation13 + $0x78] sm:$0xff] }
 0xa90   : > { %v1531_v33 = vmax.f32 %v1517_v29, 0.0  ;;  %v1766_v29 = vld [vmem:[#allocation13 + $0x68] sm:$0xff] }
 0xa91   : > { %v1530_v34 = vmax.f32 %v1512_v31, 0.0  ;;  %v2689_v35 = vpop.f32.mrb[22].mxu1 }
 0xa92   : > { %v1527_v0 = vadd.f32 %v2689_v35, %v2311_v27  ;;  %v1521_v36 = vpop.f32.mrb[23].mxu1  ;;  %v1767_v35 = vld [vmem:[#allocation13 + $0x70] sm:$0xff] }
 0xa93   : > { %v2899_v37 = vpack.c.bf16 %v1531_v33, %v1530_v34  ;;  %v1522_v38 = vadd.f32 %v2311_v27, %v1521_v36  ;;  %v1761_v27 = vld [vmem:[#allocation13 + $0x40] sm:$0xff]  ;;  %v1772_v36 = vld [vmem:[#allocation13 + $0x98] sm:$0xff] }
 0xa94   : > { %v1533_v39 = vmax.f32 %v1527_v0, 0.0  ;;  %v2923_v31 = vpack.c.bf16 %v1763_v28, %v1761_v27  ;;  %v1770_v0 = vld [vmem:[#allocation13 + $0x88] sm:$0xff]  ;;  %v1737_v28 = vld [vmem:[#allocation12 + $0x80] sm:$0xff] }
 0xa95   : > { %v1532_v40 = vmax.f32 %v1522_v38, 0.0  ;;  %2900 = vmatprep.subr.bf16.mxu0 %v2899_v37  ;;  %v2929_v38 = vpack.c.bf16 %v1772_v36, %v1770_v0  ;;  %v1743_v0 = vld [vmem:[#allocation12 + $0xb0] sm:$0xff]  ;;  %v1746_v36 = vld [vmem:[#allocation12 + $0xc8] sm:$0xff] }
 0xa96   : > { %2902 = vmatpush3.bf16.msra.mxu0 %v2899_v37 }
 0xa97   : > { %v2903_v41 = vpack.c.bf16 %v1533_v39, %v1532_v40 }
 0xa99   : > { %2904 = vmatprep.subr.bf16.mxu0 %v2903_v41 }
 0xa9a   : > { %2906 = vmatpush3.bf16.msra.mxu0 %v2903_v41  ;;  %v1774_v41 = vld [vmem:[#allocation13 + $0xa8] sm:$0xff] }
 0xa9d   : > { %2699 = vmatmul.mubr.msk.f32.vlgmr.msra.gmra.mrb[8].mxu0 %vm840_vm4, %v3988_v16 }
 0xa9e   : > { %2701 = vmatprep.mubr.msk.f32.mxu0 %vm840_vm4, %v3991_v17  ;;  %v3537_v17 = vmov 0.0|0.0  }
 0xa9f   : > { %2907 = vmatprep.subr.bf16.mxu0 %v3537_v17 }
 0xaa1   : > { %2702 = vmatmul.mubr.msk.f32.gmra.mrb[10].mxu0 %vm840_vm4, %v3998_v18  ;;  %v3539_v18 = vmov 0.0  }
 0xaa2   : > { %2712 = vmatprep.mubr.msk.f32.mxu0 %vm3538_vm5, %v3539_v18 }
 0xb70   : > { %v2700_v42 = vpop.f32.mrb[8].mxu0 }
 0xb71   : > { %v1620_v43 = vadd.f32 %v2700_v42, %v1531_v33  ;;  %v1600_v44 = vpop.f32.mrb[9].mxu0  ;;  %v2925_v33 = vpack.c.bf16 %v1768_v30, %v1766_v29  ;;  %v1776_v42 = vld [vmem:[#allocation13 + $0xb8] sm:$0xff]  ;;  %v1739_v29 = vld [vmem:[#allocation12 + $0x90] sm:$0xff]  ;;  %v1742_v30 = vld [vmem:[#allocation12 + $0xa8] sm:$0xff] }
 0xb72   : > { %v1619_v45 = vadd.f32 %v1600_v44, %v1530_v34  ;;  %v1765_v34 = vld [vmem:[#allocation13 + $0x60] sm:$0xff]  ;;  %v2933_v44 = vpack.c.bf16 %v1776_v42, %v1774_v41  ;;  %v1747_v41 = vld [vmem:[#allocation12 + $0xd0] sm:$0xff]  ;;  %v1750_v42 = vld [vmem:[#allocation12 + $0xe8] sm:$0xff] }
 0xb73   : > { %v1624_v46 = vmul.f32 %v1620_v43, %v1620_v43  ;;  %v2927_v37 = vpack.c.bf16 %v1767_v35, %v1765_v34  ;;  %v1741_v35 = vld [vmem:[#allocation12 + $0xa0] sm:$0xff] }
 0xb74   : > { %v2703_v47 = vpop.f32.mrb[10].mxu0  ;;  %v1623_v48 = vmul.f32 %v1619_v45, %v1619_v45 }
 0xb75   : > { %v1622_v49 = vadd.f32 %v2703_v47, %v1533_v39  ;;  %1629 = vadd.xlane.f32.xlu0 %v1624_v46  ;;  %v1610_v50 = vpop.f32.mrb[11].mxu0  ;;  %v1769_v39 = vld [vmem:[#allocation13 + $0x80] sm:$0xff]  ;;  %v1775_v46 = vld [vmem:[#allocation13 + $0xb0] sm:$0xff]  ;;  %v1778_v47 = vld [vmem:[#allocation13 + $0xc8] sm:$0xff] }
 0xb76   : > { %v1621_v51 = vadd.f32 %v1610_v50, %v1532_v40  ;;  %1627 = vadd.xlane.f32.xlu1 %v1623_v48  ;;  %v1771_v40 = vld [vmem:[#allocation13 + $0x90] sm:$0xff]  ;;  %v1780_v48 = vld [vmem:[#allocation13 + $0xd8] sm:$0xff] }
 0xb77   : > { %v1626_v52 = vmul.f32 %v1622_v49, %v1622_v49  ;;  %v2937_v50 = vpack.c.bf16 %v1780_v48, %v1778_v47  ;;  %v1751_v47 = vld [vmem:[#allocation12 + $0xf0] sm:$0xff]  ;;  %v1932_v48 = vld [vmem:[#allocation15 + $0x8] sm:$0xff] }
 0xb78   : > { %v1625_v16 = vmul.f32 %v1621_v51, %v1621_v51 }
 0xb79   : > { %1633 = vadd.xlane.f32.xlu0 %v1626_v52  ;;  %v1779_v52 = vld [vmem:[#allocation13 + $0xd0] sm:$0xff] }
 0xb7a   : > { %1631 = vadd.xlane.f32.xlu1 %v1625_v16  ;;  %v1782_v16 = vld [vmem:[#allocation13 + $0xe8] sm:$0xff] }
 0xc02   : > { %v1630_v53 = vpop.xlane.xlu0 %1629 }
 0xc03   : > { %v1636_v54 = vmax.f32 %v1630_v53, 1e-24  ;;  %v1628_v55 = vpop.xlane.xlu1 %1627 }
 0xc04   : > { %v1635_v56 = vmax.f32 %v1628_v55, 1e-24  ;;  %v1781_v55 = vld [vmem:[#allocation13 + $0xe0] sm:$0xff] }
 0xc05   : > { %3170 = vrsqrt.f32 %v1636_v54 }
 0xc06   : > { %3172 = vrsqrt.f32 %v1635_v56  ;;  %v1634_v57 = vpop.xlane.xlu0 %1633  ;;  %v1783_v56 = vld [vmem:[#allocation13 + $0xf0] sm:$0xff] }
 0xc07   : > { %v1638_v58 = vmax.f32 %v1634_v57, 1e-24  ;;  %v1632_v59 = vpop.xlane.xlu1 %1631  ;;  %v2943_v57 = vpack.c.bf16 %v1783_v56, %v1781_v55  ;;  %v1935_v56 = vld [vmem:[#allocation15 + $0x20] sm:$0xff] }
 0xc08   : > { %v1637_v60 = vmax.f32 %v1632_v59, 1e-24  ;;  %v1724_v59 = vld [vmem:[#allocation12 + $0x18] sm:$0xff] }
 0xc09   : > { %3174 = vrsqrt.f32 %v1638_v58  ;;  %v1722_v58 = vld [vmem:[#allocation12 + $0x8] sm:$0xff] }
 0xc0a   : > { %3176 = vrsqrt.f32 %v1637_v60  ;;  %v2945_v60 = vpack.c.bf16 %v1724_v59, %v1722_v58  ;;  %v1940_v58 = vld [vmem:[#allocation15 + $0x48] sm:$0xff]  ;;  %v1942_v59 = vld [vmem:[#allocation15 + $0x58] sm:$0xff] }
 0xc0f   : > { %v3171_v61 = vpop.eup %3170 }
 0xc10   : > { %v3173_v62 = vpop.eup %3172  ;;  %v1644_v63 = vmul.f32 %v3171_v61, %v1620_v43  ;;  %v2931_v43 = vpack.c.bf16 %v1771_v40, %v1769_v39  ;;  %v1721_v61 = vld [vmem:[#allocation12] sm:$0xff] }
 0xc11   : > { %v1643_v1 = vmul.f32 %v3173_v62, %v1619_v45  ;;  %v1773_v45 = vld [vmem:[#allocation13 + $0xa0] sm:$0xff]  ;;  %v1723_v62 = vld [vmem:[#allocation12 + $0x10] sm:$0xff] }
 0xc12   : > { %v1745_v40 = vld [vmem:[#allocation12 + $0xc0] sm:$0xff] }
 0xc13   : > { %v3175_v2 = vpop.eup %3174  ;;  %v2908_v3 = vpack.c.bf16 %v1644_v63, %v1643_v1  ;;  %v1726_v63 = vld [vmem:[#allocation12 + $0x28] sm:$0xff]  ;;  %v1728_v1 = vld [vmem:[#allocation12 + $0x38] sm:$0xff] }
 0xc14   : > { %v3177_v6 = vpop.eup %3176  ;;  %v1646_v7 = vmul.f32 %v3175_v2, %v1622_v49  ;;  %v2935_v49 = vpack.c.bf16 %v1775_v46, %v1773_v45  ;;  %v1749_v46 = vld [vmem:[#allocation12 + $0xe0] sm:$0xff] }
 0xc15   : > { %2909 = vmatpush3.bf16.msra.mxu0 %v2908_v3  ;;  %v1645_v8 = vmul.f32 %v3177_v6, %v1621_v51  ;;  %v1777_v51 = vld [vmem:[#allocation13 + $0xc0] sm:$0xff]  ;;  %v2947_v3 = vpack.c.bf16 %v1723_v62, %v1721_v61  ;;  %v2949_v6 = vpack.c.bf16 %v1728_v1, %v1726_v63  ;;  %v2985_v61 = vpack.c.bf16 %v1942_v59, %v1940_v58  ;;  %v1941_v63 = vld [vmem:[#allocation15 + $0x50] sm:$0xff]  ;;  %v1944_v1 = vld [vmem:[#allocation15 + $0x68] sm:$0xff] }
 0xc16   : > { %2910 = vmatprep.subr.bf16.mxu0 %v3537_v17  ;;  %v1784_v17 = vld [vmem:[#allocation13 + $0xf8] sm:$0xff]  ;;  %v2939_v53 = vpack.c.bf16 %v1779_v52, %v1777_v51  ;;  %v1931_v52 = vld [vmem:[#allocation15] sm:$0xff] }
 0xc17   : > { %v2911_v12 = vpack.c.bf16 %v1646_v7, %v1645_v8  ;;  %v2941_v54 = vpack.c.bf16 %v1784_v17, %v1782_v16  ;;  %v1725_v7 = vld [vmem:[#allocation12 + $0x20] sm:$0xff]  ;;  %v1727_v8 = vld [vmem:[#allocation12 + $0x30] sm:$0xff]  ;;  %v1936_v17 = vld [vmem:[#allocation15 + $0x28] sm:$0xff] }
 0xc18   : > { %v2951_v11 = vpack.c.bf16 %v1727_v8, %v1725_v7  ;;  %v1933_v16 = vld [vmem:[#allocation15 + $0x10] sm:$0xff]  ;;  %v1939_v62 = vld [vmem:[#allocation15 + $0x40] sm:$0xff]  ;;  %v1948_v8 = vld [vmem:[#allocation15 + $0x88] sm:$0xff] }
 0xc19   : > { %2912 = vmatpush3.bf16.msra.mxu0 %v2911_v12  ;;  %v1945_v7 = vld [vmem:[#allocation15 + $0x70] sm:$0xff] }
 0xc1a   : > { %2914 = vmatprep.subr.bf16.mxu0 %v2913_v9  ;;  %v1730_v9 = vld [vmem:[#allocation12 + $0x48] sm:$0xff] }
 0xc1b   : > { %v2953_v12 = vpack.c.bf16 %v1732_v10, %v1730_v9  ;;  %v1950_v9 = vld [vmem:[#allocation15 + $0x98] sm:$0xff] }
 0xc1c   : > { %2713 = vmatmul.mubr.msk.f32.vlgmr.msra.gmra.mrb[12].mxu0 %vm840_vm4, %v1647_v15  ;;  %v1734_v15 = vld [vmem:[#allocation12 + $0x68] sm:$0xff]  ;;  %v2993_v10 = vpack.c.bf16 %v1950_v9, %v1948_v8 }
 0xc1d   : > { %2916 = vmatpush1.bf16.msra.mxu0 %v2915_v19  ;;  %1852 = vmatprep.mubr.f32.mxu0 %v3539_v18  ;;  %v1736_v19 = vld [vmem:[#allocation12 + $0x78] sm:$0xff] }
 0xc1e   : > { %2918 = vmatprep.subr.bf16.mxu0 %v2917_v20  ;;  %v2955_v20 = vpack.c.bf16 %v1731_v14, %v1729_v13  ;;  %v2957_v21 = vpack.c.bf16 %v1736_v19, %v1734_v15  ;;  %v1954_v13 = vld [vmem:[#allocation15 + $0xb8] sm:$0xff]  ;;  %v1951_v19 = vld [vmem:[#allocation15 + $0xa0] sm:$0xff] }
 0xc21   : > { %2920 = vmatpush1.bf16.msra.mxu0 %v2919_v25  ;;  %v1740_v25 = vld [vmem:[#allocation12 + $0x98] sm:$0xff] }
 0xc22   : > { %2922 = vmatprep.subr.bf16.mxu0 %v2921_v26  ;;  %v2959_v26 = vpack.c.bf16 %v1735_v23, %v1733_v22  ;;  %v2961_v27 = vpack.c.bf16 %v1740_v25, %v1738_v24  ;;  %v1958_v22 = vld [vmem:[#allocation15 + $0xd8] sm:$0xff]  ;;  %v1955_v25 = vld [vmem:[#allocation15 + $0xc0] sm:$0xff] }
 0xc25   : > { %2924 = vmatpush1.bf16.msra.mxu0 %v2923_v31  ;;  %v1744_v31 = vld [vmem:[#allocation12 + $0xb8] sm:$0xff] }
 0xc26   : > { %2926 = vmatprep.subr.bf16.mxu0 %v2925_v33  ;;  %v2963_v33 = vpack.c.bf16 %v1739_v29, %v1737_v28  ;;  %v2965_v34 = vpack.c.bf16 %v1744_v31, %v1742_v30  ;;  %v1962_v28 = vld [vmem:[#allocation15 + $0xf8] sm:$0xff]  ;;  %v1959_v31 = vld [vmem:[#allocation15 + $0xe0] sm:$0xff] }
 0xc29   : > { %2928 = vmatpush1.bf16.msra.mxu0 %v2927_v37  ;;  %v1748_v37 = vld [vmem:[#allocation12 + $0xd8] sm:$0xff] }
 0xc2a   : > { %2930 = vmatprep.subr.bf16.mxu0 %v2929_v38  ;;  %v2967_v38 = vpack.c.bf16 %v1743_v0, %v1741_v35  ;;  %v2969_v39 = vpack.c.bf16 %v1748_v37, %v1746_v36  ;;  %v1930_v35 = vld [vmem:[%s504_s2] sm:$0x1]  ;;  %v2039_v0 = vshrl.u32 %v597_v32, 7  ;;  %v2036_v37 = vld [vmem:[#allocation16] sm:$0x3] }
 0xc2c   : > { %v2040_v36 = vsub.s32 0, %v2039_v0 }
 0xc2d   : > { %2932 = vmatpush1.bf16.msra.mxu0 %v2931_v43  ;;  %v1752_v43 = vld [vmem:[#allocation12 + $0xf8] sm:$0xff] }
 0xc2e   : > { %2934 = vmatprep.subr.bf16.mxu0 %v2933_v44  ;;  %v2971_v44 = vpack.c.bf16 %v1747_v41, %v1745_v40  ;;  %v2973_v45 = vpack.c.bf16 %v1752_v43, %v1750_v42  ;;  %v2041_v41 = vrot.slane %v2036_v37, %v2040_v36 }
 0xc31   : > { %2936 = vmatpush1.bf16.msra.mxu0 %v2935_v49  ;;  %v1934_v49 = vld [vmem:[#allocation15 + $0x18] sm:$0xff] }
 0xc32   : > { %2938 = vmatprep.subr.bf16.mxu0 %v2937_v50  ;;  %v2975_v50 = vpack.c.bf16 %v1751_v47, %v1749_v46  ;;  %v2977_v51 = vpack.c.bf16 %v1934_v49, %v1932_v48 }
 0xc35   : > { %2940 = vmatpush1.bf16.msra.mxu0 %v2939_v53  ;;  %v1938_v53 = vld [vmem:[#allocation15 + $0x38] sm:$0xff] }
 0xc36   : > { %2942 = vmatprep.subr.bf16.mxu0 %v2941_v54  ;;  %v2979_v54 = vpack.c.bf16 %v1933_v16, %v1931_v52  ;;  %v2981_v55 = vpack.c.bf16 %v1938_v53, %v1936_v17 }
 0xc39   : > { %2944 = vmatpush1.bf16.msra.mxu0 %v2943_v57  ;;  %v1937_v57 = vld [vmem:[#allocation15 + $0x30] sm:$0xff] }
 0xc3a   : > { %2946 = vmatprep.subr.bf16.mxu0 %v2945_v60  ;;  %v2983_v60 = vpack.c.bf16 %v1937_v57, %v1935_v56 }
 0xcef   : > { %v4028_v2 = vpop.f32.mrb[12].mxu0 }
 0xcf0   : > { %v1786_v4 = vrot.slane %v4028_v2, 1  ;;  %v2714_v5 = vpop.f32.mrb[13].mxu0 }
 0xcf2   : > { %1853 = vmatmul.mubr.f32.vlgmr.msra.gmra.mrb[14].mxu0 %v1786_v4  ;;  %v2987_v4 = vpack.c.bf16 %v1941_v63, %v1939_v62 }
 0xcf3   : > { %2948 = vmatpush1.bf16.msra.mxu0 %v2947_v3  ;;  %1923 = vmatprep.mubr.f32.mxu0 %v3539_v18  ;;  %v1946_v3 = vld [vmem:[#allocation15 + $0x78] sm:$0xff] }
 0xcf4   : > { %2950 = vmatprep.subr.bf16.mxu0 %v2949_v6  ;;  %v2989_v5 = vpack.c.bf16 %v1946_v3, %v1944_v1  ;;  %v1943_v6 = vld [vmem:[#allocation15 + $0x60] sm:$0xff] }
 0xcf7   : > { %2952 = vmatpush1.bf16.msra.mxu0 %v2951_v11  ;;  %v1947_v11 = vld [vmem:[#allocation15 + $0x80] sm:$0xff] }
 0xcf8   : > { %2954 = vmatprep.subr.bf16.mxu0 %v2953_v12  ;;  %v1952_v12 = vld [vmem:[#allocation15 + $0xa8] sm:$0xff] }
 0xcf9   : > { %v2997_v15 = vpack.c.bf16 %v1954_v13, %v1952_v12 }
 0xcfb   : > { %2956 = vmatpush1.bf16.msra.mxu0 %v2955_v20  ;;  %v1953_v20 = vld [vmem:[#allocation15 + $0xb0] sm:$0xff] }
 0xcfc   : > { %2958 = vmatprep.subr.bf16.mxu0 %v2957_v21  ;;  %v1956_v21 = vld [vmem:[#allocation15 + $0xc8] sm:$0xff]  ;;  %v2999_v23 = vpack.c.bf16 %v1953_v20, %v1951_v19 }
 0xcfd   : > { %v3001_v24 = vpack.c.bf16 %v1958_v22, %v1956_v21 }
 0xcff   : > { %2960 = vmatpush1.bf16.msra.mxu0 %v2959_v26  ;;  %v1957_v26 = vld [vmem:[#allocation15 + $0xd0] sm:$0xff] }
 0xd00   : > { %2962 = vmatprep.subr.bf16.mxu0 %v2961_v27  ;;  %v1960_v27 = vld [vmem:[#allocation15 + $0xe8] sm:$0xff]  ;;  %v3003_v29 = vpack.c.bf16 %v1957_v26, %v1955_v25 }
 0xd01   : > { %v3005_v30 = vpack.c.bf16 %v1962_v28, %v1960_v27 }
 0xd03   : > { %2964 = vmatpush1.bf16.msra.mxu0 %v2963_v33  ;;  %v1961_v33 = vld [vmem:[#allocation15 + $0xf0] sm:$0xff] }
 0xd04   : > { %2966 = vmatprep.subr.bf16.mxu0 %v2965_v34  ;;  %v3007_v34 = vpack.c.bf16 %v1961_v33, %v1959_v31 }
 0xd07   : > { %2968 = vmatpush1.bf16.msra.mxu0 %v2967_v38  ;;  %v2044_v38 = vsub.s32 1, %v2039_v0 }
 0xd08   : > { %2970 = vmatprep.subr.bf16.mxu0 %v2969_v39  ;;  %v3540_v39 = vmov 1966171168  }
 0xd09   : > { %v2056_v40 = vunpack.c.l.s4 %v3540_v39  ;;  %v2045_v42 = vrot.slane %v2036_v37, %v2044_v38 }
 0xd0b   : > { %2972 = vmatpush1.bf16.msra.mxu0 %v2971_v44  ;;  %v2057_v44 = vunpack.c.0.s8 %v2056_v40 }
 0xd0c   : > { %2974 = vmatprep.subr.bf16.mxu0 %v2973_v45 }
 0xd0f   : > { %2976 = vmatpush1.bf16.msra.mxu0 %v2975_v50  ;;  %v2060_v50 = vsub.s32 %v2057_v44, %v2039_v0 }
 0xd10   : > { %2978 = vmatprep.subr.bf16.mxu0 %v2977_v51 }
 0xd12   : > { %1924 = vmatmul.mubr.f32.vlgmr.msra.gmra.mrb[14].mxu0 %v4028_v2  ;;  %v2991_v2 = vpack.c.bf16 %v1945_v7, %v1943_v6 }
 0xd13   : > { %2980 = vmatpush1.bf16.msra.mxu0 %v2979_v54  ;;  %2027 = vmatprep.mubr.f32.mxu0 %v3539_v18  ;;  %v1949_v18 = vld [vmem:[#allocation15 + $0x90] sm:$0xff] }
 0xd14   : > { %2982 = vmatprep.subr.bf16.mxu0 %v2981_v55  ;;  %v2995_v14 = vpack.c.bf16 %v1949_v18, %v1947_v11 }
 0xd17   : > { %2984 = vmatpush1.bf16.msra.mxu0 %v2983_v60 }
 0xd18   : > { %2986 = vmatprep.subr.bf16.mxu0 %v2985_v61 }
 0xd1b   : > { %2988 = vmatpush1.bf16.msra.mxu0 %v2987_v4 }
 0xd1c   : > { %2990 = vmatprep.subr.bf16.mxu0 %v2989_v5 }
 0xd1f   : > { %2992 = vmatpush1.bf16.msra.mxu0 %v2991_v2 }
 0xd20   : > { %2994 = vmatprep.subr.bf16.mxu0 %v2993_v10 }
 0xd23   : > { %2996 = vmatpush1.bf16.msra.mxu0 %v2995_v14 }
 0xd24   : > { %2998 = vmatprep.subr.bf16.mxu0 %v2997_v15 }
 0xd27   : > { %3000 = vmatpush1.bf16.msra.mxu0 %v2999_v23 }
 0xd28   : > { %3002 = vmatprep.subr.bf16.mxu0 %v3001_v24 }
 0xd2b   : > { %3004 = vmatpush1.bf16.msra.mxu0 %v3003_v29 }
 0xd2c   : > { %3006 = vmatprep.subr.bf16.mxu0 %v3005_v30 }
 0xd2f   : > { %3008 = vmatpush1.bf16.msra.mxu0 %v3007_v34 }
 0xd32   : > { %2028 = vmatmul.mubr.f32.vlgmr.msra.gmra.mrb[14].mxu0 %v1930_v35 }
 0xe05   : > { %v2029_v43 = vpop.f32.mrb[14].mxu0 }
 0xe06   : > { %v2048_v45 = vadd.f32 %v2041_v41, %v2029_v43  ;;  %v2031_v46 = vpop.f32.mrb[15].mxu0 }
 0xe07   : > { %v2049_v47 = vadd.f32 %v2045_v42, %v2031_v46 }
 0xe08   : > { %v2050_v48 = vmax.f32 %v2048_v45, 0.0 }
 0xe09   : > { %v2051_v49 = vmax.f32 %v2049_v47, 0.0 }
 0xe0b   : > { %v2054_v51 = vcombine.low %v2050_v48, %v2051_v49 }
 0xe0d   : > { %v2061_v52 = vrot.slane %v2054_v51, %v2060_v50 }
 0xe0f   : > { %v2068_v16 = vrot.slane %v2061_v52, %v2060_v50 }
 0xe11   : > { %2074 = vst.msk [vmem:[%s592_s5] sm:$0x3] %vm2072_vm6, %v2068_v16 }
 0xe12 PF: > { %s4140_s20 = sld [smem:[#allocation26_spill]]  ;;  %s4141_s13 = sld [smem:[#allocation24_spill]] }
 0xe13   : > { %s4142_s19 = sld [smem:[#allocation27_spill]]  ;;  %s4143_s17 = smov %s3510_s18 }
 0xe18   : > { %p28_p12 = scmp.ge.s32.totalorder %s4140_s20, 6   ;;  %s4144_s18 = smov %s4141_s13 }
 0xe1a   :  { %30 = sbr.rel (!%p28_p12) target bundleno = 17 (0x11), region = 165 }
 0xe21   :  { %2094 = vsyncpa [#allocation3], 1 }
 0xe22   :  { %2096 = vsyncpa [#allocation3 + $0x1], 1 }
 0xe23   :  { %2097 = vsyncpa [#allocation5], 1 }
 0xe24   :  { %2099 = vsyncpa [#allocation5 + $0x1], 1 }
 0xe25   :  { %2100 = vsyncpa [#allocation8], 1 }
 0xe26   :  { %2101 = vsyncpa [#allocation11], 1 }
 0xe27   :  { %2102 = vsyncpa [#allocation14], 1 }
 0xe28   :  { %2103 = vsyncpa [#allocation17], 1 }

// kernel: model_forward.3
= control target key start
LH: loop header
LB: loop body
LE: loop exit
PB: predicated region body
PF: predicated region fallthrough
CT: control target
= control target key end

     0   :  { %10 = vsyncpa [#allocation3], 0  ;;  %s2204_s0 = inlined_call_operand.vmem [shape: f32[4,256], index: 0, kind: input, shape index: {}]   ;;  %s2205_s1 = inlined_call_operand.hbm [shape: f32[8,256,256], index: 1, kind: input, shape index: {}]   ;;  %s2206_s2 = inlined_call_operand.hbm [shape: f32[8,1,256], index: 2, kind: input, shape index: {}]   ;;  %s2207_s3 = inlined_call_operand.hbm [shape: f32[256,128], index: 3, kind: input, shape index: {}]   ;;  %s2208_s4 = inlined_call_operand.hbm [shape: f32[1,128], index: 4, kind: input, shape index: {}]   ;;  %s2209_s5 = inlined_call_operand.vmem [shape: f32[4,128], index: 5, kind: output, shape index: {}]  }
   0x1   :  { %11 = vsyncpa [#allocation5], 0 }
   0x2   :  { %12 = vsyncpa [#allocation8], 0  ;;  %s2085_s18 = smov [#allocation4]   ;;  %s1991_s22 = scalar_lea.hbm %s2206_s2, 256 }
   0x3   :  { %s32_s19 = sshll.u32 %s2085_s18, 4  ;;  %p1992_p0 = scmp.ne.s32.totalorder %s2206_s2, %s1991_s22  ;;  %s33_s19 = int_to_ptr.vmem [resolvable:$true] %s32_s19 }
   0x4   :  { %p1995_p1 = scmp.lt.u32.totalorder %s1991_s22, %s2206_s2 }
   0x6   :  { %p1997_p2 = pnand %p1995_p1, %p1992_p0 }
   0x8   :  { %2000 = shalt.err (!%p1997_p2)
}
   0x9   :  { %s2001_s27 = scalar_lea.vmem %s33_s19, 256  ;;  %p2006_p4 = scmp.lt.s32.totalorder %s33_s19, %s33_s19 }
   0xa   :  { %p2002_p3 = scmp.ne.s32.totalorder %s33_s19, %s2001_s27  ;;  %p2007_p5 = scmp.lt.s32.totalorder %s2001_s27, %s2001_s27 }
   0xc   :  { %p2008_p6 = por %p2007_p5, %p2006_p4 }
   0xe   :  { %p2009_p7 = pnand %p2008_p6, %p2002_p3 }
  0x10   :  { %2012 = shalt.err (!%p2009_p7)
}
  0x11   :  { %s2086_s28 = smov 32   ;;  %s2087_s29 = smov 2  }
  0x12   :  { %38 = dma.hbm_to_vmem [thread:$0]  %s2206_s2, 256, %s33_s19, [#allocation5], %s2086_s28, %s2086_s28, %s2087_s29  }
  0x13   :  { %s2088_s7 = smov [#allocation2]   ;;  %s2013_s11 = scalar_lea.hbm %s2205_s1, 65536 }
  0x14   :  { %s20_s8 = sshll.u32 %s2088_s7, 4  ;;  %p2014_p8 = scmp.ne.s32.totalorder %s2205_s1, %s2013_s11  ;;  %s21_s8 = int_to_ptr.vmem [resolvable:$true] %s20_s8 }
  0x15   :  { %p2017_p9 = scmp.lt.u32.totalorder %s2013_s11, %s2205_s1 }
  0x17   :  { %p2019_p10 = pnand %p2017_p9, %p2014_p8 }
  0x19   :  { %2022 = shalt.err (!%p2019_p10)
}
  0x1a   :  { %s2023_s16 = scalar_lea.vmem %s21_s8, 65536  ;;  %p2028_p12 = scmp.lt.s32.totalorder %s21_s8, %s21_s8 }
  0x1b   :  { %p2024_p11 = scmp.ne.s32.totalorder %s21_s8, %s2023_s16  ;;  %p2029_p13 = scmp.lt.s32.totalorder %s2023_s16, %s2023_s16 }
  0x1d   :  { %p2030_p0 = por %p2029_p13, %p2028_p12 }
  0x1f   :  { %p2031_p1 = pnand %p2030_p0, %p2024_p11 }
  0x21   :  { %2034 = shalt.err (!%p2031_p1)
}
  0x22   :  { %s2089_s2 = smov 256   ;;  %s2090_s17 = smov 16  }
  0x23   :  { %26 = dma.hbm_to_vmem [thread:$0]  %s2205_s1, 65536, %s21_s8, [#allocation3], %s2089_s2, %s2089_s2, %s2090_s17  }
  0x24   :  { %s2091_s20 = smov [#allocation6]   ;;  %s2035_s24 = scalar_lea.hbm %s2207_s3, 4096 }
  0x25   :  { %s44_s21 = sshll.u32 %s2091_s20, 4  ;;  %p2036_p2 = scmp.ne.s32.totalorder %s2207_s3, %s2035_s24  ;;  %s45_s21 = int_to_ptr.vmem [resolvable:$true] %s44_s21 }
  0x26   :  { %p2039_p3 = scmp.lt.u32.totalorder %s2035_s24, %s2207_s3 }
  0x28   :  { %p2041_p4 = pnand %p2039_p3, %p2036_p2 }
  0x2a   :  { %2044 = shalt.err (!%p2041_p4)
}
  0x2b   :  { %s2045_s29 = scalar_lea.vmem %s45_s21, 4096  ;;  %p2050_p6 = scmp.lt.s32.totalorder %s45_s21, %s45_s21 }
  0x2c   :  { %p2046_p5 = scmp.ne.s32.totalorder %s45_s21, %s2045_s29  ;;  %p2051_p7 = scmp.lt.s32.totalorder %s2045_s29, %s2045_s29 }
  0x2e   :  { %p2052_p8 = por %p2051_p7, %p2050_p6 }
  0x30   :  { %p2053_p9 = pnand %p2052_p8, %p2046_p5 }
  0x32   :  { %2056 = shalt.err (!%p2053_p9)
}
  0x33   :  { %s2092_s1 = smov 128   ;;  %s2093_s30 = smov 8  }
  0x34   :  { %50 = dma.hbm_to_vmem [thread:$0]  %s2207_s3, 4096, %s45_s21, [#allocation5], %s2092_s1, %s2092_s1, %s2093_s30  }
  0x35   :  { %s2094_s8 = smov [#allocation7]   ;;  %s2057_s12 = scalar_lea.hbm %s2208_s4, 16 }
  0x36   :  { %s57_s9 = sshll.u32 %s2094_s8, 4  ;;  %p2058_p10 = scmp.ne.s32.totalorder %s2208_s4, %s2057_s12  ;;  %s58_s9 = int_to_ptr.vmem [resolvable:$true] %s57_s9 }
  0x37   :  { %p2061_p11 = scmp.lt.u32.totalorder %s2057_s12, %s2208_s4 }
  0x39   :  { %p2063_p12 = pnand %p2061_p11, %p2058_p10 }
  0x3b   :  { %2066 = shalt.err (!%p2063_p12)
}
  0x3c   :  { %s2067_s2 = scalar_lea.vmem %s58_s9, 16  ;;  %s2071_s3 = scalar_lea.vmem %s58_s9, 32 }
  0x3d   :  { %p2068_p13 = scmp.ne.s32.totalorder %s58_s9, %s2067_s2  ;;  %p2072_p0 = scmp.lt.s32.totalorder %s58_s9, %s58_s9 }
  0x3e   :  { %p2073_p1 = scmp.lt.s32.totalorder %s2071_s3, %s2067_s2 }
  0x40   :  { %p2074_p2 = por %p2073_p1, %p2072_p0 }
  0x42   :  { %p2075_p3 = pnand %p2074_p2, %p2068_p13 }
  0x44   :  { %2078 = shalt.err (!%p2075_p3)
}
  0x45   :  { %60 = dma.hbm_to_vmem [thread:$0]  %s2208_s4, 16, %s58_s9, [#allocation8]  }
  0x46   :  { %2079 = dma.done.wait [#allocation3], 65536  }
  0x47   :  { %2080 = vsyncadd [#allocation3], 4294901760 }
  0x48   :  { %2081 = dma.done.wait [#allocation5], 4352  }
  0x49   :  { %2082 = vsyncadd [#allocation5], 4294962944 }
  0x4a   :  { %2083 = dma.done.wait [#allocation8], 16  }
  0x4b   :  { %2084 = vsyncadd [#allocation8], 4294967280  ;;  %v75_v0 = vld [vmem:[#allocation2 + $0x8] sm:$0xff]  ;;  %v77_v1 = vld [vmem:[#allocation2 + $0x18] sm:$0xff] }
  0x4c   :  { %v74_v2 = vld [vmem:[#allocation2] sm:$0xff]  ;;  %v1436_v3 = vpack.c.bf16 %v77_v1, %v75_v0  ;;  %v76_v4 = vld [vmem:[#allocation2 + $0x10] sm:$0xff]  ;;  %v79_v5 = vld [vmem:[#allocation2 + $0x28] sm:$0xff] }
  0x4d   :  { %v81_v6 = vld [vmem:[#allocation2 + $0x38] sm:$0xff]  ;;  %v1438_v7 = vpack.c.bf16 %v76_v4, %v74_v2  ;;  %v78_v9 = vld [vmem:[#allocation2 + $0x20] sm:$0xff]  ;;  %v80_v10 = vld [vmem:[#allocation2 + $0x30] sm:$0xff] }
  0x4e   :  { %v1440_v8 = vpack.c.bf16 %v81_v6, %v79_v5  ;;  %v83_v11 = vld [vmem:[#allocation2 + $0x48] sm:$0xff]  ;;  %1437 = vmatprep.subr.bf16.mxu0 %v1436_v3  ;;  %v85_v12 = vld [vmem:[#allocation2 + $0x58] sm:$0xff]  ;;  %v1442_v13 = vpack.c.bf16 %v80_v10, %v78_v9  ;;  %v82_v15 = vld [vmem:[#allocation2 + $0x40] sm:$0xff] }
  0x4f   :  { %1439 = vmatpush1.bf16.msra.mxu0 %v1438_v7  ;;  %v1444_v14 = vpack.c.bf16 %v85_v12, %v83_v11  ;;  %v84_v16 = vld [vmem:[#allocation2 + $0x50] sm:$0xff]  ;;  %v87_v17 = vld [vmem:[#allocation2 + $0x68] sm:$0xff]  ;;  %v89_v18 = vld [vmem:[#allocation2 + $0x78] sm:$0xff] }
  0x50   :  { %1441 = vmatprep.subr.bf16.mxu0 %v1440_v8  ;;  %v1446_v19 = vpack.c.bf16 %v84_v16, %v82_v15  ;;  %v1448_v20 = vpack.c.bf16 %v89_v18, %v87_v17  ;;  %v86_v21 = vld [vmem:[#allocation2 + $0x60] sm:$0xff]  ;;  %v88_v22 = vld [vmem:[#allocation2 + $0x70] sm:$0xff]  ;;  %v91_v23 = vld [vmem:[#allocation2 + $0x88] sm:$0xff] }
  0x51   :  { %v93_v24 = vld [vmem:[#allocation2 + $0x98] sm:$0xff]  ;;  %v1450_v25 = vpack.c.bf16 %v88_v22, %v86_v21  ;;  %v90_v27 = vld [vmem:[#allocation2 + $0x80] sm:$0xff]  ;;  %v92_v28 = vld [vmem:[#allocation2 + $0x90] sm:$0xff] }
  0x52   :  { %v1452_v26 = vpack.c.bf16 %v93_v24, %v91_v23  ;;  %v95_v29 = vld [vmem:[#allocation2 + $0xa8] sm:$0xff]  ;;  %v97_v30 = vld [vmem:[#allocation2 + $0xb8] sm:$0xff]  ;;  %v1454_v31 = vpack.c.bf16 %v92_v28, %v90_v27  ;;  %v94_v33 = vld [vmem:[#allocation2 + $0xa0] sm:$0xff] }
  0x53   :  { %1443 = vmatpush1.bf16.msra.mxu0 %v1442_v13  ;;  %v1456_v32 = vpack.c.bf16 %v97_v30, %v95_v29  ;;  %v96_v34 = vld [vmem:[#allocation2 + $0xb0] sm:$0xff]  ;;  %v99_v35 = vld [vmem:[#allocation2 + $0xc8] sm:$0xff]  ;;  %v101_v36 = vld [vmem:[#allocation2 + $0xd8] sm:$0xff] }
  0x54   :  { %1445 = vmatprep.subr.bf16.mxu0 %v1444_v14  ;;  %v1458_v37 = vpack.c.bf16 %v96_v34, %v94_v33  ;;  %v98_v38 = vld [vmem:[#allocation2 + $0xc0] sm:$0xff]  ;;  %v100_v39 = vld [vmem:[#allocation2 + $0xd0] sm:$0xff]  ;;  %v103_v40 = vld [vmem:[#allocation2 + $0xe8] sm:$0xff]  ;;  %v1460_v41 = vpack.c.bf16 %v101_v36, %v99_v35 }
  0x55   :  { %v105_v42 = vld [vmem:[#allocation2 + $0xf8] sm:$0xff]  ;;  %v2176_v43 = vld [vmem:[%s2204_s0] sm:$0xff]  ;;  %v228_v44 = vld [vmem:[#allocation2 + $0x208] sm:$0xff]  ;;  %v1462_v54 = vpack.c.bf16 %v100_v39, %v98_v38 }
  0x56   :  { %v151_v45 = vcombine.high %v2176_v43, %v2176_v43  ;;  %v230_v46 = vld [vmem:[#allocation2 + $0x218] sm:$0xff]  ;;  %v227_v47 = vld [vmem:[#allocation2 + $0x200] sm:$0xff]  ;;  %v229_v48 = vld [vmem:[#allocation2 + $0x210] sm:$0xff]  ;;  %v1464_v59 = vpack.c.bf16 %v105_v42, %v103_v40 }
  0x57   :  { %1447 = vmatpush1.bf16.msra.mxu0 %v1446_v19  ;;  %v1500_v49 = vpack.c.bf16 %v230_v46, %v228_v44  ;;  %v1502_v50 = vpack.c.bf16 %v229_v48, %v227_v47  ;;  %v232_v51 = vld [vmem:[#allocation2 + $0x228] sm:$0xff]  ;;  %v234_v52 = vld [vmem:[#allocation2 + $0x238] sm:$0xff]  ;;  %v231_v53 = vld [vmem:[#allocation2 + $0x220] sm:$0xff] }
  0x58   :  { %1449 = vmatprep.subr.bf16.mxu0 %v1448_v20  ;;  %217 = vmatprep.mubr.f32.mxu0 %v151_v45  ;;  %v1504_v55 = vpack.c.bf16 %v234_v52, %v232_v51  ;;  %v233_v56 = vld [vmem:[#allocation2 + $0x230] sm:$0xff]  ;;  %v236_v57 = vld [vmem:[#allocation2 + $0x248] sm:$0xff]  ;;  %v238_v58 = vld [vmem:[#allocation2 + $0x258] sm:$0xff] }
  0x59   :  { %v102_v60 = vld [vmem:[#allocation2 + $0xe0] sm:$0xff]  ;;  %v104_v61 = vld [vmem:[#allocation2 + $0xf0] sm:$0xff]  ;;  %1501 = vmatprep.subr.bf16.mxu1 %v1500_v49  ;;  %v107_v62 = vld [vmem:[#allocation2 + $0x108] sm:$0xff]  ;;  %v1506_v0 = vpack.c.bf16 %v233_v56, %v231_v53  ;;  %v1508_v1 = vpack.c.bf16 %v238_v58, %v236_v57 }
  0x5a   :  { %v109_v63 = vld [vmem:[#allocation2 + $0x118] sm:$0xff]  ;;  %1503 = vmatpush1.bf16.msra.mxu1 %v1502_v50  ;;  %v235_v2 = vld [vmem:[#allocation2 + $0x240] sm:$0xff]  ;;  %v237_v3 = vld [vmem:[#allocation2 + $0x250] sm:$0xff]  ;;  %v1466_v4 = vpack.c.bf16 %v104_v61, %v102_v60 }
  0x5b   :  { %1451 = vmatpush1.bf16.msra.mxu0 %v1450_v25  ;;  %1505 = vmatprep.subr.bf16.mxu1 %v1504_v55  ;;  %v240_v5 = vld [vmem:[#allocation2 + $0x268] sm:$0xff]  ;;  %v242_v6 = vld [vmem:[#allocation2 + $0x278] sm:$0xff]  ;;  %v1468_v7 = vpack.c.bf16 %v109_v63, %v107_v62  ;;  %v106_v8 = vld [vmem:[#allocation2 + $0x100] sm:$0xff]  ;;  %v1510_v12 = vpack.c.bf16 %v237_v3, %v235_v2 }
  0x5c   :  { %1453 = vmatprep.subr.bf16.mxu0 %v1452_v26  ;;  %v108_v9 = vld [vmem:[#allocation2 + $0x110] sm:$0xff]  ;;  %v111_v10 = vld [vmem:[#allocation2 + $0x128] sm:$0xff]  ;;  %v113_v11 = vld [vmem:[#allocation2 + $0x138] sm:$0xff]  ;;  %v1512_v13 = vpack.c.bf16 %v242_v6, %v240_v5 }
  0x5d   :  { %v239_v14 = vld [vmem:[#allocation2 + $0x260] sm:$0xff]  ;;  %v241_v15 = vld [vmem:[#allocation2 + $0x270] sm:$0xff]  ;;  %v1470_v16 = vpack.c.bf16 %v108_v9, %v106_v8  ;;  %v244_v17 = vld [vmem:[#allocation2 + $0x288] sm:$0xff]  ;;  %v1472_v19 = vpack.c.bf16 %v113_v11, %v111_v10 }
  0x5e   :  { %1507 = vmatpush1.bf16.msra.mxu1 %v1506_v0  ;;  %v246_v18 = vld [vmem:[#allocation2 + $0x298] sm:$0xff]  ;;  %v110_v20 = vld [vmem:[#allocation2 + $0x120] sm:$0xff]  ;;  %v112_v21 = vld [vmem:[#allocation2 + $0x130] sm:$0xff]  ;;  %v1514_v24 = vpack.c.bf16 %v241_v15, %v239_v14 }
  0x5f   :  { %1455 = vmatpush1.bf16.msra.mxu0 %v1454_v31  ;;  %1509 = vmatprep.subr.bf16.mxu1 %v1508_v1  ;;  %v115_v22 = vld [vmem:[#allocation2 + $0x148] sm:$0xff]  ;;  %v117_v23 = vld [vmem:[#allocation2 + $0x158] sm:$0xff]  ;;  %v1516_v25 = vpack.c.bf16 %v246_v18, %v244_v17  ;;  %v243_v26 = vld [vmem:[#allocation2 + $0x280] sm:$0xff]  ;;  %v1474_v28 = vpack.c.bf16 %v112_v21, %v110_v20 }
  0x60   :  { %1457 = vmatprep.subr.bf16.mxu0 %v1456_v32  ;;  %v245_v27 = vld [vmem:[#allocation2 + $0x290] sm:$0xff]  ;;  %v248_v29 = vld [vmem:[#allocation2 + $0x2a8] sm:$0xff]  ;;  %v250_v30 = vld [vmem:[#allocation2 + $0x2b8] sm:$0xff]  ;;  %v1476_v31 = vpack.c.bf16 %v117_v23, %v115_v22 }
  0x61   :  { %v114_v32 = vld [vmem:[#allocation2 + $0x140] sm:$0xff]  ;;  %v116_v33 = vld [vmem:[#allocation2 + $0x150] sm:$0xff]  ;;  %v119_v34 = vld [vmem:[#allocation2 + $0x168] sm:$0xff]  ;;  %v1518_v36 = vpack.c.bf16 %v245_v27, %v243_v26 }
  0x62   :  { %1511 = vmatpush1.bf16.msra.mxu1 %v1510_v12  ;;  %v121_v35 = vld [vmem:[#allocation2 + $0x178] sm:$0xff]  ;;  %v247_v38 = vld [vmem:[#allocation2 + $0x2a0] sm:$0xff]  ;;  %v249_v39 = vld [vmem:[#allocation2 + $0x2b0] sm:$0xff]  ;;  %v1478_v40 = vpack.c.bf16 %v116_v33, %v114_v32 }
  0x63   :  { %1459 = vmatpush1.bf16.msra.mxu0 %v1458_v37  ;;  %1513 = vmatprep.subr.bf16.mxu1 %v1512_v13  ;;  %v1520_v37 = vpack.c.bf16 %v250_v30, %v248_v29  ;;  %v254_v42 = vld [vmem:[#allocation2 + $0x2d8] sm:$0xff]  ;;  %v1480_v44 = vpack.c.bf16 %v121_v35, %v119_v34  ;;  %v118_v45 = vld [vmem:[#allocation2 + $0x160] sm:$0xff]  ;;  %v120_v46 = vld [vmem:[#allocation2 + $0x170] sm:$0xff]  ;;  %v1522_v49 = vpack.c.bf16 %v249_v39, %v247_v38 }
  0x64   :  { %1461 = vmatprep.subr.bf16.mxu0 %v1460_v41  ;;  %v252_v41 = vld [vmem:[#allocation2 + $0x2c8] sm:$0xff]  ;;  %v125_v48 = vld [vmem:[#allocation2 + $0x198] sm:$0xff]  ;;  %v251_v51 = vld [vmem:[#allocation2 + $0x2c0] sm:$0xff]  ;;  %v1482_v53 = vpack.c.bf16 %v120_v46, %v118_v45 }
  0x65   :  { %v123_v47 = vld [vmem:[#allocation2 + $0x188] sm:$0xff]  ;;  %v1524_v50 = vpack.c.bf16 %v254_v42, %v252_v41  ;;  %v253_v52 = vld [vmem:[#allocation2 + $0x2d0] sm:$0xff]  ;;  %v258_v55 = vld [vmem:[#allocation2 + $0x2f8] sm:$0xff] }
  0x66   :  { %1515 = vmatpush1.bf16.msra.mxu1 %v1514_v24  ;;  %v1484_v56 = vpack.c.bf16 %v125_v48, %v123_v47  ;;  %v122_v57 = vld [vmem:[#allocation2 + $0x180] sm:$0xff]  ;;  %v124_v58 = vld [vmem:[#allocation2 + $0x190] sm:$0xff]  ;;  %v129_v60 = vld [vmem:[#allocation2 + $0x1b8] sm:$0xff]  ;;  %v1526_v61 = vpack.c.bf16 %v253_v52, %v251_v51 }
  0x67   :  { %1463 = vmatpush1.bf16.msra.mxu0 %v1462_v54  ;;  %1517 = vmatprep.subr.bf16.mxu1 %v1516_v25  ;;  %v256_v54 = vld [vmem:[#allocation2 + $0x2e8] sm:$0xff]  ;;  %v255_v63 = vld [vmem:[#allocation2 + $0x2e0] sm:$0xff]  ;;  %v257_v0 = vld [vmem:[#allocation2 + $0x2f0] sm:$0xff]  ;;  %v1486_v1 = vpack.c.bf16 %v124_v58, %v122_v57 }
  0x68   :  { %1465 = vmatprep.subr.bf16.mxu0 %v1464_v59  ;;  %v127_v59 = vld [vmem:[#allocation2 + $0x1a8] sm:$0xff]  ;;  %v1528_v62 = vpack.c.bf16 %v258_v55, %v256_v54  ;;  %v262_v3 = vld [vmem:[#allocation2 + $0x318] sm:$0xff]  ;;  %v126_v5 = vld [vmem:[#allocation2 + $0x1a0] sm:$0xff]  ;;  %v1530_v9 = vpack.c.bf16 %v257_v0, %v255_v63 }
  0x69   :  { %v260_v2 = vld [vmem:[#allocation2 + $0x308] sm:$0xff]  ;;  %v128_v6 = vld [vmem:[#allocation2 + $0x1b0] sm:$0xff]  ;;  %v133_v8 = vld [vmem:[#allocation2 + $0x1d8] sm:$0xff] }
  0x6a   :  { %1519 = vmatpush1.bf16.msra.mxu1 %v1518_v36  ;;  %v1532_v10 = vpack.c.bf16 %v262_v3, %v260_v2  ;;  %v259_v11 = vld [vmem:[#allocation2 + $0x300] sm:$0xff]  ;;  %v261_v12 = vld [vmem:[#allocation2 + $0x310] sm:$0xff]  ;;  %v1490_v13 = vpack.c.bf16 %v128_v6, %v126_v5  ;;  %v264_v14 = vld [vmem:[#allocation2 + $0x328] sm:$0xff] }
  0x6b   :  { %1467 = vmatpush1.bf16.msra.mxu0 %v1466_v4  ;;  %1521 = vmatprep.subr.bf16.mxu1 %v1520_v37  ;;  %v1488_v4 = vpack.c.bf16 %v129_v60, %v127_v59  ;;  %v266_v15 = vld [vmem:[#allocation2 + $0x338] sm:$0xff]  ;;  %v130_v17 = vld [vmem:[#allocation2 + $0x1c0] sm:$0xff]  ;;  %v132_v18 = vld [vmem:[#allocation2 + $0x1d0] sm:$0xff]  ;;  %v1534_v21 = vpack.c.bf16 %v261_v12, %v259_v11 }
  0x6c   :  { %1469 = vmatprep.subr.bf16.mxu0 %v1468_v7  ;;  %v131_v7 = vld [vmem:[#allocation2 + $0x1c8] sm:$0xff]  ;;  %v137_v20 = vld [vmem:[#allocation2 + $0x1f8] sm:$0xff]  ;;  %v1536_v22 = vpack.c.bf16 %v266_v15, %v264_v14  ;;  %v263_v23 = vld [vmem:[#allocation2 + $0x320] sm:$0xff]  ;;  %v1494_v25 = vpack.c.bf16 %v132_v18, %v130_v17 }
  0x6d   :  { %v265_v24 = vld [vmem:[#allocation2 + $0x330] sm:$0xff]  ;;  %v268_v26 = vld [vmem:[#allocation2 + $0x348] sm:$0xff]  ;;  %v270_v27 = vld [vmem:[#allocation2 + $0x358] sm:$0xff] }
  0x6e   :  { %1523 = vmatpush1.bf16.msra.mxu1 %v1522_v49  ;;  %v134_v29 = vld [vmem:[#allocation2 + $0x1e0] sm:$0xff]  ;;  %v136_v30 = vld [vmem:[#allocation2 + $0x1f0] sm:$0xff]  ;;  %v1540_v32 = vpack.c.bf16 %v270_v27, %v268_v26  ;;  %v272_v36 = vld [vmem:[#allocation2 + $0x368] sm:$0xff] }
  0x6f   :  { %1471 = vmatpush1.bf16.msra.mxu0 %v1470_v16  ;;  %1525 = vmatprep.subr.bf16.mxu1 %v1524_v50  ;;  %v1492_v16 = vpack.c.bf16 %v133_v8, %v131_v7  ;;  %v267_v33 = vld [vmem:[#allocation2 + $0x340] sm:$0xff]  ;;  %v269_v34 = vld [vmem:[#allocation2 + $0x350] sm:$0xff]  ;;  %v1498_v35 = vpack.c.bf16 %v136_v30, %v134_v29  ;;  %v274_v37 = vld [vmem:[#allocation2 + $0x378] sm:$0xff] }
  0x70   :  { %1473 = vmatprep.subr.bf16.mxu0 %v1472_v19  ;;  %v135_v19 = vld [vmem:[#allocation2 + $0x1e8] sm:$0xff]  ;;  %v1542_v38 = vpack.c.bf16 %v269_v34, %v267_v33  ;;  %v1544_v39 = vpack.c.bf16 %v274_v37, %v272_v36  ;;  %v273_v41 = vld [vmem:[#allocation2 + $0x370] sm:$0xff]  ;;  %v275_v47 = vld [vmem:[#allocation2 + $0x380] sm:$0xff] }
  0x71   :  { %v276_v42 = vld [vmem:[#allocation2 + $0x388] sm:$0xff]  ;;  %v277_v48 = vld [vmem:[#allocation2 + $0x390] sm:$0xff]  ;;  %v282_v50 = vld [vmem:[#allocation2 + $0x3b8] sm:$0xff] }
  0x72   :  { %1527 = vmatpush1.bf16.msra.mxu1 %v1526_v61  ;;  %v280_v49 = vld [vmem:[#allocation2 + $0x3a8] sm:$0xff]  ;;  %v1550_v51 = vpack.c.bf16 %v277_v48, %v275_v47  ;;  %v281_v54 = vld [vmem:[#allocation2 + $0x3b0] sm:$0xff]  ;;  %v287_v0 = vld [vmem:[#allocation2 + $0x3e0] sm:$0xff] }
  0x73   :  { %1475 = vmatpush1.bf16.msra.mxu0 %v1474_v28  ;;  %1529 = vmatprep.subr.bf16.mxu1 %v1528_v62  ;;  %v1496_v28 = vpack.c.bf16 %v137_v20, %v135_v19  ;;  %v1552_v52 = vpack.c.bf16 %v282_v50, %v280_v49  ;;  %v284_v55 = vld [vmem:[#allocation2 + $0x3c8] sm:$0xff]  ;;  %v285_v59 = vld [vmem:[#allocation2 + $0x3d0] sm:$0xff]  ;;  %v290_v62 = vld [vmem:[#allocation2 + $0x3f8] sm:$0xff] }
  0x74   :  { %1477 = vmatprep.subr.bf16.mxu0 %v1476_v31  ;;  %v1538_v31 = vpack.c.bf16 %v265_v24, %v263_v23  ;;  %v288_v61 = vld [vmem:[#allocation2 + $0x3e8] sm:$0xff]  ;;  %v378_v5 = vld [vmem:[#allocation2 + $0x400] sm:$0xff]  ;;  %v380_v7 = vld [vmem:[#allocation2 + $0x410] sm:$0xff] }
  0x75   :  { %v1560_v63 = vpack.c.bf16 %v290_v62, %v288_v61  ;;  %v379_v3 = vld [vmem:[#allocation2 + $0x408] sm:$0xff]  ;;  %v382_v12 = vld [vmem:[#allocation2 + $0x420] sm:$0xff]  ;;  %v389_v15 = vld [vmem:[#allocation2 + $0x458] sm:$0xff] }
  0x76   :  { %1531 = vmatpush1.bf16.msra.mxu1 %v1530_v9  ;;  %v383_v8 = vld [vmem:[#allocation2 + $0x428] sm:$0xff]  ;;  %v385_v9 = vld [vmem:[#allocation2 + $0x438] sm:$0xff]  ;;  %v386_v18 = vld [vmem:[#allocation2 + $0x440] sm:$0xff] }
  0x77   :  { %1479 = vmatpush1.bf16.msra.mxu0 %v1478_v40  ;;  %1533 = vmatprep.subr.bf16.mxu1 %v1532_v10  ;;  %v271_v40 = vld [vmem:[#allocation2 + $0x360] sm:$0xff]  ;;  %v1566_v10 = vpack.c.bf16 %v380_v7, %v378_v5  ;;  %v1568_v11 = vpack.c.bf16 %v385_v9, %v383_v8  ;;  %v387_v14 = vld [vmem:[#allocation2 + $0x448] sm:$0xff]  ;;  %v388_v19 = vld [vmem:[#allocation2 + $0x450] sm:$0xff] }
  0x78   :  { %1481 = vmatprep.subr.bf16.mxu0 %v1480_v44  ;;  %v278_v44 = vld [vmem:[#allocation2 + $0x398] sm:$0xff]  ;;  %v1546_v45 = vpack.c.bf16 %v273_v41, %v271_v40  ;;  %v1572_v17 = vpack.c.bf16 %v389_v15, %v387_v14  ;;  %v391_v20 = vld [vmem:[#allocation2 + $0x468] sm:$0xff]  ;;  %v390_v24 = vld [vmem:[#allocation2 + $0x460] sm:$0xff] }
  0x79   :  { %v1548_v46 = vpack.c.bf16 %v278_v44, %v276_v42  ;;  %v395_v26 = vld [vmem:[#allocation2 + $0x488] sm:$0xff]  ;;  %v397_v27 = vld [vmem:[#allocation2 + $0x498] sm:$0xff]  ;;  %v394_v30 = vld [vmem:[#allocation2 + $0x480] sm:$0xff] }
  0x7a   :  { %1535 = vmatpush1.bf16.msra.mxu1 %v1534_v21  ;;  %v393_v21 = vld [vmem:[#allocation2 + $0x478] sm:$0xff]  ;;  %v1580_v29 = vpack.c.bf16 %v397_v27, %v395_v26  ;;  %v398_v36 = vld [vmem:[#allocation2 + $0x4a0] sm:$0xff]  ;;  %v400_v37 = vld [vmem:[#allocation2 + $0x4b0] sm:$0xff]  ;;  %v140_v26 = vlaneseq }
  0x7b   :  { %1483 = vmatpush1.bf16.msra.mxu0 %v1482_v53  ;;  %1537 = vmatprep.subr.bf16.mxu1 %v1536_v22  ;;  %v279_v53 = vld [vmem:[#allocation2 + $0x3a0] sm:$0xff]  ;;  %v1574_v22 = vpack.c.bf16 %v388_v19, %v386_v18  ;;  %v1576_v23 = vpack.c.bf16 %v393_v21, %v391_v20  ;;  %v401_v33 = vld [vmem:[#allocation2 + $0x4b8] sm:$0xff]  ;;  %v1586_v40 = vpack.c.bf16 %v400_v37, %v398_v36  ;;  %v404_v44 = vld [vmem:[#allocation2 + $0x4d0] sm:$0xff] }
  0x7c   :  { %1485 = vmatprep.subr.bf16.mxu0 %v1484_v56  ;;  %v286_v56 = vld [vmem:[#allocation2 + $0x3d8] sm:$0xff]  ;;  %v1554_v57 = vpack.c.bf16 %v281_v54, %v279_v53  ;;  %v402_v42 = vld [vmem:[#allocation2 + $0x4c0] sm:$0xff]  ;;  %v408_v50 = vld [vmem:[#allocation2 + $0x4f0] sm:$0xff]  ;;  %v141_v27 = vshrl.u32 %v140_v26, 7 }
  0x7d   :  { %v1556_v58 = vpack.c.bf16 %v286_v56, %v284_v55  ;;  %v1590_v47 = vpack.c.bf16 %v404_v44, %v402_v42  ;;  %v406_v49 = vld [vmem:[#allocation2 + $0x4e0] sm:$0xff]  ;;  %v412_v56 = vld [vmem:[#allocation2 + $0x510] sm:$0xff]  ;;  %v419_v62 = vld [vmem:[#allocation2 + $0x548] sm:$0xff] }
  0x7e   :  { %1539 = vmatpush1.bf16.msra.mxu1 %v1538_v31  ;;  %v396_v31 = vld [vmem:[#allocation2 + $0x490] sm:$0xff]  ;;  %v1594_v53 = vpack.c.bf16 %v408_v50, %v406_v49  ;;  %v410_v55 = vld [vmem:[#allocation2 + $0x500] sm:$0xff]  ;;  %v425_v5 = vld [vmem:[#allocation2 + $0x578] sm:$0xff] }
  0x7f   :  { %1487 = vmatpush1.bf16.msra.mxu0 %v1486_v1  ;;  %1541 = vmatprep.subr.bf16.mxu1 %v1540_v32  ;;  %v289_v1 = vld [vmem:[#allocation2 + $0x3f0] sm:$0xff]  ;;  %v399_v32 = vld [vmem:[#allocation2 + $0x4a8] sm:$0xff]  ;;  %v1582_v34 = vpack.c.bf16 %v396_v31, %v394_v30  ;;  %v422_v8 = vld [vmem:[#allocation2 + $0x560] sm:$0xff]  ;;  %v2183_v30 = vsub.s32 1, %v141_v27 }
  0x80   :  { %1489 = vmatprep.subr.bf16.mxu0 %v1488_v4  ;;  %v1562_v2 = vpack.c.bf16 %v289_v1, %v287_v0  ;;  %v381_v4 = vld [vmem:[#allocation2 + $0x418] sm:$0xff]  ;;  %v416_v61 = vld [vmem:[#allocation2 + $0x530] sm:$0xff]  ;;  %v426_v14 = vld [vmem:[#allocation2 + $0x580] sm:$0xff] }
  0x81   :  { %v1564_v6 = vpack.c.bf16 %v381_v4, %v379_v3  ;;  %v420_v3 = vld [vmem:[#allocation2 + $0x550] sm:$0xff]  ;;  %v423_v4 = vld [vmem:[#allocation2 + $0x568] sm:$0xff]  ;;  %v430_v20 = vld [vmem:[#allocation2 + $0x5a0] sm:$0xff] }
  0x82   :  { %1543 = vmatpush1.bf16.msra.mxu1 %v1542_v38  ;;  %v403_v38 = vld [vmem:[#allocation2 + $0x4c8] sm:$0xff]  ;;  %v1608_v7 = vpack.c.bf16 %v425_v5, %v423_v4  ;;  %v424_v9 = vld [vmem:[#allocation2 + $0x570] sm:$0xff]  ;;  %v441_v44 = vld [vmem:[#allocation2 + $0x5f8] sm:$0xff] }
  0x83   :  { %1491 = vmatpush1.bf16.msra.mxu0 %v1490_v13  ;;  %1545 = vmatprep.subr.bf16.mxu1 %v1544_v39  ;;  %v384_v13 = vld [vmem:[#allocation2 + $0x430] sm:$0xff]  ;;  %v405_v39 = vld [vmem:[#allocation2 + $0x4d8] sm:$0xff]  ;;  %v439_v42 = vld [vmem:[#allocation2 + $0x5e8] sm:$0xff] }
  0x84   :  { %1493 = vmatprep.subr.bf16.mxu0 %v1492_v16  ;;  %v1570_v16 = vpack.c.bf16 %v384_v13, %v382_v12  ;;  %v1588_v41 = vpack.c.bf16 %v405_v39, %v403_v38  ;;  %v1610_v12 = vpack.c.bf16 %v424_v9, %v422_v8  ;;  %v428_v15 = vld [vmem:[#allocation2 + $0x590] sm:$0xff]  ;;  %v434_v39 = vld [vmem:[#allocation2 + $0x5c0] sm:$0xff]  ;;  %v530_v49 = vld [vmem:[#allocation2 + $0x608] sm:$0xff] }
  0x85   :  { %v1614_v18 = vpack.c.bf16 %v428_v15, %v426_v14  ;;  %v432_v21 = vld [vmem:[#allocation2 + $0x5b0] sm:$0xff]  ;;  %v532_v50 = vld [vmem:[#allocation2 + $0x618] sm:$0xff]  ;;  %v541_v5 = vld [vmem:[#allocation2 + $0x660] sm:$0xff] }
  0x86   :  { %1547 = vmatpush1.bf16.msra.mxu1 %v1546_v45  ;;  %v407_v45 = vld [vmem:[#allocation2 + $0x4e8] sm:$0xff]  ;;  %v548_v8 = vld [vmem:[#allocation2 + $0x698] sm:$0xff] }
  0x87   :  { %1495 = vmatpush1.bf16.msra.mxu0 %v1494_v25  ;;  %1549 = vmatprep.subr.bf16.mxu1 %v1548_v46  ;;  %v392_v25 = vld [vmem:[#allocation2 + $0x470] sm:$0xff]  ;;  %v409_v46 = vld [vmem:[#allocation2 + $0x4f8] sm:$0xff] }
  0x88   :  { %1497 = vmatprep.subr.bf16.mxu0 %v1496_v28  ;;  %v1578_v28 = vpack.c.bf16 %v392_v25, %v390_v24  ;;  %v1592_v48 = vpack.c.bf16 %v409_v46, %v407_v45  ;;  %v1618_v24 = vpack.c.bf16 %v432_v21, %v430_v20  ;;  %v1624_v45 = vpack.c.bf16 %v441_v44, %v439_v42  ;;  %v438_v46 = vld [vmem:[#allocation2 + $0x5e0] sm:$0xff]  ;;  %v552_v14 = vld [vmem:[#allocation2 + $0x6b8] sm:$0xff] }
  0x89   :  { %v556_v20 = vld [vmem:[#allocation2 + $0x6d8] sm:$0xff]  ;;  %v565_v44 = vld [vmem:[#allocation2 + $0x720] sm:$0xff] }
  0x8a   :  { %1551 = vmatpush1.bf16.msra.mxu1 %v1550_v51  ;;  %v411_v51 = vld [vmem:[#allocation2 + $0x508] sm:$0xff]  ;;  %v560_v26 = vld [vmem:[#allocation2 + $0x6f8] sm:$0xff] }
  0x8b   :  { %1499 = vmatpush1.bf16.msra.mxu0 %v1498_v35  ;;  %1553 = vmatprep.subr.bf16.mxu1 %v1552_v52  ;;  %v1584_v35 = vpack.c.bf16 %v401_v33, %v399_v32  ;;  %v413_v52 = vld [vmem:[#allocation2 + $0x518] sm:$0xff] }
  0x8c   :  { %1565 = vmatprep.subr.bf16.mxu0 %v1564_v6  ;;  %v1596_v54 = vpack.c.bf16 %v413_v52, %v411_v51  ;;  %v529_v51 = vld [vmem:[#allocation2 + $0x600] sm:$0xff]  ;;  %v1628_v52 = vpack.c.bf16 %v532_v50, %v530_v49 }
  0x8d   :  { %v569_v50 = vld [vmem:[#allocation2 + $0x740] sm:$0xff] }
  0x8e   :  { %218 = vmatmul.mubr.f32.vlgmr.msra.gmra.mrb[0].mxu0 %v2176_v43  ;;  %1555 = vmatpush1.bf16.msra.mxu1 %v1554_v57  ;;  %v283_v43 = vld [vmem:[#allocation2 + $0x3c0] sm:$0xff]  ;;  %v415_v57 = vld [vmem:[#allocation2 + $0x528] sm:$0xff] }
  0x8f   :  { %1557 = vmatprep.subr.bf16.mxu1 %v1556_v58  ;;  %v1558_v60 = vpack.c.bf16 %v285_v59, %v283_v43  ;;  %1567 = vmatpush1.bf16.msra.mxu0 %v1566_v10  ;;  %v417_v58 = vld [vmem:[#allocation2 + $0x538] sm:$0xff]  ;;  %v1598_v43 = vpack.c.bf16 %v412_v56, %v410_v55  ;;  %v427_v10 = vld [vmem:[#allocation2 + $0x588] sm:$0xff] }
  0x90   :  { %1569 = vmatprep.subr.bf16.mxu0 %v1568_v11  ;;  %v1600_v59 = vpack.c.bf16 %v417_v58, %v415_v57  ;;  %v429_v11 = vld [vmem:[#allocation2 + $0x598] sm:$0xff]  ;;  %v533_v58 = vld [vmem:[#allocation2 + $0x620] sm:$0xff] }
  0x91   :  { %v1612_v13 = vpack.c.bf16 %v429_v11, %v427_v10  ;;  %v536_v55 = vld [vmem:[#allocation2 + $0x638] sm:$0xff]  ;;  %v545_v11 = vld [vmem:[#allocation2 + $0x680] sm:$0xff] }
  0x92   :  { %1559 = vmatpush1.bf16.msra.mxu1 %v1558_v60  ;;  %v414_v60 = vld [vmem:[#allocation2 + $0x520] sm:$0xff] }
  0x93   :  { %1561 = vmatprep.subr.bf16.mxu1 %v1560_v63  ;;  %1571 = vmatpush1.bf16.msra.mxu0 %v1570_v16  ;;  %v421_v63 = vld [vmem:[#allocation2 + $0x558] sm:$0xff]  ;;  %v1602_v0 = vpack.c.bf16 %v416_v61, %v414_v60  ;;  %v431_v16 = vld [vmem:[#allocation2 + $0x5a8] sm:$0xff] }
  0x94   :  { %1573 = vmatprep.subr.bf16.mxu0 %v1572_v17  ;;  %v1604_v1 = vpack.c.bf16 %v421_v63, %v419_v62  ;;  %v433_v17 = vld [vmem:[#allocation2 + $0x5b8] sm:$0xff]  ;;  %v537_v63 = vld [vmem:[#allocation2 + $0x640] sm:$0xff] }
  0x95   :  { %v1616_v19 = vpack.c.bf16 %v433_v17, %v431_v16  ;;  %v540_v60 = vld [vmem:[#allocation2 + $0x658] sm:$0xff]  ;;  %v549_v17 = vld [vmem:[#allocation2 + $0x6a0] sm:$0xff] }
  0x96   :  { %1563 = vmatpush1.bf16.msra.mxu1 %v1562_v2  ;;  %v418_v2 = vld [vmem:[#allocation2 + $0x540] sm:$0xff] }
  0x97   :  { %1575 = vmatpush1.bf16.msra.mxu0 %v1574_v22  ;;  %v1606_v6 = vpack.c.bf16 %v420_v3, %v418_v2  ;;  %v435_v22 = vld [vmem:[#allocation2 + $0x5c8] sm:$0xff]  ;;  %1629 = vmatprep.subr.bf16.mxu1 %v1628_v52  ;;  %v544_v2 = vld [vmem:[#allocation2 + $0x678] sm:$0xff] }
  0x98   :  { %1577 = vmatprep.subr.bf16.mxu0 %v1576_v23  ;;  %v437_v23 = vld [vmem:[#allocation2 + $0x5d8] sm:$0xff]  ;;  %v574_v52 = vld [vmem:[#allocation2 + $0x768] sm:$0xff] }
  0x99   :  { %v1620_v25 = vpack.c.bf16 %v437_v23, %v435_v22  ;;  %v553_v23 = vld [vmem:[#allocation2 + $0x6c0] sm:$0xff] }
  0x9b   :  { %1579 = vmatpush1.bf16.msra.mxu0 %v1578_v28  ;;  %v2181_v28 = vsub.s32 0, %v141_v27 }
  0x9c   :  { %1581 = vmatprep.subr.bf16.mxu0 %v1580_v29  ;;  %v138_v29 = vld [vmem:[#allocation4] sm:$0x3] }
  0x9d   :  { %v143_v31 = vrot.slane %v138_v29, %v2181_v28  ;;  %v147_v32 = vrot.slane %v138_v29, %v2183_v30 }
  0x9f   :  { %1583 = vmatpush1.bf16.msra.mxu0 %v1582_v34 }
  0xa0   :  { %1585 = vmatprep.subr.bf16.mxu0 %v1584_v35 }
  0xa3   :  { %1587 = vmatpush1.bf16.msra.mxu0 %v1586_v40  ;;  %v436_v40 = vld [vmem:[#allocation2 + $0x5d0] sm:$0xff] }
  0xa4   :  { %1589 = vmatprep.subr.bf16.mxu0 %v1588_v41  ;;  %v1622_v41 = vpack.c.bf16 %v436_v40, %v434_v39  ;;  %v566_v39 = vld [vmem:[#allocation2 + $0x728] sm:$0xff]  ;;  %v568_v40 = vld [vmem:[#allocation2 + $0x738] sm:$0xff] }
  0xa5   :  { %v1664_v42 = vpack.c.bf16 %v568_v40, %v566_v39  ;;  %v686_v39 = vld [vmem:[#allocation2 + $0x830] sm:$0xff]  ;;  %v689_v40 = vld [vmem:[#allocation2 + $0x848] sm:$0xff] }
  0xa7   :  { %1591 = vmatpush1.bf16.msra.mxu0 %v1590_v47  ;;  %v440_v47 = vld [vmem:[#allocation2 + $0x5f0] sm:$0xff] }
  0xa8   :  { %1593 = vmatprep.subr.bf16.mxu0 %v1592_v48  ;;  %v1626_v48 = vpack.c.bf16 %v440_v47, %v438_v46  ;;  %v570_v46 = vld [vmem:[#allocation2 + $0x748] sm:$0xff]  ;;  %v572_v47 = vld [vmem:[#allocation2 + $0x758] sm:$0xff] }
  0xa9   :  { %v1668_v49 = vpack.c.bf16 %v572_v47, %v570_v46  ;;  %v690_v46 = vld [vmem:[#allocation2 + $0x850] sm:$0xff]  ;;  %v693_v47 = vld [vmem:[#allocation2 + $0x868] sm:$0xff] }
  0xab   :  { %1595 = vmatpush1.bf16.msra.mxu0 %v1594_v53  ;;  %v531_v53 = vld [vmem:[#allocation2 + $0x610] sm:$0xff] }
  0xac   :  { %1597 = vmatprep.subr.bf16.mxu0 %v1596_v54  ;;  %v534_v54 = vld [vmem:[#allocation2 + $0x628] sm:$0xff]  ;;  %v1630_v56 = vpack.c.bf16 %v531_v53, %v529_v51  ;;  %v571_v51 = vld [vmem:[#allocation2 + $0x750] sm:$0xff]  ;;  %v576_v53 = vld [vmem:[#allocation2 + $0x778] sm:$0xff] }
  0xad   :  { %v1632_v57 = vpack.c.bf16 %v536_v55, %v534_v54  ;;  %v1670_v54 = vpack.c.bf16 %v571_v51, %v569_v50  ;;  %v1672_v55 = vpack.c.bf16 %v576_v53, %v574_v52  ;;  %v692_v51 = vld [vmem:[#allocation2 + $0x860] sm:$0xff]  ;;  %v694_v52 = vld [vmem:[#allocation2 + $0x870] sm:$0xff]  ;;  %v697_v53 = vld [vmem:[#allocation2 + $0x888] sm:$0xff] }
  0xaf   :  { %1599 = vmatpush1.bf16.msra.mxu0 %v1598_v43  ;;  %v535_v43 = vld [vmem:[#allocation2 + $0x630] sm:$0xff] }
  0xb0   :  { %1601 = vmatprep.subr.bf16.mxu0 %v1600_v59  ;;  %v538_v59 = vld [vmem:[#allocation2 + $0x648] sm:$0xff]  ;;  %v1634_v61 = vpack.c.bf16 %v535_v43, %v533_v58  ;;  %v580_v43 = vld [vmem:[#allocation2 + $0x798] sm:$0xff] }
  0xb1   :  { %v1636_v62 = vpack.c.bf16 %v540_v60, %v538_v59  ;;  %v578_v58 = vld [vmem:[#allocation2 + $0x788] sm:$0xff] }
  0xb2   :  { %v1676_v60 = vpack.c.bf16 %v580_v43, %v578_v58  ;;  %v698_v58 = vld [vmem:[#allocation2 + $0x890] sm:$0xff]  ;;  %v701_v43 = vld [vmem:[#allocation2 + $0x8a8] sm:$0xff] }
  0xb3   :  { %1603 = vmatpush1.bf16.msra.mxu0 %v1602_v0  ;;  %v539_v0 = vld [vmem:[#allocation2 + $0x650] sm:$0xff] }
  0xb4   :  { %1605 = vmatprep.subr.bf16.mxu0 %v1604_v1  ;;  %v542_v1 = vld [vmem:[#allocation2 + $0x668] sm:$0xff]  ;;  %v1638_v3 = vpack.c.bf16 %v539_v0, %v537_v63  ;;  %v584_v0 = vld [vmem:[#allocation2 + $0x7b8] sm:$0xff] }
  0xb5   :  { %v1640_v4 = vpack.c.bf16 %v544_v2, %v542_v1  ;;  %v582_v63 = vld [vmem:[#allocation2 + $0x7a8] sm:$0xff] }
  0xb6   :  { %v1680_v2 = vpack.c.bf16 %v584_v0, %v582_v63  ;;  %v702_v63 = vld [vmem:[#allocation2 + $0x8b0] sm:$0xff]  ;;  %v705_v0 = vld [vmem:[#allocation2 + $0x8c8] sm:$0xff] }
  0xb7   :  { %1607 = vmatpush1.bf16.msra.mxu0 %v1606_v6  ;;  %v543_v6 = vld [vmem:[#allocation2 + $0x670] sm:$0xff] }
  0xb8   :  { %1609 = vmatprep.subr.bf16.mxu0 %v1608_v7  ;;  %v546_v7 = vld [vmem:[#allocation2 + $0x688] sm:$0xff]  ;;  %v1642_v9 = vpack.c.bf16 %v543_v6, %v541_v5  ;;  %v588_v6 = vld [vmem:[#allocation2 + $0x7d8] sm:$0xff] }
  0xb9   :  { %v1644_v10 = vpack.c.bf16 %v548_v8, %v546_v7  ;;  %v586_v5 = vld [vmem:[#allocation2 + $0x7c8] sm:$0xff] }
  0xba   :  { %v1684_v8 = vpack.c.bf16 %v588_v6, %v586_v5  ;;  %v706_v5 = vld [vmem:[#allocation2 + $0x8d0] sm:$0xff]  ;;  %v709_v6 = vld [vmem:[#allocation2 + $0x8e8] sm:$0xff] }
  0xbb   :  { %1611 = vmatpush1.bf16.msra.mxu0 %v1610_v12  ;;  %v547_v12 = vld [vmem:[#allocation2 + $0x690] sm:$0xff] }
  0xbc   :  { %1613 = vmatprep.subr.bf16.mxu0 %v1612_v13  ;;  %v550_v13 = vld [vmem:[#allocation2 + $0x6a8] sm:$0xff]  ;;  %v1646_v15 = vpack.c.bf16 %v547_v12, %v545_v11 }
  0xbd   :  { %v1648_v16 = vpack.c.bf16 %v552_v14, %v550_v13 }
  0xbf   :  { %1615 = vmatpush1.bf16.msra.mxu0 %v1614_v18  ;;  %v551_v18 = vld [vmem:[#allocation2 + $0x6b0] sm:$0xff] }
  0xc0   :  { %1617 = vmatprep.subr.bf16.mxu0 %v1616_v19  ;;  %v554_v19 = vld [vmem:[#allocation2 + $0x6c8] sm:$0xff]  ;;  %v1650_v21 = vpack.c.bf16 %v551_v18, %v549_v17  ;;  %v585_v18 = vld [vmem:[#allocation2 + $0x7c0] sm:$0xff] }
  0xc1   :  { %v1652_v22 = vpack.c.bf16 %v556_v20, %v554_v19  ;;  %v587_v19 = vld [vmem:[#allocation2 + $0x7d0] sm:$0xff] }
  0xc2   :  { %v1686_v20 = vpack.c.bf16 %v587_v19, %v585_v18  ;;  %v717_v18 = vld [vmem:[#allocation2 + $0x928] sm:$0xff]  ;;  %v719_v19 = vld [vmem:[#allocation2 + $0x938] sm:$0xff] }
  0xc3   :  { %1619 = vmatpush1.bf16.msra.mxu0 %v1618_v24  ;;  %v555_v24 = vld [vmem:[#allocation2 + $0x6d0] sm:$0xff] }
  0xc4   :  { %1621 = vmatprep.subr.bf16.mxu0 %v1620_v25  ;;  %v558_v25 = vld [vmem:[#allocation2 + $0x6e8] sm:$0xff]  ;;  %v1654_v27 = vpack.c.bf16 %v555_v24, %v553_v23  ;;  %v589_v24 = vld [vmem:[#allocation2 + $0x7e0] sm:$0xff] }
  0xc5   :  { %v1656_v29 = vpack.c.bf16 %v560_v26, %v558_v25  ;;  %v591_v25 = vld [vmem:[#allocation2 + $0x7f0] sm:$0xff] }
  0xc6   :  { %v1690_v26 = vpack.c.bf16 %v591_v25, %v589_v24  ;;  %v721_v24 = vld [vmem:[#allocation2 + $0x948] sm:$0xff]  ;;  %v723_v25 = vld [vmem:[#allocation2 + $0x958] sm:$0xff] }
  0xc7   :  { %1623 = vmatpush1.bf16.msra.mxu0 %v1622_v41 }
  0xc8   :  { %1625 = vmatprep.subr.bf16.mxu0 %v1624_v45  ;;  %v567_v45 = vld [vmem:[#allocation2 + $0x730] sm:$0xff] }
  0xcb   :  { %1627 = vmatpush1.bf16.msra.mxu0 %v1626_v48  ;;  %v1666_v48 = vpack.c.bf16 %v567_v45, %v565_v44  ;;  %v688_v45 = vld [vmem:[#allocation2 + $0x840] sm:$0xff] }
 0x161   :  { %v219_v33 = vpop.f32.mrb[0].mxu0 }
 0x162   :  { %v220_v34 = vadd.f32 %v219_v33, %v143_v31  ;;  %v221_v35 = vpop.f32.mrb[1].mxu0  ;;  %v557_v31 = vld [vmem:[#allocation2 + $0x6e0] sm:$0xff]  ;;  %v562_v33 = vld [vmem:[#allocation2 + $0x708] sm:$0xff] }
 0x163   :  { %v222_v36 = vadd.f32 %v221_v35, %v147_v32  ;;  %v559_v32 = vld [vmem:[#allocation2 + $0x6f0] sm:$0xff] }
 0x164   :  { %v224_v38 = vmax.f32 %v220_v34, 0.0  ;;  %v564_v34 = vld [vmem:[#allocation2 + $0x718] sm:$0xff]  ;;  %v1658_v35 = vpack.c.bf16 %v559_v32, %v557_v31  ;;  %v680_v31 = vld [vmem:[#allocation2 + $0x800] sm:$0xff] }
 0x165   :  { %v225_v37 = vmax.f32 %v222_v36, 0.0  ;;  %v1660_v36 = vpack.c.bf16 %v564_v34, %v562_v33  ;;  %v682_v33 = vld [vmem:[#allocation2 + $0x810] sm:$0xff]  ;;  %v685_v34 = vld [vmem:[#allocation2 + $0x828] sm:$0xff] }
 0x167   :  { %368 = vmatprep.mubr.f32.mxu1 %v225_v37  ;;  %v561_v37 = vld [vmem:[#allocation2 + $0x700] sm:$0xff] }
 0x168   :  { %369 = vmatmul.mubr.f32.vlgmr.msra.gmra.mrb[0].mxu1 %v224_v38  ;;  %v563_v38 = vld [vmem:[#allocation2 + $0x710] sm:$0xff] }
 0x169   :  { %1631 = vmatpush1.bf16.msra.mxu1 %v1630_v56  ;;  %v1662_v41 = vpack.c.bf16 %v563_v38, %v561_v37  ;;  %v573_v56 = vld [vmem:[#allocation2 + $0x760] sm:$0xff] }
 0x16a   :  { %1633 = vmatprep.subr.bf16.mxu1 %v1632_v57  ;;  %v575_v57 = vld [vmem:[#allocation2 + $0x770] sm:$0xff]  ;;  %v684_v38 = vld [vmem:[#allocation2 + $0x820] sm:$0xff] }
 0x16b   :  { %v1674_v59 = vpack.c.bf16 %v575_v57, %v573_v56  ;;  %v696_v57 = vld [vmem:[#allocation2 + $0x880] sm:$0xff] }
 0x16d   :  { %1635 = vmatpush1.bf16.msra.mxu1 %v1634_v61  ;;  %v577_v61 = vld [vmem:[#allocation2 + $0x780] sm:$0xff] }
 0x16e   :  { %1637 = vmatprep.subr.bf16.mxu1 %v1636_v62  ;;  %v579_v62 = vld [vmem:[#allocation2 + $0x790] sm:$0xff] }
 0x16f   :  { %v1678_v1 = vpack.c.bf16 %v579_v62, %v577_v61  ;;  %v700_v62 = vld [vmem:[#allocation2 + $0x8a0] sm:$0xff] }
 0x171   :  { %1639 = vmatpush1.bf16.msra.mxu1 %v1638_v3  ;;  %v581_v3 = vld [vmem:[#allocation2 + $0x7a0] sm:$0xff] }
 0x172   :  { %1641 = vmatprep.subr.bf16.mxu1 %v1640_v4  ;;  %v583_v4 = vld [vmem:[#allocation2 + $0x7b0] sm:$0xff] }
 0x173   :  { %v1682_v7 = vpack.c.bf16 %v583_v4, %v581_v3  ;;  %v704_v4 = vld [vmem:[#allocation2 + $0x8c0] sm:$0xff] }
 0x175   :  { %1643 = vmatpush1.bf16.msra.mxu1 %v1642_v9  ;;  %v292_v9 = vld [vmem:[#allocation4 + $0x2] sm:$0x3] }
 0x176   :  { %1645 = vmatprep.subr.bf16.mxu1 %v1644_v10  ;;  %v297_v10 = vrot.slane %v292_v9, %v2181_v28  ;;  %v301_v11 = vrot.slane %v292_v9, %v2183_v30 }
 0x179   :  { %1647 = vmatpush1.bf16.msra.mxu1 %v1646_v15 }
 0x17a   :  { %1649 = vmatprep.subr.bf16.mxu1 %v1648_v16 }
 0x17d   :  { %1651 = vmatpush1.bf16.msra.mxu1 %v1650_v21  ;;  %v590_v21 = vld [vmem:[#allocation2 + $0x7e8] sm:$0xff] }
 0x17e   :  { %1653 = vmatprep.subr.bf16.mxu1 %v1652_v22  ;;  %v592_v22 = vld [vmem:[#allocation2 + $0x7f8] sm:$0xff] }
 0x17f   :  { %v1688_v23 = vpack.c.bf16 %v592_v22, %v590_v21  ;;  %v1728_v21 = vpack.c.bf16 %v719_v19, %v717_v18  ;;  %v716_v22 = vld [vmem:[#allocation2 + $0x920] sm:$0xff]  ;;  %v837_v18 = vld [vmem:[#allocation2 + $0xa30] sm:$0xff]  ;;  %v840_v19 = vld [vmem:[#allocation2 + $0xa48] sm:$0xff] }
 0x181   :  { %1655 = vmatpush1.bf16.msra.mxu1 %v1654_v27  ;;  %v681_v27 = vld [vmem:[#allocation2 + $0x808] sm:$0xff] }
 0x182   :  { %1657 = vmatprep.subr.bf16.mxu1 %v1656_v29  ;;  %v683_v29 = vld [vmem:[#allocation2 + $0x818] sm:$0xff] }
 0x183   :  { %v1692_v32 = vpack.c.bf16 %v683_v29, %v681_v27  ;;  %v1732_v27 = vpack.c.bf16 %v723_v25, %v721_v24  ;;  %v720_v29 = vld [vmem:[#allocation2 + $0x940] sm:$0xff]  ;;  %v841_v24 = vld [vmem:[#allocation2 + $0xa50] sm:$0xff]  ;;  %v844_v25 = vld [vmem:[#allocation2 + $0xa68] sm:$0xff] }
 0x185   :  { %1659 = vmatpush1.bf16.msra.mxu1 %v1658_v35  ;;  %v687_v35 = vld [vmem:[#allocation2 + $0x838] sm:$0xff]  ;;  %1693 = vmatprep.subr.bf16.mxu0 %v1692_v32  ;;  %v725_v32 = vld [vmem:[#allocation2 + $0x968] sm:$0xff] }
 0x186   :  { %1661 = vmatprep.subr.bf16.mxu1 %v1660_v36  ;;  %v1694_v36 = vpack.c.bf16 %v682_v33, %v680_v31  ;;  %v1696_v37 = vpack.c.bf16 %v687_v35, %v685_v34  ;;  %v722_v31 = vld [vmem:[#allocation2 + $0x950] sm:$0xff]  ;;  %v727_v33 = vld [vmem:[#allocation2 + $0x978] sm:$0xff] }
 0x187   :  { %v1734_v34 = vpack.c.bf16 %v722_v31, %v720_v29  ;;  %v1736_v35 = vpack.c.bf16 %v727_v33, %v725_v32  ;;  %v843_v31 = vld [vmem:[#allocation2 + $0xa60] sm:$0xff]  ;;  %v845_v32 = vld [vmem:[#allocation2 + $0xa70] sm:$0xff]  ;;  %v848_v33 = vld [vmem:[#allocation2 + $0xa88] sm:$0xff] }
 0x189   :  { %1663 = vmatpush1.bf16.msra.mxu1 %v1662_v41  ;;  %v691_v41 = vld [vmem:[#allocation2 + $0x858] sm:$0xff] }
 0x18a   :  { %1665 = vmatprep.subr.bf16.mxu1 %v1664_v42  ;;  %v1698_v42 = vpack.c.bf16 %v686_v39, %v684_v38  ;;  %v1700_v44 = vpack.c.bf16 %v691_v41, %v689_v40  ;;  %v729_v38 = vld [vmem:[#allocation2 + $0x988] sm:$0xff]  ;;  %v731_v39 = vld [vmem:[#allocation2 + $0x998] sm:$0xff] }
 0x18b   :  { %v1740_v41 = vpack.c.bf16 %v731_v39, %v729_v38  ;;  %v849_v38 = vld [vmem:[#allocation2 + $0xa90] sm:$0xff]  ;;  %v852_v39 = vld [vmem:[#allocation2 + $0xaa8] sm:$0xff] }
 0x18d   :  { %1667 = vmatpush1.bf16.msra.mxu1 %v1666_v48  ;;  %v695_v48 = vld [vmem:[#allocation2 + $0x878] sm:$0xff] }
 0x18e   :  { %1669 = vmatprep.subr.bf16.mxu1 %v1668_v49  ;;  %v1702_v49 = vpack.c.bf16 %v690_v46, %v688_v45  ;;  %v1704_v50 = vpack.c.bf16 %v695_v48, %v693_v47  ;;  %v733_v45 = vld [vmem:[#allocation2 + $0x9a8] sm:$0xff]  ;;  %v735_v46 = vld [vmem:[#allocation2 + $0x9b8] sm:$0xff] }
 0x18f   :  { %v1744_v48 = vpack.c.bf16 %v735_v46, %v733_v45  ;;  %v853_v45 = vld [vmem:[#allocation2 + $0xab0] sm:$0xff]  ;;  %v856_v46 = vld [vmem:[#allocation2 + $0xac8] sm:$0xff] }
 0x191   :  { %1671 = vmatpush1.bf16.msra.mxu1 %v1670_v54  ;;  %v699_v54 = vld [vmem:[#allocation2 + $0x898] sm:$0xff] }
 0x192   :  { %1673 = vmatprep.subr.bf16.mxu1 %v1672_v55  ;;  %v1706_v55 = vpack.c.bf16 %v694_v52, %v692_v51  ;;  %v1708_v56 = vpack.c.bf16 %v699_v54, %v697_v53  ;;  %v737_v51 = vld [vmem:[#allocation2 + $0x9c8] sm:$0xff]  ;;  %v739_v52 = vld [vmem:[#allocation2 + $0x9d8] sm:$0xff] }
 0x193   :  { %v1748_v54 = vpack.c.bf16 %v739_v52, %v737_v51  ;;  %v857_v51 = vld [vmem:[#allocation2 + $0xad0] sm:$0xff]  ;;  %v860_v52 = vld [vmem:[#allocation2 + $0xae8] sm:$0xff] }
 0x195   :  { %1675 = vmatpush1.bf16.msra.mxu1 %v1674_v59  ;;  %v703_v59 = vld [vmem:[#allocation2 + $0x8b8] sm:$0xff] }
 0x196   :  { %1677 = vmatprep.subr.bf16.mxu1 %v1676_v60  ;;  %v1710_v60 = vpack.c.bf16 %v698_v58, %v696_v57  ;;  %v1712_v61 = vpack.c.bf16 %v703_v59, %v701_v43 }
 0x199   :  { %1679 = vmatpush1.bf16.msra.mxu1 %v1678_v1  ;;  %v707_v1 = vld [vmem:[#allocation2 + $0x8d8] sm:$0xff] }
 0x19a   :  { %1681 = vmatprep.subr.bf16.mxu1 %v1680_v2  ;;  %v1714_v2 = vpack.c.bf16 %v702_v63, %v700_v62  ;;  %v1716_v3 = vpack.c.bf16 %v707_v1, %v705_v0  ;;  %v736_v63 = vld [vmem:[#allocation2 + $0x9c0] sm:$0xff]  ;;  %v738_v0 = vld [vmem:[#allocation2 + $0x9d0] sm:$0xff] }
 0x19b   :  { %v1750_v1 = vpack.c.bf16 %v738_v0, %v736_v63  ;;  %v868_v63 = vld [vmem:[#allocation2 + $0xb28] sm:$0xff]  ;;  %v870_v0 = vld [vmem:[#allocation2 + $0xb38] sm:$0xff] }
 0x19d   :  { %1683 = vmatpush1.bf16.msra.mxu1 %v1682_v7  ;;  %v711_v7 = vld [vmem:[#allocation2 + $0x8f8] sm:$0xff] }
 0x19e   :  { %1685 = vmatprep.subr.bf16.mxu1 %v1684_v8  ;;  %v1718_v8 = vpack.c.bf16 %v706_v5, %v704_v4  ;;  %v1720_v9 = vpack.c.bf16 %v711_v7, %v709_v6  ;;  %v740_v5 = vld [vmem:[#allocation2 + $0x9e0] sm:$0xff]  ;;  %v742_v6 = vld [vmem:[#allocation2 + $0x9f0] sm:$0xff] }
 0x19f   :  { %v1754_v7 = vpack.c.bf16 %v742_v6, %v740_v5  ;;  %v872_v5 = vld [vmem:[#allocation2 + $0xb48] sm:$0xff]  ;;  %v874_v6 = vld [vmem:[#allocation2 + $0xb58] sm:$0xff] }
 0x1a1   :  { %1687 = vmatpush1.bf16.msra.mxu1 %v1686_v20 }
 0x1a2   :  { %1689 = vmatprep.subr.bf16.mxu1 %v1688_v23  ;;  %v718_v23 = vld [vmem:[#allocation2 + $0x930] sm:$0xff] }
 0x1a5   :  { %1691 = vmatpush1.bf16.msra.mxu1 %v1690_v26  ;;  %v1730_v26 = vpack.c.bf16 %v718_v23, %v716_v22  ;;  %v839_v23 = vld [vmem:[#allocation2 + $0xa40] sm:$0xff] }
 0x23b   :  { %v370_v12 = vpop.f32.mrb[0].mxu1 }
 0x23c   :  { %v371_v13 = vadd.f32 %v370_v12, %v297_v10  ;;  %v372_v14 = vpop.f32.mrb[1].mxu1  ;;  %v708_v10 = vld [vmem:[#allocation2 + $0x8e0] sm:$0xff]  ;;  %v713_v12 = vld [vmem:[#allocation2 + $0x908] sm:$0xff] }
 0x23d   :  { %v373_v15 = vadd.f32 %v372_v14, %v301_v11  ;;  %v710_v11 = vld [vmem:[#allocation2 + $0x8f0] sm:$0xff] }
 0x23e   :  { %v375_v17 = vmax.f32 %v371_v13, 0.0  ;;  %v715_v13 = vld [vmem:[#allocation2 + $0x918] sm:$0xff]  ;;  %v1722_v14 = vpack.c.bf16 %v710_v11, %v708_v10  ;;  %v831_v10 = vld [vmem:[#allocation2 + $0xa00] sm:$0xff] }
 0x23f   :  { %v376_v16 = vmax.f32 %v373_v15, 0.0  ;;  %v1724_v15 = vpack.c.bf16 %v715_v13, %v713_v12  ;;  %v833_v12 = vld [vmem:[#allocation2 + $0xa10] sm:$0xff]  ;;  %v836_v13 = vld [vmem:[#allocation2 + $0xa28] sm:$0xff] }
 0x241   :  { %519 = vmatprep.mubr.f32.mxu0 %v376_v16  ;;  %v712_v16 = vld [vmem:[#allocation2 + $0x900] sm:$0xff] }
 0x242   :  { %520 = vmatmul.mubr.f32.vlgmr.msra.gmra.mrb[2].mxu0 %v375_v17  ;;  %v714_v17 = vld [vmem:[#allocation2 + $0x910] sm:$0xff] }
 0x243   :  { %1695 = vmatpush1.bf16.msra.mxu0 %v1694_v36  ;;  %v1726_v20 = vpack.c.bf16 %v714_v17, %v712_v16  ;;  %v724_v36 = vld [vmem:[#allocation2 + $0x960] sm:$0xff] }
 0x244   :  { %1697 = vmatprep.subr.bf16.mxu0 %v1696_v37  ;;  %v726_v37 = vld [vmem:[#allocation2 + $0x970] sm:$0xff]  ;;  %v835_v17 = vld [vmem:[#allocation2 + $0xa20] sm:$0xff] }
 0x245   :  { %v1738_v40 = vpack.c.bf16 %v726_v37, %v724_v36  ;;  %v847_v37 = vld [vmem:[#allocation2 + $0xa80] sm:$0xff] }
 0x247   :  { %1699 = vmatpush1.bf16.msra.mxu0 %v1698_v42  ;;  %v728_v42 = vld [vmem:[#allocation2 + $0x980] sm:$0xff] }
 0x248   :  { %1701 = vmatprep.subr.bf16.mxu0 %v1700_v44  ;;  %v730_v44 = vld [vmem:[#allocation2 + $0x990] sm:$0xff] }
 0x249   :  { %v1742_v47 = vpack.c.bf16 %v730_v44, %v728_v42  ;;  %v851_v44 = vld [vmem:[#allocation2 + $0xaa0] sm:$0xff] }
 0x24b   :  { %1703 = vmatpush1.bf16.msra.mxu0 %v1702_v49  ;;  %v732_v49 = vld [vmem:[#allocation2 + $0x9a0] sm:$0xff] }
 0x24c   :  { %1705 = vmatprep.subr.bf16.mxu0 %v1704_v50  ;;  %v734_v50 = vld [vmem:[#allocation2 + $0x9b0] sm:$0xff] }
 0x24d   :  { %v1746_v53 = vpack.c.bf16 %v734_v50, %v732_v49  ;;  %v855_v50 = vld [vmem:[#allocation2 + $0xac0] sm:$0xff] }
 0x24f   :  { %1707 = vmatpush1.bf16.msra.mxu0 %v1706_v55  ;;  %v443_v55 = vld [vmem:[#allocation4 + $0x4] sm:$0x3] }
 0x250   :  { %1709 = vmatprep.subr.bf16.mxu0 %v1708_v56  ;;  %v448_v56 = vrot.slane %v443_v55, %v2181_v28  ;;  %v452_v57 = vrot.slane %v443_v55, %v2183_v30 }
 0x253   :  { %1711 = vmatpush1.bf16.msra.mxu0 %v1710_v60 }
 0x254   :  { %1713 = vmatprep.subr.bf16.mxu0 %v1712_v61 }
 0x257   :  { %1715 = vmatpush1.bf16.msra.mxu0 %v1714_v2  ;;  %v741_v2 = vld [vmem:[#allocation2 + $0x9e8] sm:$0xff] }
 0x258   :  { %1717 = vmatprep.subr.bf16.mxu0 %v1716_v3  ;;  %v743_v3 = vld [vmem:[#allocation2 + $0x9f8] sm:$0xff] }
 0x259   :  { %v1752_v4 = vpack.c.bf16 %v743_v3, %v741_v2  ;;  %v1792_v2 = vpack.c.bf16 %v870_v0, %v868_v63  ;;  %v867_v3 = vld [vmem:[#allocation2 + $0xb20] sm:$0xff]  ;;  %v988_v63 = vld [vmem:[#allocation2 + $0xc30] sm:$0xff]  ;;  %v991_v0 = vld [vmem:[#allocation2 + $0xc48] sm:$0xff] }
 0x25b   :  { %1719 = vmatpush1.bf16.msra.mxu0 %v1718_v8  ;;  %v832_v8 = vld [vmem:[#allocation2 + $0xa08] sm:$0xff] }
 0x25c   :  { %1721 = vmatprep.subr.bf16.mxu0 %v1720_v9  ;;  %v834_v9 = vld [vmem:[#allocation2 + $0xa18] sm:$0xff] }
 0x25d   :  { %v1756_v11 = vpack.c.bf16 %v834_v9, %v832_v8  ;;  %v1796_v8 = vpack.c.bf16 %v874_v6, %v872_v5  ;;  %v871_v9 = vld [vmem:[#allocation2 + $0xb40] sm:$0xff]  ;;  %v992_v5 = vld [vmem:[#allocation2 + $0xc50] sm:$0xff]  ;;  %v995_v6 = vld [vmem:[#allocation2 + $0xc68] sm:$0xff] }
 0x25f   :  { %1723 = vmatpush1.bf16.msra.mxu0 %v1722_v14  ;;  %v838_v14 = vld [vmem:[#allocation2 + $0xa38] sm:$0xff]  ;;  %1757 = vmatprep.subr.bf16.mxu1 %v1756_v11  ;;  %v876_v11 = vld [vmem:[#allocation2 + $0xb68] sm:$0xff] }
 0x260   :  { %1725 = vmatprep.subr.bf16.mxu0 %v1724_v15  ;;  %v1758_v15 = vpack.c.bf16 %v833_v12, %v831_v10  ;;  %v1760_v16 = vpack.c.bf16 %v838_v14, %v836_v13  ;;  %v873_v10 = vld [vmem:[#allocation2 + $0xb50] sm:$0xff]  ;;  %v878_v12 = vld [vmem:[#allocation2 + $0xb78] sm:$0xff] }
 0x261   :  { %v1798_v13 = vpack.c.bf16 %v873_v10, %v871_v9  ;;  %v1800_v14 = vpack.c.bf16 %v878_v12, %v876_v11  ;;  %v994_v10 = vld [vmem:[#allocation2 + $0xc60] sm:$0xff]  ;;  %v996_v11 = vld [vmem:[#allocation2 + $0xc70] sm:$0xff]  ;;  %v999_v12 = vld [vmem:[#allocation2 + $0xc88] sm:$0xff] }
 0x263   :  { %1727 = vmatpush1.bf16.msra.mxu0 %v1726_v20  ;;  %v842_v20 = vld [vmem:[#allocation2 + $0xa58] sm:$0xff] }
 0x264   :  { %1729 = vmatprep.subr.bf16.mxu0 %v1728_v21  ;;  %v1762_v21 = vpack.c.bf16 %v837_v18, %v835_v17  ;;  %v1764_v22 = vpack.c.bf16 %v842_v20, %v840_v19  ;;  %v880_v17 = vld [vmem:[#allocation2 + $0xb88] sm:$0xff]  ;;  %v882_v18 = vld [vmem:[#allocation2 + $0xb98] sm:$0xff] }
 0x265   :  { %v1804_v20 = vpack.c.bf16 %v882_v18, %v880_v17  ;;  %v1000_v17 = vld [vmem:[#allocation2 + $0xc90] sm:$0xff]  ;;  %v1003_v18 = vld [vmem:[#allocation2 + $0xca8] sm:$0xff] }
 0x267   :  { %1731 = vmatpush1.bf16.msra.mxu0 %v1730_v26  ;;  %v846_v26 = vld [vmem:[#allocation2 + $0xa78] sm:$0xff] }
 0x268   :  { %1733 = vmatprep.subr.bf16.mxu0 %v1732_v27  ;;  %v1766_v27 = vpack.c.bf16 %v841_v24, %v839_v23  ;;  %v1768_v29 = vpack.c.bf16 %v846_v26, %v844_v25  ;;  %v884_v23 = vld [vmem:[#allocation2 + $0xba8] sm:$0xff]  ;;  %v886_v24 = vld [vmem:[#allocation2 + $0xbb8] sm:$0xff] }
 0x269   :  { %v1808_v26 = vpack.c.bf16 %v886_v24, %v884_v23  ;;  %v1004_v23 = vld [vmem:[#allocation2 + $0xcb0] sm:$0xff]  ;;  %v1007_v24 = vld [vmem:[#allocation2 + $0xcc8] sm:$0xff] }
 0x26b   :  { %1735 = vmatpush1.bf16.msra.mxu0 %v1734_v34  ;;  %v850_v34 = vld [vmem:[#allocation2 + $0xa98] sm:$0xff] }
 0x26c   :  { %1737 = vmatprep.subr.bf16.mxu0 %v1736_v35  ;;  %v1770_v35 = vpack.c.bf16 %v845_v32, %v843_v31  ;;  %v1772_v36 = vpack.c.bf16 %v850_v34, %v848_v33  ;;  %v888_v31 = vld [vmem:[#allocation2 + $0xbc8] sm:$0xff]  ;;  %v890_v32 = vld [vmem:[#allocation2 + $0xbd8] sm:$0xff] }
 0x26d   :  { %v1812_v34 = vpack.c.bf16 %v890_v32, %v888_v31  ;;  %v1008_v31 = vld [vmem:[#allocation2 + $0xcd0] sm:$0xff]  ;;  %v1011_v32 = vld [vmem:[#allocation2 + $0xce8] sm:$0xff] }
 0x26f   :  { %1739 = vmatpush1.bf16.msra.mxu0 %v1738_v40  ;;  %v854_v40 = vld [vmem:[#allocation2 + $0xab8] sm:$0xff] }
 0x270   :  { %1741 = vmatprep.subr.bf16.mxu0 %v1740_v41  ;;  %v1774_v41 = vpack.c.bf16 %v849_v38, %v847_v37  ;;  %v1776_v42 = vpack.c.bf16 %v854_v40, %v852_v39 }
 0x273   :  { %1743 = vmatpush1.bf16.msra.mxu0 %v1742_v47  ;;  %v858_v47 = vld [vmem:[#allocation2 + $0xad8] sm:$0xff] }
 0x274   :  { %1745 = vmatprep.subr.bf16.mxu0 %v1744_v48  ;;  %v1778_v48 = vpack.c.bf16 %v853_v45, %v851_v44  ;;  %v1780_v49 = vpack.c.bf16 %v858_v47, %v856_v46  ;;  %v887_v45 = vld [vmem:[#allocation2 + $0xbc0] sm:$0xff]  ;;  %v889_v46 = vld [vmem:[#allocation2 + $0xbd0] sm:$0xff] }
 0x275   :  { %v1814_v47 = vpack.c.bf16 %v889_v46, %v887_v45  ;;  %v1019_v45 = vld [vmem:[#allocation2 + $0xd28] sm:$0xff]  ;;  %v1021_v46 = vld [vmem:[#allocation2 + $0xd38] sm:$0xff] }
 0x277   :  { %1747 = vmatpush1.bf16.msra.mxu0 %v1746_v53  ;;  %v862_v53 = vld [vmem:[#allocation2 + $0xaf8] sm:$0xff] }
 0x278   :  { %1749 = vmatprep.subr.bf16.mxu0 %v1748_v54  ;;  %v1782_v54 = vpack.c.bf16 %v857_v51, %v855_v50  ;;  %v1784_v55 = vpack.c.bf16 %v862_v53, %v860_v52  ;;  %v891_v51 = vld [vmem:[#allocation2 + $0xbe0] sm:$0xff]  ;;  %v893_v52 = vld [vmem:[#allocation2 + $0xbf0] sm:$0xff] }
 0x279   :  { %v1818_v53 = vpack.c.bf16 %v893_v52, %v891_v51  ;;  %v1023_v51 = vld [vmem:[#allocation2 + $0xd48] sm:$0xff]  ;;  %v1025_v52 = vld [vmem:[#allocation2 + $0xd58] sm:$0xff] }
 0x27b   :  { %1751 = vmatpush1.bf16.msra.mxu0 %v1750_v1 }
 0x27c   :  { %1753 = vmatprep.subr.bf16.mxu0 %v1752_v4  ;;  %v869_v4 = vld [vmem:[#allocation2 + $0xb30] sm:$0xff] }
 0x27f   :  { %1755 = vmatpush1.bf16.msra.mxu0 %v1754_v7  ;;  %v1794_v7 = vpack.c.bf16 %v869_v4, %v867_v3  ;;  %v990_v4 = vld [vmem:[#allocation2 + $0xc40] sm:$0xff] }
 0x315   :  { %v521_v58 = vpop.f32.mrb[2].mxu0 }
 0x316   :  { %v522_v43 = vadd.f32 %v521_v58, %v448_v56  ;;  %v523_v59 = vpop.f32.mrb[3].mxu0  ;;  %v859_v56 = vld [vmem:[#allocation2 + $0xae0] sm:$0xff]  ;;  %v864_v58 = vld [vmem:[#allocation2 + $0xb08] sm:$0xff] }
 0x317   :  { %v524_v60 = vadd.f32 %v523_v59, %v452_v57  ;;  %v861_v57 = vld [vmem:[#allocation2 + $0xaf0] sm:$0xff] }
 0x318   :  { %v526_v62 = vmax.f32 %v522_v43, 0.0  ;;  %v866_v43 = vld [vmem:[#allocation2 + $0xb18] sm:$0xff]  ;;  %v1786_v59 = vpack.c.bf16 %v861_v57, %v859_v56  ;;  %v982_v56 = vld [vmem:[#allocation2 + $0xc00] sm:$0xff] }
 0x319   :  { %v527_v61 = vmax.f32 %v524_v60, 0.0  ;;  %v1788_v60 = vpack.c.bf16 %v866_v43, %v864_v58  ;;  %v984_v58 = vld [vmem:[#allocation2 + $0xc10] sm:$0xff]  ;;  %v987_v43 = vld [vmem:[#allocation2 + $0xc28] sm:$0xff] }
 0x31b   :  { %670 = vmatprep.mubr.f32.mxu1 %v527_v61  ;;  %v863_v61 = vld [vmem:[#allocation2 + $0xb00] sm:$0xff] }
 0x31c   :  { %671 = vmatmul.mubr.f32.vlgmr.msra.gmra.mrb[2].mxu1 %v526_v62  ;;  %v865_v62 = vld [vmem:[#allocation2 + $0xb10] sm:$0xff] }
 0x31d   :  { %1759 = vmatpush1.bf16.msra.mxu1 %v1758_v15  ;;  %v1790_v1 = vpack.c.bf16 %v865_v62, %v863_v61  ;;  %v875_v15 = vld [vmem:[#allocation2 + $0xb60] sm:$0xff] }
 0x31e   :  { %1761 = vmatprep.subr.bf16.mxu1 %v1760_v16  ;;  %v877_v16 = vld [vmem:[#allocation2 + $0xb70] sm:$0xff]  ;;  %v986_v62 = vld [vmem:[#allocation2 + $0xc20] sm:$0xff] }
 0x31f   :  { %v1802_v19 = vpack.c.bf16 %v877_v16, %v875_v15  ;;  %v998_v16 = vld [vmem:[#allocation2 + $0xc80] sm:$0xff] }
 0x321   :  { %1763 = vmatpush1.bf16.msra.mxu1 %v1762_v21  ;;  %v879_v21 = vld [vmem:[#allocation2 + $0xb80] sm:$0xff] }
 0x322   :  { %1765 = vmatprep.subr.bf16.mxu1 %v1764_v22  ;;  %v881_v22 = vld [vmem:[#allocation2 + $0xb90] sm:$0xff] }
 0x323   :  { %v1806_v25 = vpack.c.bf16 %v881_v22, %v879_v21  ;;  %v1002_v22 = vld [vmem:[#allocation2 + $0xca0] sm:$0xff] }
 0x325   :  { %1767 = vmatpush1.bf16.msra.mxu1 %v1766_v27  ;;  %v883_v27 = vld [vmem:[#allocation2 + $0xba0] sm:$0xff] }
 0x326   :  { %1769 = vmatprep.subr.bf16.mxu1 %v1768_v29  ;;  %v885_v29 = vld [vmem:[#allocation2 + $0xbb0] sm:$0xff] }
 0x327   :  { %v1810_v33 = vpack.c.bf16 %v885_v29, %v883_v27  ;;  %v1006_v29 = vld [vmem:[#allocation2 + $0xcc0] sm:$0xff] }
 0x329   :  { %1771 = vmatpush1.bf16.msra.mxu1 %v1770_v35  ;;  %v594_v35 = vld [vmem:[#allocation4 + $0x6] sm:$0x3] }
 0x32a   :  { %1773 = vmatprep.subr.bf16.mxu1 %v1772_v36  ;;  %v599_v36 = vrot.slane %v594_v35, %v2181_v28  ;;  %v603_v37 = vrot.slane %v594_v35, %v2183_v30 }
 0x32d   :  { %1775 = vmatpush1.bf16.msra.mxu1 %v1774_v41 }
 0x32e   :  { %1777 = vmatprep.subr.bf16.mxu1 %v1776_v42 }
 0x331   :  { %1779 = vmatpush1.bf16.msra.mxu1 %v1778_v48  ;;  %v892_v48 = vld [vmem:[#allocation2 + $0xbe8] sm:$0xff] }
 0x332   :  { %1781 = vmatprep.subr.bf16.mxu1 %v1780_v49  ;;  %v894_v49 = vld [vmem:[#allocation2 + $0xbf8] sm:$0xff] }
 0x333   :  { %v1816_v50 = vpack.c.bf16 %v894_v49, %v892_v48  ;;  %v1856_v48 = vpack.c.bf16 %v1021_v46, %v1019_v45  ;;  %v1018_v49 = vld [vmem:[#allocation2 + $0xd20] sm:$0xff]  ;;  %v1139_v45 = vld [vmem:[#allocation2 + $0xe30] sm:$0xff]  ;;  %v1142_v46 = vld [vmem:[#allocation2 + $0xe48] sm:$0xff] }
 0x335   :  { %1783 = vmatpush1.bf16.msra.mxu1 %v1782_v54  ;;  %v983_v54 = vld [vmem:[#allocation2 + $0xc08] sm:$0xff] }
 0x336   :  { %1785 = vmatprep.subr.bf16.mxu1 %v1784_v55  ;;  %v985_v55 = vld [vmem:[#allocation2 + $0xc18] sm:$0xff] }
 0x337   :  { %v1820_v57 = vpack.c.bf16 %v985_v55, %v983_v54  ;;  %v1860_v54 = vpack.c.bf16 %v1025_v52, %v1023_v51  ;;  %v1022_v55 = vld [vmem:[#allocation2 + $0xd40] sm:$0xff]  ;;  %v1143_v51 = vld [vmem:[#allocation2 + $0xe50] sm:$0xff]  ;;  %v1146_v52 = vld [vmem:[#allocation2 + $0xe68] sm:$0xff] }
 0x339   :  { %1787 = vmatpush1.bf16.msra.mxu1 %v1786_v59  ;;  %v989_v59 = vld [vmem:[#allocation2 + $0xc38] sm:$0xff]  ;;  %1821 = vmatprep.subr.bf16.mxu0 %v1820_v57  ;;  %v1027_v57 = vld [vmem:[#allocation2 + $0xd68] sm:$0xff] }
 0x33a   :  { %1789 = vmatprep.subr.bf16.mxu1 %v1788_v60  ;;  %v1822_v60 = vpack.c.bf16 %v984_v58, %v982_v56  ;;  %v1824_v61 = vpack.c.bf16 %v989_v59, %v987_v43  ;;  %v1024_v56 = vld [vmem:[#allocation2 + $0xd50] sm:$0xff]  ;;  %v1029_v58 = vld [vmem:[#allocation2 + $0xd78] sm:$0xff] }
 0x33b   :  { %v1862_v43 = vpack.c.bf16 %v1024_v56, %v1022_v55  ;;  %v1864_v59 = vpack.c.bf16 %v1029_v58, %v1027_v57  ;;  %v1145_v56 = vld [vmem:[#allocation2 + $0xe60] sm:$0xff]  ;;  %v1147_v57 = vld [vmem:[#allocation2 + $0xe70] sm:$0xff]  ;;  %v1150_v58 = vld [vmem:[#allocation2 + $0xe88] sm:$0xff] }
 0x33d   :  { %1791 = vmatpush1.bf16.msra.mxu1 %v1790_v1  ;;  %v993_v1 = vld [vmem:[#allocation2 + $0xc58] sm:$0xff] }
 0x33e   :  { %1793 = vmatprep.subr.bf16.mxu1 %v1792_v2  ;;  %v1826_v2 = vpack.c.bf16 %v988_v63, %v986_v62  ;;  %v1828_v3 = vpack.c.bf16 %v993_v1, %v991_v0  ;;  %v1031_v62 = vld [vmem:[#allocation2 + $0xd88] sm:$0xff]  ;;  %v1033_v63 = vld [vmem:[#allocation2 + $0xd98] sm:$0xff] }
 0x33f   :  { %v1868_v1 = vpack.c.bf16 %v1033_v63, %v1031_v62  ;;  %v1151_v62 = vld [vmem:[#allocation2 + $0xe90] sm:$0xff]  ;;  %v1154_v63 = vld [vmem:[#allocation2 + $0xea8] sm:$0xff] }
 0x341   :  { %1795 = vmatpush1.bf16.msra.mxu1 %v1794_v7  ;;  %v997_v7 = vld [vmem:[#allocation2 + $0xc78] sm:$0xff] }
 0x342   :  { %1797 = vmatprep.subr.bf16.mxu1 %v1796_v8  ;;  %v1830_v8 = vpack.c.bf16 %v992_v5, %v990_v4  ;;  %v1832_v9 = vpack.c.bf16 %v997_v7, %v995_v6  ;;  %v1035_v4 = vld [vmem:[#allocation2 + $0xda8] sm:$0xff]  ;;  %v1037_v5 = vld [vmem:[#allocation2 + $0xdb8] sm:$0xff] }
 0x343   :  { %v1872_v7 = vpack.c.bf16 %v1037_v5, %v1035_v4  ;;  %v1155_v4 = vld [vmem:[#allocation2 + $0xeb0] sm:$0xff]  ;;  %v1158_v5 = vld [vmem:[#allocation2 + $0xec8] sm:$0xff] }
 0x345   :  { %1799 = vmatpush1.bf16.msra.mxu1 %v1798_v13  ;;  %v1001_v13 = vld [vmem:[#allocation2 + $0xc98] sm:$0xff] }
 0x346   :  { %1801 = vmatprep.subr.bf16.mxu1 %v1800_v14  ;;  %v1834_v14 = vpack.c.bf16 %v996_v11, %v994_v10  ;;  %v1836_v15 = vpack.c.bf16 %v1001_v13, %v999_v12  ;;  %v1039_v10 = vld [vmem:[#allocation2 + $0xdc8] sm:$0xff]  ;;  %v1041_v11 = vld [vmem:[#allocation2 + $0xdd8] sm:$0xff] }
 0x347   :  { %v1876_v13 = vpack.c.bf16 %v1041_v11, %v1039_v10  ;;  %v1159_v10 = vld [vmem:[#allocation2 + $0xed0] sm:$0xff]  ;;  %v1162_v11 = vld [vmem:[#allocation2 + $0xee8] sm:$0xff] }
 0x349   :  { %1803 = vmatpush1.bf16.msra.mxu1 %v1802_v19  ;;  %v1005_v19 = vld [vmem:[#allocation2 + $0xcb8] sm:$0xff] }
 0x34a   :  { %1805 = vmatprep.subr.bf16.mxu1 %v1804_v20  ;;  %v1838_v20 = vpack.c.bf16 %v1000_v17, %v998_v16  ;;  %v1840_v21 = vpack.c.bf16 %v1005_v19, %v1003_v18 }
 0x34d   :  { %1807 = vmatpush1.bf16.msra.mxu1 %v1806_v25  ;;  %v1009_v25 = vld [vmem:[#allocation2 + $0xcd8] sm:$0xff] }
 0x34e   :  { %1809 = vmatprep.subr.bf16.mxu1 %v1808_v26  ;;  %v1842_v26 = vpack.c.bf16 %v1004_v23, %v1002_v22  ;;  %v1844_v27 = vpack.c.bf16 %v1009_v25, %v1007_v24  ;;  %v1038_v23 = vld [vmem:[#allocation2 + $0xdc0] sm:$0xff]  ;;  %v1040_v24 = vld [vmem:[#allocation2 + $0xdd0] sm:$0xff] }
 0x34f   :  { %v1878_v25 = vpack.c.bf16 %v1040_v24, %v1038_v23  ;;  %v1170_v23 = vld [vmem:[#allocation2 + $0xf28] sm:$0xff]  ;;  %v1172_v24 = vld [vmem:[#allocation2 + $0xf38] sm:$0xff] }
 0x351   :  { %1811 = vmatpush1.bf16.msra.mxu1 %v1810_v33  ;;  %v1013_v33 = vld [vmem:[#allocation2 + $0xcf8] sm:$0xff] }
 0x352   :  { %1813 = vmatprep.subr.bf16.mxu1 %v1812_v34  ;;  %v1846_v34 = vpack.c.bf16 %v1008_v31, %v1006_v29  ;;  %v1848_v35 = vpack.c.bf16 %v1013_v33, %v1011_v32  ;;  %v1042_v31 = vld [vmem:[#allocation2 + $0xde0] sm:$0xff]  ;;  %v1044_v32 = vld [vmem:[#allocation2 + $0xdf0] sm:$0xff] }
 0x353   :  { %v1882_v33 = vpack.c.bf16 %v1044_v32, %v1042_v31  ;;  %v1174_v31 = vld [vmem:[#allocation2 + $0xf48] sm:$0xff]  ;;  %v1176_v32 = vld [vmem:[#allocation2 + $0xf58] sm:$0xff] }
 0x355   :  { %1815 = vmatpush1.bf16.msra.mxu1 %v1814_v47 }
 0x356   :  { %1817 = vmatprep.subr.bf16.mxu1 %v1816_v50  ;;  %v1020_v50 = vld [vmem:[#allocation2 + $0xd30] sm:$0xff] }
 0x359   :  { %1819 = vmatpush1.bf16.msra.mxu1 %v1818_v53  ;;  %v1858_v53 = vpack.c.bf16 %v1020_v50, %v1018_v49  ;;  %v1141_v50 = vld [vmem:[#allocation2 + $0xe40] sm:$0xff] }
 0x3ef   :  { %v672_v38 = vpop.f32.mrb[2].mxu1 }
 0x3f0   :  { %v673_v39 = vadd.f32 %v672_v38, %v599_v36  ;;  %v674_v40 = vpop.f32.mrb[3].mxu1  ;;  %v1010_v36 = vld [vmem:[#allocation2 + $0xce0] sm:$0xff]  ;;  %v1015_v38 = vld [vmem:[#allocation2 + $0xd08] sm:$0xff] }
 0x3f1   :  { %v675_v41 = vadd.f32 %v674_v40, %v603_v37  ;;  %v1012_v37 = vld [vmem:[#allocation2 + $0xcf0] sm:$0xff] }
 0x3f2   :  { %v677_v44 = vmax.f32 %v673_v39, 0.0  ;;  %v1017_v39 = vld [vmem:[#allocation2 + $0xd18] sm:$0xff]  ;;  %v1850_v40 = vpack.c.bf16 %v1012_v37, %v1010_v36  ;;  %v1133_v36 = vld [vmem:[#allocation2 + $0xe00] sm:$0xff] }
 0x3f3   :  { %v678_v42 = vmax.f32 %v675_v41, 0.0  ;;  %v1852_v41 = vpack.c.bf16 %v1017_v39, %v1015_v38  ;;  %v1135_v38 = vld [vmem:[#allocation2 + $0xe10] sm:$0xff]  ;;  %v1138_v39 = vld [vmem:[#allocation2 + $0xe28] sm:$0xff] }
 0x3f5   :  { %821 = vmatprep.mubr.f32.mxu0 %v678_v42  ;;  %v1014_v42 = vld [vmem:[#allocation2 + $0xd00] sm:$0xff] }
 0x3f6   :  { %822 = vmatmul.mubr.f32.vlgmr.msra.gmra.mrb[4].mxu0 %v677_v44  ;;  %v1016_v44 = vld [vmem:[#allocation2 + $0xd10] sm:$0xff] }
 0x3f7   :  { %1823 = vmatpush1.bf16.msra.mxu0 %v1822_v60  ;;  %v1854_v47 = vpack.c.bf16 %v1016_v44, %v1014_v42  ;;  %v1026_v60 = vld [vmem:[#allocation2 + $0xd60] sm:$0xff] }
 0x3f8   :  { %1825 = vmatprep.subr.bf16.mxu0 %v1824_v61  ;;  %v1028_v61 = vld [vmem:[#allocation2 + $0xd70] sm:$0xff]  ;;  %v1137_v44 = vld [vmem:[#allocation2 + $0xe20] sm:$0xff] }
 0x3f9   :  { %v1866_v0 = vpack.c.bf16 %v1028_v61, %v1026_v60  ;;  %v1149_v61 = vld [vmem:[#allocation2 + $0xe80] sm:$0xff] }
 0x3fb   :  { %1827 = vmatpush1.bf16.msra.mxu0 %v1826_v2  ;;  %v1030_v2 = vld [vmem:[#allocation2 + $0xd80] sm:$0xff] }
 0x3fc   :  { %1829 = vmatprep.subr.bf16.mxu0 %v1828_v3  ;;  %v1032_v3 = vld [vmem:[#allocation2 + $0xd90] sm:$0xff] }
 0x3fd   :  { %v1870_v6 = vpack.c.bf16 %v1032_v3, %v1030_v2  ;;  %v1153_v3 = vld [vmem:[#allocation2 + $0xea0] sm:$0xff] }
 0x3ff   :  { %1831 = vmatpush1.bf16.msra.mxu0 %v1830_v8  ;;  %v1034_v8 = vld [vmem:[#allocation2 + $0xda0] sm:$0xff] }
 0x400   :  { %1833 = vmatprep.subr.bf16.mxu0 %v1832_v9  ;;  %v1036_v9 = vld [vmem:[#allocation2 + $0xdb0] sm:$0xff] }
 0x401   :  { %v1874_v12 = vpack.c.bf16 %v1036_v9, %v1034_v8  ;;  %v1157_v9 = vld [vmem:[#allocation2 + $0xec0] sm:$0xff] }
 0x403   :  { %1835 = vmatpush1.bf16.msra.mxu0 %v1834_v14  ;;  %v745_v14 = vld [vmem:[#allocation4 + $0x8] sm:$0x3] }
 0x404   :  { %1837 = vmatprep.subr.bf16.mxu0 %v1836_v15  ;;  %v750_v15 = vrot.slane %v745_v14, %v2181_v28  ;;  %v754_v16 = vrot.slane %v745_v14, %v2183_v30 }
 0x407   :  { %1839 = vmatpush1.bf16.msra.mxu0 %v1838_v20 }
 0x408   :  { %1841 = vmatprep.subr.bf16.mxu0 %v1840_v21 }
 0x40b   :  { %1843 = vmatpush1.bf16.msra.mxu0 %v1842_v26  ;;  %v1043_v26 = vld [vmem:[#allocation2 + $0xde8] sm:$0xff] }
 0x40c   :  { %1845 = vmatprep.subr.bf16.mxu0 %v1844_v27  ;;  %v1045_v27 = vld [vmem:[#allocation2 + $0xdf8] sm:$0xff] }
 0x40d   :  { %v1880_v29 = vpack.c.bf16 %v1045_v27, %v1043_v26  ;;  %v1920_v26 = vpack.c.bf16 %v1172_v24, %v1170_v23  ;;  %v1169_v27 = vld [vmem:[#allocation2 + $0xf20] sm:$0xff]  ;;  %v1286_v23 = vld [vmem:[#allocation6 + $0x18] sm:$0xff]  ;;  %v1303_v24 = vld [vmem:[#allocation6 + $0xa0] sm:$0xff] }
 0x40f   :  { %1847 = vmatpush1.bf16.msra.mxu0 %v1846_v34  ;;  %v1134_v34 = vld [vmem:[#allocation2 + $0xe08] sm:$0xff] }
 0x410   :  { %1849 = vmatprep.subr.bf16.mxu0 %v1848_v35  ;;  %v1136_v35 = vld [vmem:[#allocation2 + $0xe18] sm:$0xff] }
 0x411   :  { %v1884_v37 = vpack.c.bf16 %v1136_v35, %v1134_v34  ;;  %v1924_v34 = vpack.c.bf16 %v1176_v32, %v1174_v31  ;;  %v1173_v35 = vld [vmem:[#allocation2 + $0xf40] sm:$0xff]  ;;  %v1288_v31 = vld [vmem:[#allocation6 + $0x28] sm:$0xff] }
 0x412   :  { %v1305_v32 = vld [vmem:[#allocation6 + $0xb0] sm:$0xff] }
 0x413   :  { %1851 = vmatpush1.bf16.msra.mxu0 %v1850_v40  ;;  %v1140_v40 = vld [vmem:[#allocation2 + $0xe38] sm:$0xff]  ;;  %1885 = vmatprep.subr.bf16.mxu1 %v1884_v37  ;;  %v1178_v37 = vld [vmem:[#allocation2 + $0xf68] sm:$0xff] }
 0x414   :  { %1853 = vmatprep.subr.bf16.mxu0 %v1852_v41  ;;  %v1886_v41 = vpack.c.bf16 %v1135_v38, %v1133_v36  ;;  %v1888_v42 = vpack.c.bf16 %v1140_v40, %v1138_v39  ;;  %v1175_v36 = vld [vmem:[#allocation2 + $0xf50] sm:$0xff]  ;;  %v1180_v38 = vld [vmem:[#allocation2 + $0xf78] sm:$0xff] }
 0x415   :  { %v1926_v39 = vpack.c.bf16 %v1175_v36, %v1173_v35  ;;  %v1928_v40 = vpack.c.bf16 %v1180_v38, %v1178_v37  ;;  %v1289_v36 = vld [vmem:[#allocation6 + $0x30] sm:$0xff]  ;;  %v1290_v37 = vld [vmem:[#allocation6 + $0x38] sm:$0xff]  ;;  %v1307_v38 = vld [vmem:[#allocation6 + $0xc0] sm:$0xff] }
 0x417   :  { %1855 = vmatpush1.bf16.msra.mxu0 %v1854_v47  ;;  %v1144_v47 = vld [vmem:[#allocation2 + $0xe58] sm:$0xff] }
 0x418   :  { %1857 = vmatprep.subr.bf16.mxu0 %v1856_v48  ;;  %v1890_v48 = vpack.c.bf16 %v1139_v45, %v1137_v44  ;;  %v1892_v49 = vpack.c.bf16 %v1144_v47, %v1142_v46  ;;  %v1182_v44 = vld [vmem:[#allocation2 + $0xf88] sm:$0xff]  ;;  %v1184_v45 = vld [vmem:[#allocation2 + $0xf98] sm:$0xff] }
 0x419   :  { %v1932_v47 = vpack.c.bf16 %v1184_v45, %v1182_v44  ;;  %v1292_v44 = vld [vmem:[#allocation6 + $0x48] sm:$0xff]  ;;  %v1309_v45 = vld [vmem:[#allocation6 + $0xd0] sm:$0xff] }
 0x41b   :  { %1859 = vmatpush1.bf16.msra.mxu0 %v1858_v53  ;;  %v1148_v53 = vld [vmem:[#allocation2 + $0xe78] sm:$0xff] }
 0x41c   :  { %1861 = vmatprep.subr.bf16.mxu0 %v1860_v54  ;;  %v1894_v54 = vpack.c.bf16 %v1143_v51, %v1141_v50  ;;  %v1896_v55 = vpack.c.bf16 %v1148_v53, %v1146_v52  ;;  %v1186_v50 = vld [vmem:[#allocation2 + $0xfa8] sm:$0xff]  ;;  %v1188_v51 = vld [vmem:[#allocation2 + $0xfb8] sm:$0xff] }
 0x41d   :  { %v1936_v53 = vpack.c.bf16 %v1188_v51, %v1186_v50  ;;  %v1294_v50 = vld [vmem:[#allocation6 + $0x58] sm:$0xff]  ;;  %v1311_v51 = vld [vmem:[#allocation6 + $0xe0] sm:$0xff] }
 0x41f   :  { %1863 = vmatpush1.bf16.msra.mxu0 %v1862_v43  ;;  %v1152_v43 = vld [vmem:[#allocation2 + $0xe98] sm:$0xff] }
 0x420   :  { %1865 = vmatprep.subr.bf16.mxu0 %v1864_v59  ;;  %v1898_v59 = vpack.c.bf16 %v1147_v57, %v1145_v56  ;;  %v1900_v60 = vpack.c.bf16 %v1152_v43, %v1150_v58  ;;  %v1190_v56 = vld [vmem:[#allocation2 + $0xfc8] sm:$0xff]  ;;  %v1192_v57 = vld [vmem:[#allocation2 + $0xfd8] sm:$0xff] }
 0x421   :  { %v1940_v43 = vpack.c.bf16 %v1192_v57, %v1190_v56 }
 0x423   :  { %1867 = vmatpush1.bf16.msra.mxu0 %v1866_v0  ;;  %v1156_v0 = vld [vmem:[#allocation2 + $0xeb8] sm:$0xff] }
 0x424   :  { %1869 = vmatprep.subr.bf16.mxu0 %v1868_v1  ;;  %v1902_v1 = vpack.c.bf16 %v1151_v62, %v1149_v61  ;;  %v1904_v2 = vpack.c.bf16 %v1156_v0, %v1154_v63 }
 0x427   :  { %1871 = vmatpush1.bf16.msra.mxu0 %v1870_v6  ;;  %v1160_v6 = vld [vmem:[#allocation2 + $0xed8] sm:$0xff] }
 0x428   :  { %1873 = vmatprep.subr.bf16.mxu0 %v1872_v7  ;;  %v1906_v7 = vpack.c.bf16 %v1155_v4, %v1153_v3  ;;  %v1908_v8 = vpack.c.bf16 %v1160_v6, %v1158_v5  ;;  %v1189_v4 = vld [vmem:[#allocation2 + $0xfc0] sm:$0xff]  ;;  %v1191_v5 = vld [vmem:[#allocation2 + $0xfd0] sm:$0xff] }
 0x429   :  { %v1942_v6 = vpack.c.bf16 %v1191_v5, %v1189_v4  ;;  %v1297_v5 = vld [vmem:[#allocation6 + $0x70] sm:$0xff] }
 0x42b   :  { %1875 = vmatpush1.bf16.msra.mxu0 %v1874_v12  ;;  %v1164_v12 = vld [vmem:[#allocation2 + $0xef8] sm:$0xff] }
 0x42c   :  { %1877 = vmatprep.subr.bf16.mxu0 %v1876_v13  ;;  %v1910_v13 = vpack.c.bf16 %v1159_v10, %v1157_v9  ;;  %v1912_v14 = vpack.c.bf16 %v1164_v12, %v1162_v11  ;;  %v1193_v10 = vld [vmem:[#allocation2 + $0xfe0] sm:$0xff]  ;;  %v1195_v11 = vld [vmem:[#allocation2 + $0xff0] sm:$0xff] }
 0x42d   :  { %v1946_v12 = vpack.c.bf16 %v1195_v11, %v1193_v10 }
 0x42f   :  { %1879 = vmatpush1.bf16.msra.mxu0 %v1878_v25 }
 0x430   :  { %1881 = vmatprep.subr.bf16.mxu0 %v1880_v29  ;;  %v1171_v29 = vld [vmem:[#allocation2 + $0xf30] sm:$0xff] }
 0x433   :  { %1883 = vmatpush1.bf16.msra.mxu0 %v1882_v33  ;;  %v1922_v33 = vpack.c.bf16 %v1171_v29, %v1169_v27  ;;  %v1287_v29 = vld [vmem:[#allocation6 + $0x20] sm:$0xff] }
 0x4c9   :  { %v823_v17 = vpop.f32.mrb[4].mxu0 }
 0x4ca   :  { %v824_v18 = vadd.f32 %v823_v17, %v750_v15  ;;  %v825_v19 = vpop.f32.mrb[5].mxu0  ;;  %v1161_v15 = vld [vmem:[#allocation2 + $0xee0] sm:$0xff]  ;;  %v1166_v17 = vld [vmem:[#allocation2 + $0xf08] sm:$0xff] }
 0x4cb   :  { %v826_v20 = vadd.f32 %v825_v19, %v754_v16  ;;  %v1163_v16 = vld [vmem:[#allocation2 + $0xef0] sm:$0xff] }
 0x4cc   :  { %v828_v22 = vmax.f32 %v824_v18, 0.0  ;;  %v1168_v18 = vld [vmem:[#allocation2 + $0xf18] sm:$0xff]  ;;  %v1914_v19 = vpack.c.bf16 %v1163_v16, %v1161_v15  ;;  %v1283_v15 = vld [vmem:[#allocation6] sm:$0xff] }
 0x4cd   :  { %v829_v21 = vmax.f32 %v826_v20, 0.0  ;;  %v1916_v20 = vpack.c.bf16 %v1168_v18, %v1166_v17  ;;  %v1284_v17 = vld [vmem:[#allocation6 + $0x8] sm:$0xff]  ;;  %v1301_v18 = vld [vmem:[#allocation6 + $0x90] sm:$0xff] }
 0x4cf   :  { %972 = vmatprep.mubr.f32.mxu1 %v829_v21  ;;  %v1165_v21 = vld [vmem:[#allocation2 + $0xf00] sm:$0xff] }
 0x4d0   :  { %973 = vmatmul.mubr.f32.vlgmr.msra.gmra.mrb[4].mxu1 %v828_v22  ;;  %v1167_v22 = vld [vmem:[#allocation2 + $0xf10] sm:$0xff] }
 0x4d1   :  { %1887 = vmatpush1.bf16.msra.mxu1 %v1886_v41  ;;  %v1918_v25 = vpack.c.bf16 %v1167_v22, %v1165_v21  ;;  %v1177_v41 = vld [vmem:[#allocation2 + $0xf60] sm:$0xff] }
 0x4d2   :  { %1889 = vmatprep.subr.bf16.mxu1 %v1888_v42  ;;  %v1179_v42 = vld [vmem:[#allocation2 + $0xf70] sm:$0xff]  ;;  %v1285_v22 = vld [vmem:[#allocation6 + $0x10] sm:$0xff] }
 0x4d3   :  { %v1930_v46 = vpack.c.bf16 %v1179_v42, %v1177_v41  ;;  %v1291_v42 = vld [vmem:[#allocation6 + $0x40] sm:$0xff] }
 0x4d5   :  { %1891 = vmatpush1.bf16.msra.mxu1 %v1890_v48  ;;  %v1181_v48 = vld [vmem:[#allocation2 + $0xf80] sm:$0xff] }
 0x4d6   :  { %1893 = vmatprep.subr.bf16.mxu1 %v1892_v49  ;;  %v1183_v49 = vld [vmem:[#allocation2 + $0xf90] sm:$0xff] }
 0x4d7   :  { %v1934_v52 = vpack.c.bf16 %v1183_v49, %v1181_v48  ;;  %v1293_v49 = vld [vmem:[#allocation6 + $0x50] sm:$0xff] }
 0x4d9   :  { %1895 = vmatpush1.bf16.msra.mxu1 %v1894_v54  ;;  %v1185_v54 = vld [vmem:[#allocation2 + $0xfa0] sm:$0xff] }
 0x4da   :  { %1897 = vmatprep.subr.bf16.mxu1 %v1896_v55  ;;  %v1187_v55 = vld [vmem:[#allocation2 + $0xfb0] sm:$0xff] }
 0x4db   :  { %v1938_v58 = vpack.c.bf16 %v1187_v55, %v1185_v54  ;;  %v1047_v55 = vld [vmem:[#allocation4 + $0xc] sm:$0x3] }
 0x4dc   :  { %v1052_v56 = vrot.slane %v1047_v55, %v2181_v28  ;;  %v1056_v57 = vrot.slane %v1047_v55, %v2183_v30 }
 0x4dd   :  { %1899 = vmatpush1.bf16.msra.mxu1 %v1898_v59  ;;  %v896_v59 = vld [vmem:[#allocation4 + $0xa] sm:$0x3] }
 0x4de   :  { %1901 = vmatprep.subr.bf16.mxu1 %v1900_v60  ;;  %v901_v60 = vrot.slane %v896_v59, %v2181_v28  ;;  %v905_v61 = vrot.slane %v896_v59, %v2183_v30 }
 0x4e1   :  { %1903 = vmatpush1.bf16.msra.mxu1 %v1902_v1 }
 0x4e2   :  { %1905 = vmatprep.subr.bf16.mxu1 %v1904_v2 }
 0x4e5   :  { %1907 = vmatpush1.bf16.msra.mxu1 %v1906_v7  ;;  %v1194_v7 = vld [vmem:[#allocation2 + $0xfe8] sm:$0xff] }
 0x4e6   :  { %1909 = vmatprep.subr.bf16.mxu1 %v1908_v8  ;;  %v1196_v8 = vld [vmem:[#allocation2 + $0xff8] sm:$0xff] }
 0x4e7   :  { %v1944_v9 = vpack.c.bf16 %v1196_v8, %v1194_v7  ;;  %v1198_v8 = vld [vmem:[#allocation4 + $0xe] sm:$0x3] }
 0x4e8   :  { %v1207_v10 = vrot.slane %v1198_v8, %v2183_v30 }
 0x4e9   :  { %1911 = vmatpush1.bf16.msra.mxu1 %v1910_v13  ;;  %v1299_v13 = vld [vmem:[#allocation6 + $0x80] sm:$0xff] }
 0x4ea   :  { %1913 = vmatprep.subr.bf16.mxu1 %v1912_v14  ;;  %v1300_v14 = vld [vmem:[#allocation6 + $0x88] sm:$0xff] }
 0x4eb   :  { %v1948_v16 = vpack.c.bf16 %v1300_v14, %v1299_v13 }
 0x4ed   :  { %1915 = vmatpush1.bf16.msra.mxu1 %v1914_v19  ;;  %v1302_v19 = vld [vmem:[#allocation6 + $0x98] sm:$0xff]  ;;  %1949 = vmatprep.subr.bf16.mxu0 %v1948_v16 }
 0x4ee   :  { %1917 = vmatprep.subr.bf16.mxu1 %v1916_v20  ;;  %v1950_v20 = vpack.c.bf16 %v1284_v17, %v1283_v15  ;;  %v1952_v21 = vpack.c.bf16 %v1302_v19, %v1301_v18  ;;  %v1400_v18 = vld [vmem:[#allocation7] ss:$0 sm:$0xff] }
 0x4f1   :  { %1919 = vmatpush1.bf16.msra.mxu1 %v1918_v25  ;;  %v1304_v25 = vld [vmem:[#allocation6 + $0xa8] sm:$0xff] }
 0x4f2   :  { %1921 = vmatprep.subr.bf16.mxu1 %v1920_v26  ;;  %v1954_v26 = vpack.c.bf16 %v1286_v23, %v1285_v22  ;;  %v1956_v27 = vpack.c.bf16 %v1304_v25, %v1303_v24 }
 0x4f5   :  { %1923 = vmatpush1.bf16.msra.mxu1 %v1922_v33  ;;  %v1306_v33 = vld [vmem:[#allocation6 + $0xb8] sm:$0xff] }
 0x4f6   :  { %1925 = vmatprep.subr.bf16.mxu1 %v1924_v34  ;;  %v1958_v34 = vpack.c.bf16 %v1288_v31, %v1287_v29  ;;  %v1960_v35 = vpack.c.bf16 %v1306_v33, %v1305_v32 }
 0x4f9   :  { %1927 = vmatpush1.bf16.msra.mxu1 %v1926_v39  ;;  %v1308_v39 = vld [vmem:[#allocation6 + $0xc8] sm:$0xff] }
 0x4fa   :  { %1929 = vmatprep.subr.bf16.mxu1 %v1928_v40  ;;  %v1962_v40 = vpack.c.bf16 %v1290_v37, %v1289_v36  ;;  %v1964_v41 = vpack.c.bf16 %v1308_v39, %v1307_v38 }
 0x4fd   :  { %1931 = vmatpush1.bf16.msra.mxu1 %v1930_v46  ;;  %v1310_v46 = vld [vmem:[#allocation6 + $0xd8] sm:$0xff] }
 0x4fe   :  { %1933 = vmatprep.subr.bf16.mxu1 %v1932_v47  ;;  %v1966_v47 = vpack.c.bf16 %v1292_v44, %v1291_v42  ;;  %v1968_v48 = vpack.c.bf16 %v1310_v46, %v1309_v45 }
 0x501   :  { %1935 = vmatpush1.bf16.msra.mxu1 %v1934_v52  ;;  %v1312_v52 = vld [vmem:[#allocation6 + $0xe8] sm:$0xff] }
 0x502   :  { %1937 = vmatprep.subr.bf16.mxu1 %v1936_v53  ;;  %v1970_v53 = vpack.c.bf16 %v1294_v50, %v1293_v49  ;;  %v1972_v54 = vpack.c.bf16 %v1312_v52, %v1311_v51 }
 0x505   :  { %1939 = vmatpush1.bf16.msra.mxu1 %v1938_v58 }
 0x506   :  { %1941 = vmatprep.subr.bf16.mxu1 %v1940_v43 }
 0x509   :  { %1943 = vmatpush1.bf16.msra.mxu1 %v1942_v6  ;;  %v1298_v6 = vld [vmem:[#allocation6 + $0x78] sm:$0xff] }
 0x50a   :  { %1945 = vmatprep.subr.bf16.mxu1 %v1944_v9  ;;  %v1978_v7 = vpack.c.bf16 %v1298_v6, %v1297_v5  ;;  %v1203_v9 = vrot.slane %v1198_v8, %v2181_v28 }
 0x50d   :  { %1947 = vmatpush1.bf16.msra.mxu1 %v1946_v12 }
 0x5a3   :  { %v974_v62 = vpop.f32.mrb[4].mxu1 }
 0x5a4   :  { %v975_v63 = vadd.f32 %v974_v62, %v901_v60  ;;  %v976_v0 = vpop.f32.mrb[5].mxu1 }
 0x5a5   :  { %v977_v1 = vadd.f32 %v976_v0, %v905_v61  ;;  %v1296_v0 = vld [vmem:[#allocation6 + $0x68] sm:$0xff] }
 0x5a6   :  { %v979_v3 = vmax.f32 %v975_v63, 0.0  ;;  %v1295_v63 = vld [vmem:[#allocation6 + $0x60] sm:$0xff] }
 0x5a7   :  { %v980_v2 = vmax.f32 %v977_v1, 0.0  ;;  %v1974_v1 = vpack.c.bf16 %v1296_v0, %v1295_v63 }
 0x5a9   :  { %1123 = vmatprep.mubr.f32.mxu0 %v980_v2  ;;  %v1313_v2 = vld [vmem:[#allocation6 + $0xf0] sm:$0xff] }
 0x5aa   :  { %1124 = vmatmul.mubr.f32.vlgmr.msra.gmra.mrb[6].mxu0 %v979_v3  ;;  %v1314_v3 = vld [vmem:[#allocation6 + $0xf8] sm:$0xff] }
 0x5ab   :  { %1951 = vmatpush3.bf16.msra.mxu0 %v1950_v20  ;;  %v1976_v4 = vpack.c.bf16 %v1314_v3, %v1313_v2 }
 0x5ac   :  { %1953 = vmatprep.subr.bf16.mxu0 %v1952_v21 }
 0x5af   :  { %1955 = vmatpush3.bf16.msra.mxu0 %v1954_v26 }
 0x5b0   :  { %1957 = vmatprep.subr.bf16.mxu0 %v1956_v27 }
 0x5b3   :  { %1959 = vmatpush3.bf16.msra.mxu0 %v1958_v34 }
 0x5b4   :  { %1961 = vmatprep.subr.bf16.mxu0 %v1960_v35 }
 0x5b7   :  { %1963 = vmatpush3.bf16.msra.mxu0 %v1962_v40 }
 0x5b8   :  { %1965 = vmatprep.subr.bf16.mxu0 %v1964_v41 }
 0x5bb   :  { %1967 = vmatpush3.bf16.msra.mxu0 %v1966_v47 }
 0x5bc   :  { %1969 = vmatprep.subr.bf16.mxu0 %v1968_v48 }
 0x5bf   :  { %1971 = vmatpush3.bf16.msra.mxu0 %v1970_v53 }
 0x5c0   :  { %1973 = vmatprep.subr.bf16.mxu0 %v1972_v54 }
 0x5c3   :  { %1975 = vmatpush3.bf16.msra.mxu0 %v1974_v1 }
 0x5c4   :  { %1977 = vmatprep.subr.bf16.mxu0 %v1976_v4 }
 0x5c7   :  { %1979 = vmatpush3.bf16.msra.mxu0 %v1978_v7 }
 0x67d   :  { %v1125_v58 = vpop.f32.mrb[6].mxu0 }
 0x67e   :  { %v1126_v43 = vadd.f32 %v1125_v58, %v1052_v56  ;;  %v1127_v59 = vpop.f32.mrb[7].mxu0 }
 0x67f   :  { %v1128_v60 = vadd.f32 %v1127_v59, %v1056_v57 }
 0x680   :  { %v1130_v62 = vmax.f32 %v1126_v43, 0.0 }
 0x681   :  { %v1131_v61 = vmax.f32 %v1128_v60, 0.0 }
 0x683   :  { %1274 = vmatprep.mubr.f32.mxu1 %v1131_v61 }
 0x684   :  { %1275 = vmatmul.mubr.f32.vlgmr.msra.gmra.mrb[6].mxu1 %v1130_v62 }
 0x757   :  { %v1276_v11 = vpop.f32.mrb[6].mxu1 }
 0x758   :  { %v1277_v12 = vadd.f32 %v1276_v11, %v1203_v9  ;;  %v1278_v13 = vpop.f32.mrb[7].mxu1 }
 0x759   :  { %v1279_v14 = vadd.f32 %v1278_v13, %v1207_v10 }
 0x75a   :  { %v1281_v16 = vmax.f32 %v1277_v12, 0.0 }
 0x75b   :  { %v1282_v15 = vmax.f32 %v1279_v14, 0.0 }
 0x75d   :  { %1386 = vmatprep.mubr.f32.mxu0 %v1282_v15 }
 0x75e   :  { %1387 = vmatmul.mubr.f32.vlgmr.msra.gmra.mrb[8].mxu0 %v1281_v16 }
 0x831   :  { %v1433_v17 = vpop.f32.mrb[8].mxu0 }
 0x832   :  { %v1434_v19 = vpop.f32.mrb[9].mxu0 }
 0x833   :  { %v1435_v20 = vadd.f32 %v1434_v19, %v1433_v17 }
 0x835   :  { %v1389_v21 = vadd.f32 %v1435_v20, %v1400_v18 }
 0x837   :  { %1392 = vst [vmem:[%s2209_s5] sm:$0xf] %v1389_v21 }
 0x838   :  { %1397 = vsyncpa [#allocation3], 1 }
 0x839   :  { %1398 = vsyncpa [#allocation5], 1 }
 0x83a   :  { %1399 = vsyncpa [#allocation8], 1 }

</bundles_post_ra>
